<compile_context>
chip_gen: v7x
topology: tpu7x:2x2x1
jax: 0.10.0
libtpu: 0.0.40
codegen_flags: <defaults>
</compile_context>

<pallas_src>
import jax
import jax.numpy as jnp
from jax import lax
from jax.experimental import pallas as pl
from jax.experimental.pallas import tpu as pltpu

# Small, module-consistent, lane/sublane-aligned sizes
# (original: embed=128, hidden=1024, layers=2).
VOCAB = 128     # multiple of 128 -> lane-dense logits stores
EMBED = 128     # matches the module's embed_size
HIDDEN = 128    # small stand-in for 1024; keeps every gate slice 128-lane aligned
NUM_LAYERS = 2
BATCH = 8       # fills all 8 f32 sublanes / MXU rows
SEQ = 8


# ------------------------------ Fused RNNLM kernel ------------------------------
def _rnnlm_kernel(x_ref, h0_ref, c0_ref,
                  wih0_ref, whh0_ref, b0_ref, b1_ref, lb_ref,
                  w1_hbm, lw_hbm,
                  logits_ref, hN_ref, cN_ref,
                  g_s, y1_s, w1_vmem, lw_vmem, dma_sem):
    T, B, E = x_ref.shape
    H = whh0_ref.shape[0]
    cdt = jnp.bfloat16  # matmul operand dtype (f32 accumulation everywhere)

    # Kick off layer-1 / vocab-projection weight DMA so it overlaps layer-0 compute
    # (with grid=(1,) these would otherwise be exposed prologue latency).
    w1_copy = pltpu.make_async_copy(w1_hbm, w1_vmem, dma_sem.at[0])
    lw_copy = pltpu.make_async_copy(lw_hbm, lw_vmem, dma_sem.at[1])
    w1_copy.start()
    lw_copy.start()

    # ---- layer-0 input projection hoisted out of the recurrence: one MXU matmul ----
    g_s[...] = (jnp.dot(x_ref[...].reshape(T * B, E), wih0_ref[...],
                        preferred_element_type=jnp.float32)
                + b0_ref[...]).reshape(T, B, 4 * H)

    def lstm_cell(gates, c):
        # Gate columns pre-permuted to [i, f, o, g] -> one sigmoid slab + one tanh slab.
        sfo = jax.nn.sigmoid(gates[:, :3 * H])
        g = jnp.tanh(gates[:, 3 * H:])
        c_new = sfo[:, H:2 * H] * c + sfo[:, :H] * g
        h_new = sfo[:, 2 * H:3 * H] * jnp.tanh(c_new)
        return h_new, c_new

    def l0_step(t, h, c):
        # Weight load inside the step (no full-vreg-file hoist of W_hh).
        gates = g_s[t] + jnp.dot(h.astype(cdt), whh0_ref[...],
                                 preferred_element_type=jnp.float32)
        return lstm_cell(gates, c)

    def l1_step(t, x_in, h, c):
        # Fused input + recurrent projection: [y0_t ; h1] @ [W_ih1^T ; W_hh1^T], K=2H.
        cat = jnp.concatenate([x_in, h], axis=-1).astype(cdt)      # (B, 2H)
        gates = (jnp.dot(cat, w1_vmem[...], preferred_element_type=jnp.float32)
                 + b1_ref[...])
        h_new, c_new = lstm_cell(gates, c)
        y1_s[t] = h_new
        return h_new, c_new

    # Layer-1 weights are needed from super-step 1 onward.
    w1_copy.wait()

    # ---- skewed two-layer pipeline ----
    # Super-step s: layer-0 processes t=s, layer-1 processes t=s-1 using the carried
    # layer-0 hidden from the previous super-step -> independent work inside the body.
    h0c, c0c = l0_step(0, h0_ref[0], c0_ref[0])

    def superstep(s, carry):
        h0c, c0c, h1c, c1c = carry
        h1n, c1n = l1_step(s - 1, h0c, h1c, c1c)
        h0n, c0n = l0_step(s, h0c, c0c)
        return (h0n, c0n, h1n, c1n)

    h0c, c0c, h1c, c1c = lax.fori_loop(
        1, T, superstep, (h0c, c0c, h0_ref[1], c0_ref[1]), unroll=True)
    h1c, c1c = l1_step(T - 1, h0c, h1c, c1c)   # drain layer-1's last step

    hN_ref[0] = h0c
    cN_ref[0] = c0c
    hN_ref[1] = h1c
    cN_ref[1] = c1c

    # ---- vocab projection, time-major (no in-kernel transpose; lane-dense stores) ----
    lw_copy.wait()
    logits_ref[...] = (jnp.dot(y1_s[...].reshape(T * B, H).astype(cdt),
                               lw_vmem[...], preferred_element_type=jnp.float32)
                       + lb_ref[...])


def rnnlm_pallas(x_tbe, h0, c0, wih0_T, whh0_T, b0, b1, lb, w1s_T, lw_T):
    T, B, E = x_tbe.shape
    L, _, H = h0.shape
    V = lw_T.shape[1]

    def full(shape):
        return pl.BlockSpec(shape, lambda i, _s=len(shape): (0,) * _s)

    grid_spec = pltpu.PrefetchScalarGridSpec(
        num_scalar_prefetch=0,
        grid=(1,),                       # whole problem is VMEM-resident in one invocation
        in_specs=[
            full((T, B, E)),             # time-major embedded tokens (bf16)
            full((L, B, H)),             # h0
            full((L, B, H)),             # c0
            full((E, 4 * H)),            # W_ih^T layer 0 (bf16, gate order i,f,o,g)
            full((H, 4 * H)),            # W_hh^T layer 0 (bf16)
            full((1, 4 * H)),            # combined bias layer 0
            full((1, 4 * H)),            # combined bias layer 1
            full((1, V)),                # linear bias
            pl.BlockSpec(memory_space=pl.ANY),   # stacked [W_ih1^T ; W_hh1^T] (HBM, manual DMA)
            pl.BlockSpec(memory_space=pl.ANY),   # linear weight^T (HBM, manual DMA)
        ],
        out_specs=[
            full((T * B, V)),            # logits, time-major (wrapper reorders rows)
            full((L, B, H)),             # final h
            full((L, B, H)),             # final c
        ],
        scratch_shapes=[
            pltpu.VMEM((T, B, 4 * H), jnp.float32),    # hoisted layer-0 input gates
            pltpu.VMEM((T, B, H), jnp.float32),        # layer-1 hidden outputs
            pltpu.VMEM((2 * H, 4 * H), jnp.bfloat16),  # layer-1 stacked weights
            pltpu.VMEM((H, V), jnp.bfloat16),          # vocab projection weights
            pltpu.SemaphoreType.DMA((2,)),
        ],
    )
    return pl.pallas_call(
        _rnnlm_kernel,
        out_shape=(
            jax.ShapeDtypeStruct((T * B, V), jnp.float32),
            jax.ShapeDtypeStruct((L, B, H), jnp.float32),
            jax.ShapeDtypeStruct((L, B, H), jnp.float32),
        ),
        grid_spec=grid_spec,
        compiler_params=pltpu.CompilerParams(
            dimension_semantics=("arbitrary",),
            vmem_limit_bytes=32 * 1024 * 1024),
    )(x_tbe, h0, c0, wih0_T, whh0_T, b0, b1, lb, w1s_T, lw_T)


# ------------------------------ Parameters ------------------------------
def init_params(key):
    """Raw parameters in PyTorch layout / gate order (i, f, g, o)."""
    ks = jax.random.split(key, 3 + 4 * NUM_LAYERS)
    params = {}
    params["embed"] = jax.random.uniform(ks[0], (VOCAB, EMBED), jnp.float32, -0.1, 0.1)
    params["lin_w"] = jax.random.uniform(ks[1], (VOCAB, HIDDEN), jnp.float32, -0.1, 0.1)
    params["lin_b"] = jnp.zeros((VOCAB,), jnp.float32)
    stdv = 1.0 / (HIDDEN ** 0.5)
    for l in range(NUM_LAYERS):
        in_sz = EMBED if l == 0 else HIDDEN
        base = 3 + 4 * l
        params[f"wih{l}"] = jax.random.uniform(ks[base + 0], (4 * HIDDEN, in_sz), jnp.float32, -stdv, stdv)
        params[f"whh{l}"] = jax.random.uniform(ks[base + 1], (4 * HIDDEN, HIDDEN), jnp.float32, -stdv, stdv)
        params[f"bih{l}"] = jax.random.uniform(ks[base + 2], (4 * HIDDEN,), jnp.float32, -stdv, stdv)
        params[f"bhh{l}"] = jax.random.uniform(ks[base + 3], (4 * HIDDEN,), jnp.float32, -stdv, stdv)
    return params


def _perm_ifog(w):
    """Permute PyTorch gate blocks (i, f, g, o) -> kernel order (i, f, o, g) along axis 0."""
    H = w.shape[0] // 4
    return jnp.concatenate([w[:H], w[H:2 * H], w[3 * H:], w[2 * H:3 * H]], axis=0)


def pack_params(raw):
    """Kernel-ready layout: gate-permuted, transposed, bias-combined, bf16 weights,
    layer-1 input/recurrent weights stacked for the fused K=2H matmul."""
    p = {"embed": raw["embed"]}
    wih0 = _perm_ifog(raw["wih0"])
    whh0 = _perm_ifog(raw["whh0"])
    wih1 = _perm_ifog(raw["wih1"])
    whh1 = _perm_ifog(raw["whh1"])
    p["wih0_T"] = wih0.T.astype(jnp.bfloat16)                       # (E, 4H)
    p["whh0_T"] = whh0.T.astype(jnp.bfloat16)                       # (H, 4H)
    p["b0"] = _perm_ifog(raw["bih0"] + raw["bhh0"])[None, :]        # (1, 4H) f32
    p["w1s_T"] = jnp.concatenate([wih1.T, whh1.T], axis=0).astype(jnp.bfloat16)  # (2H, 4H)
    p["b1"] = _perm_ifog(raw["bih1"] + raw["bhh1"])[None, :]        # (1, 4H) f32
    p["lw_T"] = raw["lin_w"].T.astype(jnp.bfloat16)                 # (H, V)
    p["lb"] = raw["lin_b"][None, :]                                 # (1, V) f32
    return p


# ------------------------------ Forward ------------------------------
@jax.jit
def rnnlm_forward(packed, tokens, h):
    h0, c0 = h  # each (L, B, H)
    B, T = tokens.shape
    # TODO(synk): embedding gather stays as XLA glue; a manual Pallas DMA-gather is not
    # worthwhile at these sizes.
    x_tbe = jnp.take(packed["embed"], tokens.T, axis=0).astype(jnp.bfloat16)  # (T, B, E)
    logits_tm, hN, cN = rnnlm_pallas(
        x_tbe, h0, c0,
        packed["wih0_T"], packed["whh0_T"], packed["b0"],
        packed["b1"], packed["lb"], packed["w1s_T"], packed["lw_T"])
    # Kernel emits time-major rows; reorder to PyTorch's out.view(B*T, H) batch-major order.
    logits = logits_tm.reshape(T, B, -1).transpose(1, 0, 2).reshape(B * T, -1)
    return logits, (hN, cN)


# ------------------------------ Pure-JAX reference (f32, PyTorch gate order) ------------------------------
def ref_forward(raw, tokens, h):
    h0, c0 = h
    x = raw["embed"][tokens]  # (B, T, E)
    h_finals, c_finals = [], []
    for l in range(NUM_LAYERS):
        wih, whh = raw[f"wih{l}"], raw[f"whh{l}"]
        b = raw[f"bih{l}"] + raw[f"bhh{l}"]

        def step(carry, xt, wih=wih, whh=whh, b=b):
            hh, cc = carry
            g = xt @ wih.T + hh @ whh.T + b
            i, f, gg, o = jnp.split(g, 4, axis=-1)
            i, f, o = jax.nn.sigmoid(i), jax.nn.sigmoid(f), jax.nn.sigmoid(o)
            gg = jnp.tanh(gg)
            cc = f * cc + i * gg
            hh = o * jnp.tanh(cc)
            return (hh, cc), hh

        (hN, cN), out = lax.scan(step, (h0[l], c0[l]), jnp.transpose(x, (1, 0, 2)))
        x = jnp.transpose(out, (1, 0, 2))
        h_finals.append(hN)
        c_finals.append(cN)
    logits = x.reshape(-1, HIDDEN) @ raw["lin_w"].T + raw["lin_b"]
    return logits, (jnp.stack(h_finals), jnp.stack(c_finals))


if __name__ == "__main__":
    key = jax.random.PRNGKey(0)
    kp, kt, kh, kc = jax.random.split(key, 4)
    raw = init_params(kp)
    packed = pack_params(raw)
    tokens = jax.random.randint(kt, (BATCH, SEQ), 0, VOCAB, dtype=jnp.int32)
    h0 = jax.random.normal(kh, (NUM_LAYERS, BATCH, HIDDEN), jnp.float32) * 0.1
    c0 = jax.random.normal(kc, (NUM_LAYERS, BATCH, HIDDEN), jnp.float32) * 0.1

    logits, (hN, cN) = rnnlm_forward(packed, tokens, (h0, c0))
    jax.block_until_ready((logits, hN, cN))

    ref_logits, (ref_h, ref_c) = ref_forward(raw, tokens, (h0, c0))
    assert logits.shape == (BATCH * SEQ, VOCAB)
    assert hN.shape == (NUM_LAYERS, BATCH, HIDDEN)
    assert cN.shape == (NUM_LAYERS, BATCH, HIDDEN)
    # bf16 matmul operands (f32 accumulation) -> looser tolerance than the all-f32 version.
    assert jnp.allclose(logits, ref_logits, atol=2e-2, rtol=2e-2)
    assert jnp.allclose(hN, ref_h, atol=2e-2, rtol=2e-2)
    assert jnp.allclose(cN, ref_c, atol=2e-2, rtol=2e-2)

    print("KERNEL_OK")
</pallas_src>

<mosaic_0001>
module attributes {stable_mosaic.version = 11 : i64} {
  func.func @_rnnlm_kernel(%arg0: i32, %arg1: memref<8x8x128xbf16, #tpu.memory_space<vmem>>, %arg2: memref<2x8x128xf32, #tpu.memory_space<vmem>>, %arg3: memref<2x8x128xf32, #tpu.memory_space<vmem>>, %arg4: memref<128x512xbf16, #tpu.memory_space<vmem>>, %arg5: memref<128x512xbf16, #tpu.memory_space<vmem>>, %arg6: memref<1x512xf32, #tpu.memory_space<vmem>>, %arg7: memref<1x512xf32, #tpu.memory_space<vmem>>, %arg8: memref<1x128xf32, #tpu.memory_space<vmem>>, %arg9: memref<256x512xbf16, #tpu.memory_space<any>>, %arg10: memref<128x128xbf16, #tpu.memory_space<any>>, %arg11: memref<64x128xf32, #tpu.memory_space<vmem>>, %arg12: memref<2x8x128xf32, #tpu.memory_space<vmem>>, %arg13: memref<2x8x128xf32, #tpu.memory_space<vmem>>, %arg14: memref<8x8x512xf32, #tpu.memory_space<vmem>>, %arg15: memref<8x8x128xf32, #tpu.memory_space<vmem>>, %arg16: memref<256x512xbf16, #tpu.memory_space<vmem>>, %arg17: memref<128x128xbf16, #tpu.memory_space<vmem>>, %arg18: memref<2x!tpu.dma_semaphore, #tpu.memory_space<semaphore_mem>>) attributes {dimension_semantics = [#tpu.dimension_semantics<arbitrary>], iteration_bounds = array<i64: 1>, scalar_prefetch = 0 : i64, scratch_operands = 5 : i64, tpu.core_type = #tpu.core_type<tc>, window_params = [{pipeline_mode = #tpu.pipeline_mode<synchronous>, transform_indices = @transform_0, window_bounds = array<i64: 8, 8, 128>}, {pipeline_mode = #tpu.pipeline_mode<synchronous>, transform_indices = @transform_1, window_bounds = array<i64: 2, 8, 128>}, {pipeline_mode = #tpu.pipeline_mode<synchronous>, transform_indices = @transform_2, window_bounds = array<i64: 2, 8, 128>}, {pipeline_mode = #tpu.pipeline_mode<synchronous>, transform_indices = @transform_3, window_bounds = array<i64: 128, 512>}, {pipeline_mode = #tpu.pipeline_mode<synchronous>, transform_indices = @transform_4, window_bounds = array<i64: 128, 512>}, {pipeline_mode = #tpu.pipeline_mode<synchronous>, transform_indices = @transform_5, window_bounds = array<i64: 1, 512>}, {pipeline_mode = #tpu.pipeline_mode<synchronous>, transform_indices = @transform_6, window_bounds = array<i64: 1, 512>}, {pipeline_mode = #tpu.pipeline_mode<synchronous>, transform_indices = @transform_7, window_bounds = array<i64: 1, 128>}, {}, {}, {pipeline_mode = #tpu.pipeline_mode<synchronous>, transform_indices = @transform_10, window_bounds = array<i64: 64, 128>}, {pipeline_mode = #tpu.pipeline_mode<synchronous>, transform_indices = @transform_11, window_bounds = array<i64: 2, 8, 128>}, {pipeline_mode = #tpu.pipeline_mode<synchronous>, transform_indices = @transform_12, window_bounds = array<i64: 2, 8, 128>}]} {
    %c0_i32 = arith.constant 0 : i32
    %0 = tpu.memref_slice %arg18[%c0_i32] : memref<2x!tpu.dma_semaphore, #tpu.memory_space<semaphore_mem>> -> memref<1x!tpu.dma_semaphore, #tpu.memory_space<semaphore_mem>>
    %1 = tpu.memref_squeeze %0 : memref<1x!tpu.dma_semaphore, #tpu.memory_space<semaphore_mem>> -> memref<!tpu.dma_semaphore, #tpu.memory_space<semaphore_mem>>
    tpu.enqueue_dma source(%arg9 : memref<256x512xbf16, #tpu.memory_space<any>>) target(%arg16 : memref<256x512xbf16, #tpu.memory_space<vmem>>) target_semaphore(%1 : memref<!tpu.dma_semaphore, #tpu.memory_space<semaphore_mem>>)
    %c1_i32 = arith.constant 1 : i32
    %2 = tpu.memref_slice %arg18[%c1_i32] : memref<2x!tpu.dma_semaphore, #tpu.memory_space<semaphore_mem>> -> memref<1x!tpu.dma_semaphore, #tpu.memory_space<semaphore_mem>>
    %3 = tpu.memref_squeeze %2 : memref<1x!tpu.dma_semaphore, #tpu.memory_space<semaphore_mem>> -> memref<!tpu.dma_semaphore, #tpu.memory_space<semaphore_mem>>
    tpu.enqueue_dma source(%arg10 : memref<128x128xbf16, #tpu.memory_space<any>>) target(%arg17 : memref<128x128xbf16, #tpu.memory_space<vmem>>) target_semaphore(%3 : memref<!tpu.dma_semaphore, #tpu.memory_space<semaphore_mem>>)
    %c0 = arith.constant 0 : index
    %c0_0 = arith.constant 0 : index
    %c0_1 = arith.constant 0 : index
    %4 = vector.load %arg1[%c0, %c0_0, %c0_1] : memref<8x8x128xbf16, #tpu.memory_space<vmem>>, vector<8x8x128xbf16>
    %5 = vector.shape_cast %4 : vector<8x8x128xbf16> to vector<64x128xbf16>
    %c0_2 = arith.constant 0 : index
    %c0_3 = arith.constant 0 : index
    %6 = vector.load %arg4[%c0_2, %c0_3] : memref<128x512xbf16, #tpu.memory_space<vmem>>, vector<128x512xbf16>
    %cst = arith.constant dense<0.000000e+00> : vector<64x512xf32>
    %7 = tpu.matmul %5, %6, %cst {dimension_numbers = #tpu.dot_dimension_numbers<[1], [0], [0], [1], [0, 0, 1, 1], [], []>} : vector<64x128xbf16>, vector<128x512xbf16>, vector<64x512xf32> -> vector<64x512xf32>
    %c0_4 = arith.constant 0 : index
    %c0_5 = arith.constant 0 : index
    %8 = vector.load %arg6[%c0_4, %c0_5] : memref<1x512xf32, #tpu.memory_space<vmem>>, vector<1x512xf32>
    %9 = vector.broadcast %8 : vector<1x512xf32> to vector<64x512xf32>
    %10 = arith.addf %7, %9 : vector<64x512xf32>
    %11 = vector.shape_cast %10 : vector<64x512xf32> to vector<8x8x512xf32>
    %c0_6 = arith.constant 0 : index
    %c0_7 = arith.constant 0 : index
    %c0_8 = arith.constant 0 : index
    %12 = vector.load %arg14[%c0_6, %c0_7, %c0_8] : memref<8x8x512xf32, #tpu.memory_space<vmem>>, vector<8x8x512xf32>
    tpu.vector_store %arg14[%c0_6, %c0_7, %c0_8], %11 {strides = array<i32>} : memref<8x8x512xf32, #tpu.memory_space<vmem>>, vector<8x8x512xf32>,
    %c0_i32_9 = arith.constant 0 : i32
    %13 = tpu.memref_slice %arg18[%c0_i32_9] : memref<2x!tpu.dma_semaphore, #tpu.memory_space<semaphore_mem>> -> memref<1x!tpu.dma_semaphore, #tpu.memory_space<semaphore_mem>>
    %14 = tpu.memref_squeeze %13 : memref<1x!tpu.dma_semaphore, #tpu.memory_space<semaphore_mem>> -> memref<!tpu.dma_semaphore, #tpu.memory_space<semaphore_mem>>
    tpu.wait_dma2 semaphore(%14 : memref<!tpu.dma_semaphore, #tpu.memory_space<semaphore_mem>>) src(%arg9 : memref<256x512xbf16, #tpu.memory_space<any>>) dst(%arg16 : memref<256x512xbf16, #tpu.memory_space<vmem>>)
    %c0_10 = arith.constant 0 : index
    %c0_11 = arith.constant 0 : index
    %c0_12 = arith.constant 0 : index
    %15 = vector.load %arg2[%c0_10, %c0_11, %c0_12] : memref<2x8x128xf32, #tpu.memory_space<vmem>>, vector<1x8x128xf32>
    %16 = vector.shape_cast %15 : vector<1x8x128xf32> to vector<8x128xf32>
    %c0_13 = arith.constant 0 : index
    %c0_14 = arith.constant 0 : index
    %c0_15 = arith.constant 0 : index
    %17 = vector.load %arg3[%c0_13, %c0_14, %c0_15] : memref<2x8x128xf32, #tpu.memory_space<vmem>>, vector<1x8x128xf32>
    %18 = vector.shape_cast %17 : vector<1x8x128xf32> to vector<8x128xf32>
    %c0_16 = arith.constant 0 : index
    %c0_17 = arith.constant 0 : index
    %c0_18 = arith.constant 0 : index
    %19 = vector.load %arg14[%c0_16, %c0_17, %c0_18] : memref<8x8x512xf32, #tpu.memory_space<vmem>>, vector<1x8x512xf32>
    %20 = vector.shape_cast %19 : vector<1x8x512xf32> to vector<8x512xf32>
    %21 = arith.truncf %16 : vector<8x128xf32> to vector<8x128xbf16>
    %c0_19 = arith.constant 0 : index
    %c0_20 = arith.constant 0 : index
    %22 = vector.load %arg5[%c0_19, %c0_20] : memref<128x512xbf16, #tpu.memory_space<vmem>>, vector<128x512xbf16>
    %cst_21 = arith.constant dense<0.000000e+00> : vector<8x512xf32>
    %23 = tpu.matmul %21, %22, %cst_21 {dimension_numbers = #tpu.dot_dimension_numbers<[1], [0], [0], [1], [0, 0, 1, 1], [], []>} : vector<8x128xbf16>, vector<128x512xbf16>, vector<8x512xf32> -> vector<8x512xf32>
    %24 = arith.addf %20, %23 : vector<8x512xf32>
    %25 = vector.extract_strided_slice %24 {offsets = [0, 0], sizes = [8, 384], strides = [1, 1]} : vector<8x512xf32> to vector<8x384xf32>
    %26 = arith.negf %25 : vector<8x384xf32>
    %27 = math.exp %26 : vector<8x384xf32>
    %cst_22 = arith.constant 1.000000e+00 : f32
    %28 = vector.broadcast %cst_22 : f32 to vector<8x384xf32>
    %29 = arith.addf %28, %27 : vector<8x384xf32>
    %30 = arith.divf %28, %29 : vector<8x384xf32>
    %31 = vector.extract_strided_slice %24 {offsets = [0, 384], sizes = [8, 128], strides = [1, 1]} : vector<8x512xf32> to vector<8x128xf32>
    %32 = math.tanh %31 : vector<8x128xf32>
    %33 = vector.extract_strided_slice %30 {offsets = [0, 128], sizes = [8, 128], strides = [1, 1]} : vector<8x384xf32> to vector<8x128xf32>
    %34 = arith.mulf %33, %18 : vector<8x128xf32>
    %35 = vector.extract_strided_slice %30 {offsets = [0, 0], sizes = [8, 128], strides = [1, 1]} : vector<8x384xf32> to vector<8x128xf32>
    %36 = arith.mulf %35, %32 : vector<8x128xf32>
    %37 = arith.addf %34, %36 : vector<8x128xf32>
    %38 = vector.extract_strided_slice %30 {offsets = [0, 256], sizes = [8, 128], strides = [1, 1]} : vector<8x384xf32> to vector<8x128xf32>
    %39 = math.tanh %37 : vector<8x128xf32>
    %40 = arith.mulf %38, %39 : vector<8x128xf32>
    %c1 = arith.constant 1 : index
    %c0_23 = arith.constant 0 : index
    %c0_24 = arith.constant 0 : index
    %41 = vector.load %arg2[%c1, %c0_23, %c0_24] : memref<2x8x128xf32, #tpu.memory_space<vmem>>, vector<1x8x128xf32>
    %42 = vector.shape_cast %41 : vector<1x8x128xf32> to vector<8x128xf32>
    %c1_25 = arith.constant 1 : index
    %c0_26 = arith.constant 0 : index
    %c0_27 = arith.constant 0 : index
    %43 = vector.load %arg3[%c1_25, %c0_26, %c0_27] : memref<2x8x128xf32, #tpu.memory_space<vmem>>, vector<1x8x128xf32>
    %44 = vector.shape_cast %43 : vector<1x8x128xf32> to vector<8x128xf32>
    %c1_i32_28 = arith.constant 1 : i32
    %c1_i32_29 = arith.constant 1 : i32
    %45 = arith.subi %c1_i32_28, %c1_i32_29 : i32
    %46 = tpu.concatenate %40, %42 in 1 : vector<8x128xf32>, vector<8x128xf32> -> vector<8x256xf32>
    %47 = arith.truncf %46 : vector<8x256xf32> to vector<8x256xbf16>
    %c0_30 = arith.constant 0 : index
    %c0_31 = arith.constant 0 : index
    %48 = vector.load %arg16[%c0_30, %c0_31] : memref<256x512xbf16, #tpu.memory_space<vmem>>, vector<256x512xbf16>
    %cst_32 = arith.constant dense<0.000000e+00> : vector<8x512xf32>
    %49 = tpu.matmul %47, %48, %cst_32 {dimension_numbers = #tpu.dot_dimension_numbers<[1], [0], [0], [1], [0, 0, 1, 1], [], []>} : vector<8x256xbf16>, vector<256x512xbf16>, vector<8x512xf32> -> vector<8x512xf32>
    %c0_33 = arith.constant 0 : index
    %c0_34 = arith.constant 0 : index
    %50 = vector.load %arg7[%c0_33, %c0_34] : memref<1x512xf32, #tpu.memory_space<vmem>>, vector<1x512xf32>
    %51 = vector.broadcast %50 : vector<1x512xf32> to vector<8x512xf32>
    %52 = arith.addf %49, %51 : vector<8x512xf32>
    %53 = vector.extract_strided_slice %52 {offsets = [0, 0], sizes = [8, 384], strides = [1, 1]} : vector<8x512xf32> to vector<8x384xf32>
    %54 = arith.negf %53 : vector<8x384xf32>
    %55 = math.exp %54 : vector<8x384xf32>
    %cst_35 = arith.constant 1.000000e+00 : f32
    %56 = vector.broadcast %cst_35 : f32 to vector<8x384xf32>
    %57 = arith.addf %56, %55 : vector<8x384xf32>
    %58 = arith.divf %56, %57 : vector<8x384xf32>
    %59 = vector.extract_strided_slice %52 {offsets = [0, 384], sizes = [8, 128], strides = [1, 1]} : vector<8x512xf32> to vector<8x128xf32>
    %60 = math.tanh %59 : vector<8x128xf32>
    %61 = vector.extract_strided_slice %58 {offsets = [0, 128], sizes = [8, 128], strides = [1, 1]} : vector<8x384xf32> to vector<8x128xf32>
    %62 = arith.mulf %61, %44 : vector<8x128xf32>
    %63 = vector.extract_strided_slice %58 {offsets = [0, 0], sizes = [8, 128], strides = [1, 1]} : vector<8x384xf32> to vector<8x128xf32>
    %64 = arith.mulf %63, %60 : vector<8x128xf32>
    %65 = arith.addf %62, %64 : vector<8x128xf32>
    %66 = vector.extract_strided_slice %58 {offsets = [0, 256], sizes = [8, 128], strides = [1, 1]} : vector<8x384xf32> to vector<8x128xf32>
    %67 = math.tanh %65 : vector<8x128xf32>
    %68 = arith.mulf %66, %67 : vector<8x128xf32>
    %69 = arith.index_cast %45 : i32 to index
    %c0_36 = arith.constant 0 : index
    %c0_37 = arith.constant 0 : index
    %70 = vector.load %arg15[%69, %c0_36, %c0_37] : memref<8x8x128xf32, #tpu.memory_space<vmem>>, vector<1x8x128xf32>
    %71 = vector.shape_cast %70 : vector<1x8x128xf32> to vector<8x128xf32>
    %72 = vector.shape_cast %68 : vector<8x128xf32> to vector<1x8x128xf32>
    tpu.vector_store %arg15[%69, %c0_36, %c0_37], %72 {strides = array<i32>} : memref<8x8x128xf32, #tpu.memory_space<vmem>>, vector<1x8x128xf32>,
    %73 = arith.index_cast %c1_i32_28 : i32 to index
    %c0_38 = arith.constant 0 : index
    %c0_39 = arith.constant 0 : index
    %74 = vector.load %arg14[%73, %c0_38, %c0_39] : memref<8x8x512xf32, #tpu.memory_space<vmem>>, vector<1x8x512xf32>
    %75 = vector.shape_cast %74 : vector<1x8x512xf32> to vector<8x512xf32>
    %76 = arith.truncf %40 : vector<8x128xf32> to vector<8x128xbf16>
    %c0_40 = arith.constant 0 : index
    %c0_41 = arith.constant 0 : index
    %77 = vector.load %arg5[%c0_40, %c0_41] : memref<128x512xbf16, #tpu.memory_space<vmem>>, vector<128x512xbf16>
    %cst_42 = arith.constant dense<0.000000e+00> : vector<8x512xf32>
    %78 = tpu.matmul %76, %77, %cst_42 {dimension_numbers = #tpu.dot_dimension_numbers<[1], [0], [0], [1], [0, 0, 1, 1], [], []>} : vector<8x128xbf16>, vector<128x512xbf16>, vector<8x512xf32> -> vector<8x512xf32>
    %79 = arith.addf %75, %78 : vector<8x512xf32>
    %80 = vector.extract_strided_slice %79 {offsets = [0, 0], sizes = [8, 384], strides = [1, 1]} : vector<8x512xf32> to vector<8x384xf32>
    %81 = arith.negf %80 : vector<8x384xf32>
    %82 = math.exp %81 : vector<8x384xf32>
    %cst_43 = arith.constant 1.000000e+00 : f32
    %83 = vector.broadcast %cst_43 : f32 to vector<8x384xf32>
    %84 = arith.addf %83, %82 : vector<8x384xf32>
    %85 = arith.divf %83, %84 : vector<8x384xf32>
    %86 = vector.extract_strided_slice %79 {offsets = [0, 384], sizes = [8, 128], strides = [1, 1]} : vector<8x512xf32> to vector<8x128xf32>
    %87 = math.tanh %86 : vector<8x128xf32>
    %88 = vector.extract_strided_slice %85 {offsets = [0, 128], sizes = [8, 128], strides = [1, 1]} : vector<8x384xf32> to vector<8x128xf32>
    %89 = arith.mulf %88, %37 : vector<8x128xf32>
    %90 = vector.extract_strided_slice %85 {offsets = [0, 0], sizes = [8, 128], strides = [1, 1]} : vector<8x384xf32> to vector<8x128xf32>
    %91 = arith.mulf %90, %87 : vector<8x128xf32>
    %92 = arith.addf %89, %91 : vector<8x128xf32>
    %93 = vector.extract_strided_slice %85 {offsets = [0, 256], sizes = [8, 128], strides = [1, 1]} : vector<8x384xf32> to vector<8x128xf32>
    %94 = math.tanh %92 : vector<8x128xf32>
    %95 = arith.mulf %93, %94 : vector<8x128xf32>
    %c2_i32 = arith.constant 2 : i32
    %c1_i32_44 = arith.constant 1 : i32
    %96 = arith.subi %c2_i32, %c1_i32_44 : i32
    %97 = tpu.concatenate %95, %68 in 1 : vector<8x128xf32>, vector<8x128xf32> -> vector<8x256xf32>
    %98 = arith.truncf %97 : vector<8x256xf32> to vector<8x256xbf16>
    %c0_45 = arith.constant 0 : index
    %c0_46 = arith.constant 0 : index
    %99 = vector.load %arg16[%c0_45, %c0_46] : memref<256x512xbf16, #tpu.memory_space<vmem>>, vector<256x512xbf16>
    %cst_47 = arith.constant dense<0.000000e+00> : vector<8x512xf32>
    %100 = tpu.matmul %98, %99, %cst_47 {dimension_numbers = #tpu.dot_dimension_numbers<[1], [0], [0], [1], [0, 0, 1, 1], [], []>} : vector<8x256xbf16>, vector<256x512xbf16>, vector<8x512xf32> -> vector<8x512xf32>
    %c0_48 = arith.constant 0 : index
    %c0_49 = arith.constant 0 : index
    %101 = vector.load %arg7[%c0_48, %c0_49] : memref<1x512xf32, #tpu.memory_space<vmem>>, vector<1x512xf32>
    %102 = vector.broadcast %101 : vector<1x512xf32> to vector<8x512xf32>
    %103 = arith.addf %100, %102 : vector<8x512xf32>
    %104 = vector.extract_strided_slice %103 {offsets = [0, 0], sizes = [8, 384], strides = [1, 1]} : vector<8x512xf32> to vector<8x384xf32>
    %105 = arith.negf %104 : vector<8x384xf32>
    %106 = math.exp %105 : vector<8x384xf32>
    %cst_50 = arith.constant 1.000000e+00 : f32
    %107 = vector.broadcast %cst_50 : f32 to vector<8x384xf32>
    %108 = arith.addf %107, %106 : vector<8x384xf32>
    %109 = arith.divf %107, %108 : vector<8x384xf32>
    %110 = vector.extract_strided_slice %103 {offsets = [0, 384], sizes = [8, 128], strides = [1, 1]} : vector<8x512xf32> to vector<8x128xf32>
    %111 = math.tanh %110 : vector<8x128xf32>
    %112 = vector.extract_strided_slice %109 {offsets = [0, 128], sizes = [8, 128], strides = [1, 1]} : vector<8x384xf32> to vector<8x128xf32>
    %113 = arith.mulf %112, %65 : vector<8x128xf32>
    %114 = vector.extract_strided_slice %109 {offsets = [0, 0], sizes = [8, 128], strides = [1, 1]} : vector<8x384xf32> to vector<8x128xf32>
    %115 = arith.mulf %114, %111 : vector<8x128xf32>
    %116 = arith.addf %113, %115 : vector<8x128xf32>
    %117 = vector.extract_strided_slice %109 {offsets = [0, 256], sizes = [8, 128], strides = [1, 1]} : vector<8x384xf32> to vector<8x128xf32>
    %118 = math.tanh %116 : vector<8x128xf32>
    %119 = arith.mulf %117, %118 : vector<8x128xf32>
    %120 = arith.index_cast %96 : i32 to index
    %c0_51 = arith.constant 0 : index
    %c0_52 = arith.constant 0 : index
    %121 = vector.load %arg15[%120, %c0_51, %c0_52] : memref<8x8x128xf32, #tpu.memory_space<vmem>>, vector<1x8x128xf32>
    %122 = vector.shape_cast %121 : vector<1x8x128xf32> to vector<8x128xf32>
    %123 = vector.shape_cast %119 : vector<8x128xf32> to vector<1x8x128xf32>
    tpu.vector_store %arg15[%120, %c0_51, %c0_52], %123 {strides = array<i32>} : memref<8x8x128xf32, #tpu.memory_space<vmem>>, vector<1x8x128xf32>,
    %124 = arith.index_cast %c2_i32 : i32 to index
    %c0_53 = arith.constant 0 : index
    %c0_54 = arith.constant 0 : index
    %125 = vector.load %arg14[%124, %c0_53, %c0_54] : memref<8x8x512xf32, #tpu.memory_space<vmem>>, vector<1x8x512xf32>
    %126 = vector.shape_cast %125 : vector<1x8x512xf32> to vector<8x512xf32>
    %127 = arith.truncf %95 : vector<8x128xf32> to vector<8x128xbf16>
    %c0_55 = arith.constant 0 : index
    %c0_56 = arith.constant 0 : index
    %128 = vector.load %arg5[%c0_55, %c0_56] : memref<128x512xbf16, #tpu.memory_space<vmem>>, vector<128x512xbf16>
    %cst_57 = arith.constant dense<0.000000e+00> : vector<8x512xf32>
    %129 = tpu.matmul %127, %128, %cst_57 {dimension_numbers = #tpu.dot_dimension_numbers<[1], [0], [0], [1], [0, 0, 1, 1], [], []>} : vector<8x128xbf16>, vector<128x512xbf16>, vector<8x512xf32> -> vector<8x512xf32>
    %130 = arith.addf %126, %129 : vector<8x512xf32>
    %131 = vector.extract_strided_slice %130 {offsets = [0, 0], sizes = [8, 384], strides = [1, 1]} : vector<8x512xf32> to vector<8x384xf32>
    %132 = arith.negf %131 : vector<8x384xf32>
    %133 = math.exp %132 : vector<8x384xf32>
    %cst_58 = arith.constant 1.000000e+00 : f32
    %134 = vector.broadcast %cst_58 : f32 to vector<8x384xf32>
    %135 = arith.addf %134, %133 : vector<8x384xf32>
    %136 = arith.divf %134, %135 : vector<8x384xf32>
    %137 = vector.extract_strided_slice %130 {offsets = [0, 384], sizes = [8, 128], strides = [1, 1]} : vector<8x512xf32> to vector<8x128xf32>
    %138 = math.tanh %137 : vector<8x128xf32>
    %139 = vector.extract_strided_slice %136 {offsets = [0, 128], sizes = [8, 128], strides = [1, 1]} : vector<8x384xf32> to vector<8x128xf32>
    %140 = arith.mulf %139, %92 : vector<8x128xf32>
    %141 = vector.extract_strided_slice %136 {offsets = [0, 0], sizes = [8, 128], strides = [1, 1]} : vector<8x384xf32> to vector<8x128xf32>
    %142 = arith.mulf %141, %138 : vector<8x128xf32>
    %143 = arith.addf %140, %142 : vector<8x128xf32>
    %144 = vector.extract_strided_slice %136 {offsets = [0, 256], sizes = [8, 128], strides = [1, 1]} : vector<8x384xf32> to vector<8x128xf32>
    %145 = math.tanh %143 : vector<8x128xf32>
    %146 = arith.mulf %144, %145 : vector<8x128xf32>
    %c3_i32 = arith.constant 3 : i32
    %c1_i32_59 = arith.constant 1 : i32
    %147 = arith.subi %c3_i32, %c1_i32_59 : i32
    %148 = tpu.concatenate %146, %119 in 1 : vector<8x128xf32>, vector<8x128xf32> -> vector<8x256xf32>
    %149 = arith.truncf %148 : vector<8x256xf32> to vector<8x256xbf16>
    %c0_60 = arith.constant 0 : index
    %c0_61 = arith.constant 0 : index
    %150 = vector.load %arg16[%c0_60, %c0_61] : memref<256x512xbf16, #tpu.memory_space<vmem>>, vector<256x512xbf16>
    %cst_62 = arith.constant dense<0.000000e+00> : vector<8x512xf32>
    %151 = tpu.matmul %149, %150, %cst_62 {dimension_numbers = #tpu.dot_dimension_numbers<[1], [0], [0], [1], [0, 0, 1, 1], [], []>} : vector<8x256xbf16>, vector<256x512xbf16>, vector<8x512xf32> -> vector<8x512xf32>
    %c0_63 = arith.constant 0 : index
    %c0_64 = arith.constant 0 : index
    %152 = vector.load %arg7[%c0_63, %c0_64] : memref<1x512xf32, #tpu.memory_space<vmem>>, vector<1x512xf32>
    %153 = vector.broadcast %152 : vector<1x512xf32> to vector<8x512xf32>
    %154 = arith.addf %151, %153 : vector<8x512xf32>
    %155 = vector.extract_strided_slice %154 {offsets = [0, 0], sizes = [8, 384], strides = [1, 1]} : vector<8x512xf32> to vector<8x384xf32>
    %156 = arith.negf %155 : vector<8x384xf32>
    %157 = math.exp %156 : vector<8x384xf32>
    %cst_65 = arith.constant 1.000000e+00 : f32
    %158 = vector.broadcast %cst_65 : f32 to vector<8x384xf32>
    %159 = arith.addf %158, %157 : vector<8x384xf32>
    %160 = arith.divf %158, %159 : vector<8x384xf32>
    %161 = vector.extract_strided_slice %154 {offsets = [0, 384], sizes = [8, 128], strides = [1, 1]} : vector<8x512xf32> to vector<8x128xf32>
    %162 = math.tanh %161 : vector<8x128xf32>
    %163 = vector.extract_strided_slice %160 {offsets = [0, 128], sizes = [8, 128], strides = [1, 1]} : vector<8x384xf32> to vector<8x128xf32>
    %164 = arith.mulf %163, %116 : vector<8x128xf32>
    %165 = vector.extract_strided_slice %160 {offsets = [0, 0], sizes = [8, 128], strides = [1, 1]} : vector<8x384xf32> to vector<8x128xf32>
    %166 = arith.mulf %165, %162 : vector<8x128xf32>
    %167 = arith.addf %164, %166 : vector<8x128xf32>
    %168 = vector.extract_strided_slice %160 {offsets = [0, 256], sizes = [8, 128], strides = [1, 1]} : vector<8x384xf32> to vector<8x128xf32>
    %169 = math.tanh %167 : vector<8x128xf32>
    %170 = arith.mulf %168, %169 : vector<8x128xf32>
    %171 = arith.index_cast %147 : i32 to index
    %c0_66 = arith.constant 0 : index
    %c0_67 = arith.constant 0 : index
    %172 = vector.load %arg15[%171, %c0_66, %c0_67] : memref<8x8x128xf32, #tpu.memory_space<vmem>>, vector<1x8x128xf32>
    %173 = vector.shape_cast %172 : vector<1x8x128xf32> to vector<8x128xf32>
    %174 = vector.shape_cast %170 : vector<8x128xf32> to vector<1x8x128xf32>
    tpu.vector_store %arg15[%171, %c0_66, %c0_67], %174 {strides = array<i32>} : memref<8x8x128xf32, #tpu.memory_space<vmem>>, vector<1x8x128xf32>,
    %175 = arith.index_cast %c3_i32 : i32 to index
    %c0_68 = arith.constant 0 : index
    %c0_69 = arith.constant 0 : index
    %176 = vector.load %arg14[%175, %c0_68, %c0_69] : memref<8x8x512xf32, #tpu.memory_space<vmem>>, vector<1x8x512xf32>
    %177 = vector.shape_cast %176 : vector<1x8x512xf32> to vector<8x512xf32>
    %178 = arith.truncf %146 : vector<8x128xf32> to vector<8x128xbf16>
    %c0_70 = arith.constant 0 : index
    %c0_71 = arith.constant 0 : index
    %179 = vector.load %arg5[%c0_70, %c0_71] : memref<128x512xbf16, #tpu.memory_space<vmem>>, vector<128x512xbf16>
    %cst_72 = arith.constant dense<0.000000e+00> : vector<8x512xf32>
    %180 = tpu.matmul %178, %179, %cst_72 {dimension_numbers = #tpu.dot_dimension_numbers<[1], [0], [0], [1], [0, 0, 1, 1], [], []>} : vector<8x128xbf16>, vector<128x512xbf16>, vector<8x512xf32> -> vector<8x512xf32>
    %181 = arith.addf %177, %180 : vector<8x512xf32>
    %182 = vector.extract_strided_slice %181 {offsets = [0, 0], sizes = [8, 384], strides = [1, 1]} : vector<8x512xf32> to vector<8x384xf32>
    %183 = arith.negf %182 : vector<8x384xf32>
    %184 = math.exp %183 : vector<8x384xf32>
    %cst_73 = arith.constant 1.000000e+00 : f32
    %185 = vector.broadcast %cst_73 : f32 to vector<8x384xf32>
    %186 = arith.addf %185, %184 : vector<8x384xf32>
    %187 = arith.divf %185, %186 : vector<8x384xf32>
    %188 = vector.extract_strided_slice %181 {offsets = [0, 384], sizes = [8, 128], strides = [1, 1]} : vector<8x512xf32> to vector<8x128xf32>
    %189 = math.tanh %188 : vector<8x128xf32>
    %190 = vector.extract_strided_slice %187 {offsets = [0, 128], sizes = [8, 128], strides = [1, 1]} : vector<8x384xf32> to vector<8x128xf32>
    %191 = arith.mulf %190, %143 : vector<8x128xf32>
    %192 = vector.extract_strided_slice %187 {offsets = [0, 0], sizes = [8, 128], strides = [1, 1]} : vector<8x384xf32> to vector<8x128xf32>
    %193 = arith.mulf %192, %189 : vector<8x128xf32>
    %194 = arith.addf %191, %193 : vector<8x128xf32>
    %195 = vector.extract_strided_slice %187 {offsets = [0, 256], sizes = [8, 128], strides = [1, 1]} : vector<8x384xf32> to vector<8x128xf32>
    %196 = math.tanh %194 : vector<8x128xf32>
    %197 = arith.mulf %195, %196 : vector<8x128xf32>
    %c4_i32 = arith.constant 4 : i32
    %c1_i32_74 = arith.constant 1 : i32
    %198 = arith.subi %c4_i32, %c1_i32_74 : i32
    %199 = tpu.concatenate %197, %170 in 1 : vector<8x128xf32>, vector<8x128xf32> -> vector<8x256xf32>
    %200 = arith.truncf %199 : vector<8x256xf32> to vector<8x256xbf16>
    %c0_75 = arith.constant 0 : index
    %c0_76 = arith.constant 0 : index
    %201 = vector.load %arg16[%c0_75, %c0_76] : memref<256x512xbf16, #tpu.memory_space<vmem>>, vector<256x512xbf16>
    %cst_77 = arith.constant dense<0.000000e+00> : vector<8x512xf32>
    %202 = tpu.matmul %200, %201, %cst_77 {dimension_numbers = #tpu.dot_dimension_numbers<[1], [0], [0], [1], [0, 0, 1, 1], [], []>} : vector<8x256xbf16>, vector<256x512xbf16>, vector<8x512xf32> -> vector<8x512xf32>
    %c0_78 = arith.constant 0 : index
    %c0_79 = arith.constant 0 : index
    %203 = vector.load %arg7[%c0_78, %c0_79] : memref<1x512xf32, #tpu.memory_space<vmem>>, vector<1x512xf32>
    %204 = vector.broadcast %203 : vector<1x512xf32> to vector<8x512xf32>
    %205 = arith.addf %202, %204 : vector<8x512xf32>
    %206 = vector.extract_strided_slice %205 {offsets = [0, 0], sizes = [8, 384], strides = [1, 1]} : vector<8x512xf32> to vector<8x384xf32>
    %207 = arith.negf %206 : vector<8x384xf32>
    %208 = math.exp %207 : vector<8x384xf32>
    %cst_80 = arith.constant 1.000000e+00 : f32
    %209 = vector.broadcast %cst_80 : f32 to vector<8x384xf32>
    %210 = arith.addf %209, %208 : vector<8x384xf32>
    %211 = arith.divf %209, %210 : vector<8x384xf32>
    %212 = vector.extract_strided_slice %205 {offsets = [0, 384], sizes = [8, 128], strides = [1, 1]} : vector<8x512xf32> to vector<8x128xf32>
    %213 = math.tanh %212 : vector<8x128xf32>
    %214 = vector.extract_strided_slice %211 {offsets = [0, 128], sizes = [8, 128], strides = [1, 1]} : vector<8x384xf32> to vector<8x128xf32>
    %215 = arith.mulf %214, %167 : vector<8x128xf32>
    %216 = vector.extract_strided_slice %211 {offsets = [0, 0], sizes = [8, 128], strides = [1, 1]} : vector<8x384xf32> to vector<8x128xf32>
    %217 = arith.mulf %216, %213 : vector<8x128xf32>
    %218 = arith.addf %215, %217 : vector<8x128xf32>
    %219 = vector.extract_strided_slice %211 {offsets = [0, 256], sizes = [8, 128], strides = [1, 1]} : vector<8x384xf32> to vector<8x128xf32>
    %220 = math.tanh %218 : vector<8x128xf32>
    %221 = arith.mulf %219, %220 : vector<8x128xf32>
    %222 = arith.index_cast %198 : i32 to index
    %c0_81 = arith.constant 0 : index
    %c0_82 = arith.constant 0 : index
    %223 = vector.load %arg15[%222, %c0_81, %c0_82] : memref<8x8x128xf32, #tpu.memory_space<vmem>>, vector<1x8x128xf32>
    %224 = vector.shape_cast %223 : vector<1x8x128xf32> to vector<8x128xf32>
    %225 = vector.shape_cast %221 : vector<8x128xf32> to vector<1x8x128xf32>
    tpu.vector_store %arg15[%222, %c0_81, %c0_82], %225 {strides = array<i32>} : memref<8x8x128xf32, #tpu.memory_space<vmem>>, vector<1x8x128xf32>,
    %226 = arith.index_cast %c4_i32 : i32 to index
    %c0_83 = arith.constant 0 : index
    %c0_84 = arith.constant 0 : index
    %227 = vector.load %arg14[%226, %c0_83, %c0_84] : memref<8x8x512xf32, #tpu.memory_space<vmem>>, vector<1x8x512xf32>
    %228 = vector.shape_cast %227 : vector<1x8x512xf32> to vector<8x512xf32>
    %229 = arith.truncf %197 : vector<8x128xf32> to vector<8x128xbf16>
    %c0_85 = arith.constant 0 : index
    %c0_86 = arith.constant 0 : index
    %230 = vector.load %arg5[%c0_85, %c0_86] : memref<128x512xbf16, #tpu.memory_space<vmem>>, vector<128x512xbf16>
    %cst_87 = arith.constant dense<0.000000e+00> : vector<8x512xf32>
    %231 = tpu.matmul %229, %230, %cst_87 {dimension_numbers = #tpu.dot_dimension_numbers<[1], [0], [0], [1], [0, 0, 1, 1], [], []>} : vector<8x128xbf16>, vector<128x512xbf16>, vector<8x512xf32> -> vector<8x512xf32>
    %232 = arith.addf %228, %231 : vector<8x512xf32>
    %233 = vector.extract_strided_slice %232 {offsets = [0, 0], sizes = [8, 384], strides = [1, 1]} : vector<8x512xf32> to vector<8x384xf32>
    %234 = arith.negf %233 : vector<8x384xf32>
    %235 = math.exp %234 : vector<8x384xf32>
    %cst_88 = arith.constant 1.000000e+00 : f32
    %236 = vector.broadcast %cst_88 : f32 to vector<8x384xf32>
    %237 = arith.addf %236, %235 : vector<8x384xf32>
    %238 = arith.divf %236, %237 : vector<8x384xf32>
    %239 = vector.extract_strided_slice %232 {offsets = [0, 384], sizes = [8, 128], strides = [1, 1]} : vector<8x512xf32> to vector<8x128xf32>
    %240 = math.tanh %239 : vector<8x128xf32>
    %241 = vector.extract_strided_slice %238 {offsets = [0, 128], sizes = [8, 128], strides = [1, 1]} : vector<8x384xf32> to vector<8x128xf32>
    %242 = arith.mulf %241, %194 : vector<8x128xf32>
    %243 = vector.extract_strided_slice %238 {offsets = [0, 0], sizes = [8, 128], strides = [1, 1]} : vector<8x384xf32> to vector<8x128xf32>
    %244 = arith.mulf %243, %240 : vector<8x128xf32>
    %245 = arith.addf %242, %244 : vector<8x128xf32>
    %246 = vector.extract_strided_slice %238 {offsets = [0, 256], sizes = [8, 128], strides = [1, 1]} : vector<8x384xf32> to vector<8x128xf32>
    %247 = math.tanh %245 : vector<8x128xf32>
    %248 = arith.mulf %246, %247 : vector<8x128xf32>
    %c5_i32 = arith.constant 5 : i32
    %c1_i32_89 = arith.constant 1 : i32
    %249 = arith.subi %c5_i32, %c1_i32_89 : i32
    %250 = tpu.concatenate %248, %221 in 1 : vector<8x128xf32>, vector<8x128xf32> -> vector<8x256xf32>
    %251 = arith.truncf %250 : vector<8x256xf32> to vector<8x256xbf16>
    %c0_90 = arith.constant 0 : index
    %c0_91 = arith.constant 0 : index
    %252 = vector.load %arg16[%c0_90, %c0_91] : memref<256x512xbf16, #tpu.memory_space<vmem>>, vector<256x512xbf16>
    %cst_92 = arith.constant dense<0.000000e+00> : vector<8x512xf32>
    %253 = tpu.matmul %251, %252, %cst_92 {dimension_numbers = #tpu.dot_dimension_numbers<[1], [0], [0], [1], [0, 0, 1, 1], [], []>} : vector<8x256xbf16>, vector<256x512xbf16>, vector<8x512xf32> -> vector<8x512xf32>
    %c0_93 = arith.constant 0 : index
    %c0_94 = arith.constant 0 : index
    %254 = vector.load %arg7[%c0_93, %c0_94] : memref<1x512xf32, #tpu.memory_space<vmem>>, vector<1x512xf32>
    %255 = vector.broadcast %254 : vector<1x512xf32> to vector<8x512xf32>
    %256 = arith.addf %253, %255 : vector<8x512xf32>
    %257 = vector.extract_strided_slice %256 {offsets = [0, 0], sizes = [8, 384], strides = [1, 1]} : vector<8x512xf32> to vector<8x384xf32>
    %258 = arith.negf %257 : vector<8x384xf32>
    %259 = math.exp %258 : vector<8x384xf32>
    %cst_95 = arith.constant 1.000000e+00 : f32
    %260 = vector.broadcast %cst_95 : f32 to vector<8x384xf32>
    %261 = arith.addf %260, %259 : vector<8x384xf32>
    %262 = arith.divf %260, %261 : vector<8x384xf32>
    %263 = vector.extract_strided_slice %256 {offsets = [0, 384], sizes = [8, 128], strides = [1, 1]} : vector<8x512xf32> to vector<8x128xf32>
    %264 = math.tanh %263 : vector<8x128xf32>
    %265 = vector.extract_strided_slice %262 {offsets = [0, 128], sizes = [8, 128], strides = [1, 1]} : vector<8x384xf32> to vector<8x128xf32>
    %266 = arith.mulf %265, %218 : vector<8x128xf32>
    %267 = vector.extract_strided_slice %262 {offsets = [0, 0], sizes = [8, 128], strides = [1, 1]} : vector<8x384xf32> to vector<8x128xf32>
    %268 = arith.mulf %267, %264 : vector<8x128xf32>
    %269 = arith.addf %266, %268 : vector<8x128xf32>
    %270 = vector.extract_strided_slice %262 {offsets = [0, 256], sizes = [8, 128], strides = [1, 1]} : vector<8x384xf32> to vector<8x128xf32>
    %271 = math.tanh %269 : vector<8x128xf32>
    %272 = arith.mulf %270, %271 : vector<8x128xf32>
    %273 = arith.index_cast %249 : i32 to index
    %c0_96 = arith.constant 0 : index
    %c0_97 = arith.constant 0 : index
    %274 = vector.load %arg15[%273, %c0_96, %c0_97] : memref<8x8x128xf32, #tpu.memory_space<vmem>>, vector<1x8x128xf32>
    %275 = vector.shape_cast %274 : vector<1x8x128xf32> to vector<8x128xf32>
    %276 = vector.shape_cast %272 : vector<8x128xf32> to vector<1x8x128xf32>
    tpu.vector_store %arg15[%273, %c0_96, %c0_97], %276 {strides = array<i32>} : memref<8x8x128xf32, #tpu.memory_space<vmem>>, vector<1x8x128xf32>,
    %277 = arith.index_cast %c5_i32 : i32 to index
    %c0_98 = arith.constant 0 : index
    %c0_99 = arith.constant 0 : index
    %278 = vector.load %arg14[%277, %c0_98, %c0_99] : memref<8x8x512xf32, #tpu.memory_space<vmem>>, vector<1x8x512xf32>
    %279 = vector.shape_cast %278 : vector<1x8x512xf32> to vector<8x512xf32>
    %280 = arith.truncf %248 : vector<8x128xf32> to vector<8x128xbf16>
    %c0_100 = arith.constant 0 : index
    %c0_101 = arith.constant 0 : index
    %281 = vector.load %arg5[%c0_100, %c0_101] : memref<128x512xbf16, #tpu.memory_space<vmem>>, vector<128x512xbf16>
    %cst_102 = arith.constant dense<0.000000e+00> : vector<8x512xf32>
    %282 = tpu.matmul %280, %281, %cst_102 {dimension_numbers = #tpu.dot_dimension_numbers<[1], [0], [0], [1], [0, 0, 1, 1], [], []>} : vector<8x128xbf16>, vector<128x512xbf16>, vector<8x512xf32> -> vector<8x512xf32>
    %283 = arith.addf %279, %282 : vector<8x512xf32>
    %284 = vector.extract_strided_slice %283 {offsets = [0, 0], sizes = [8, 384], strides = [1, 1]} : vector<8x512xf32> to vector<8x384xf32>
    %285 = arith.negf %284 : vector<8x384xf32>
    %286 = math.exp %285 : vector<8x384xf32>
    %cst_103 = arith.constant 1.000000e+00 : f32
    %287 = vector.broadcast %cst_103 : f32 to vector<8x384xf32>
    %288 = arith.addf %287, %286 : vector<8x384xf32>
    %289 = arith.divf %287, %288 : vector<8x384xf32>
    %290 = vector.extract_strided_slice %283 {offsets = [0, 384], sizes = [8, 128], strides = [1, 1]} : vector<8x512xf32> to vector<8x128xf32>
    %291 = math.tanh %290 : vector<8x128xf32>
    %292 = vector.extract_strided_slice %289 {offsets = [0, 128], sizes = [8, 128], strides = [1, 1]} : vector<8x384xf32> to vector<8x128xf32>
    %293 = arith.mulf %292, %245 : vector<8x128xf32>
    %294 = vector.extract_strided_slice %289 {offsets = [0, 0], sizes = [8, 128], strides = [1, 1]} : vector<8x384xf32> to vector<8x128xf32>
    %295 = arith.mulf %294, %291 : vector<8x128xf32>
    %296 = arith.addf %293, %295 : vector<8x128xf32>
    %297 = vector.extract_strided_slice %289 {offsets = [0, 256], sizes = [8, 128], strides = [1, 1]} : vector<8x384xf32> to vector<8x128xf32>
    %298 = math.tanh %296 : vector<8x128xf32>
    %299 = arith.mulf %297, %298 : vector<8x128xf32>
    %c6_i32 = arith.constant 6 : i32
    %c1_i32_104 = arith.constant 1 : i32
    %300 = arith.subi %c6_i32, %c1_i32_104 : i32
    %301 = tpu.concatenate %299, %272 in 1 : vector<8x128xf32>, vector<8x128xf32> -> vector<8x256xf32>
    %302 = arith.truncf %301 : vector<8x256xf32> to vector<8x256xbf16>
    %c0_105 = arith.constant 0 : index
    %c0_106 = arith.constant 0 : index
    %303 = vector.load %arg16[%c0_105, %c0_106] : memref<256x512xbf16, #tpu.memory_space<vmem>>, vector<256x512xbf16>
    %cst_107 = arith.constant dense<0.000000e+00> : vector<8x512xf32>
    %304 = tpu.matmul %302, %303, %cst_107 {dimension_numbers = #tpu.dot_dimension_numbers<[1], [0], [0], [1], [0, 0, 1, 1], [], []>} : vector<8x256xbf16>, vector<256x512xbf16>, vector<8x512xf32> -> vector<8x512xf32>
    %c0_108 = arith.constant 0 : index
    %c0_109 = arith.constant 0 : index
    %305 = vector.load %arg7[%c0_108, %c0_109] : memref<1x512xf32, #tpu.memory_space<vmem>>, vector<1x512xf32>
    %306 = vector.broadcast %305 : vector<1x512xf32> to vector<8x512xf32>
    %307 = arith.addf %304, %306 : vector<8x512xf32>
    %308 = vector.extract_strided_slice %307 {offsets = [0, 0], sizes = [8, 384], strides = [1, 1]} : vector<8x512xf32> to vector<8x384xf32>
    %309 = arith.negf %308 : vector<8x384xf32>
    %310 = math.exp %309 : vector<8x384xf32>
    %cst_110 = arith.constant 1.000000e+00 : f32
    %311 = vector.broadcast %cst_110 : f32 to vector<8x384xf32>
    %312 = arith.addf %311, %310 : vector<8x384xf32>
    %313 = arith.divf %311, %312 : vector<8x384xf32>
    %314 = vector.extract_strided_slice %307 {offsets = [0, 384], sizes = [8, 128], strides = [1, 1]} : vector<8x512xf32> to vector<8x128xf32>
    %315 = math.tanh %314 : vector<8x128xf32>
    %316 = vector.extract_strided_slice %313 {offsets = [0, 128], sizes = [8, 128], strides = [1, 1]} : vector<8x384xf32> to vector<8x128xf32>
    %317 = arith.mulf %316, %269 : vector<8x128xf32>
    %318 = vector.extract_strided_slice %313 {offsets = [0, 0], sizes = [8, 128], strides = [1, 1]} : vector<8x384xf32> to vector<8x128xf32>
    %319 = arith.mulf %318, %315 : vector<8x128xf32>
    %320 = arith.addf %317, %319 : vector<8x128xf32>
    %321 = vector.extract_strided_slice %313 {offsets = [0, 256], sizes = [8, 128], strides = [1, 1]} : vector<8x384xf32> to vector<8x128xf32>
    %322 = math.tanh %320 : vector<8x128xf32>
    %323 = arith.mulf %321, %322 : vector<8x128xf32>
    %324 = arith.index_cast %300 : i32 to index
    %c0_111 = arith.constant 0 : index
    %c0_112 = arith.constant 0 : index
    %325 = vector.load %arg15[%324, %c0_111, %c0_112] : memref<8x8x128xf32, #tpu.memory_space<vmem>>, vector<1x8x128xf32>
    %326 = vector.shape_cast %325 : vector<1x8x128xf32> to vector<8x128xf32>
    %327 = vector.shape_cast %323 : vector<8x128xf32> to vector<1x8x128xf32>
    tpu.vector_store %arg15[%324, %c0_111, %c0_112], %327 {strides = array<i32>} : memref<8x8x128xf32, #tpu.memory_space<vmem>>, vector<1x8x128xf32>,
    %328 = arith.index_cast %c6_i32 : i32 to index
    %c0_113 = arith.constant 0 : index
    %c0_114 = arith.constant 0 : index
    %329 = vector.load %arg14[%328, %c0_113, %c0_114] : memref<8x8x512xf32, #tpu.memory_space<vmem>>, vector<1x8x512xf32>
    %330 = vector.shape_cast %329 : vector<1x8x512xf32> to vector<8x512xf32>
    %331 = arith.truncf %299 : vector<8x128xf32> to vector<8x128xbf16>
    %c0_115 = arith.constant 0 : index
    %c0_116 = arith.constant 0 : index
    %332 = vector.load %arg5[%c0_115, %c0_116] : memref<128x512xbf16, #tpu.memory_space<vmem>>, vector<128x512xbf16>
    %cst_117 = arith.constant dense<0.000000e+00> : vector<8x512xf32>
    %333 = tpu.matmul %331, %332, %cst_117 {dimension_numbers = #tpu.dot_dimension_numbers<[1], [0], [0], [1], [0, 0, 1, 1], [], []>} : vector<8x128xbf16>, vector<128x512xbf16>, vector<8x512xf32> -> vector<8x512xf32>
    %334 = arith.addf %330, %333 : vector<8x512xf32>
    %335 = vector.extract_strided_slice %334 {offsets = [0, 0], sizes = [8, 384], strides = [1, 1]} : vector<8x512xf32> to vector<8x384xf32>
    %336 = arith.negf %335 : vector<8x384xf32>
    %337 = math.exp %336 : vector<8x384xf32>
    %cst_118 = arith.constant 1.000000e+00 : f32
    %338 = vector.broadcast %cst_118 : f32 to vector<8x384xf32>
    %339 = arith.addf %338, %337 : vector<8x384xf32>
    %340 = arith.divf %338, %339 : vector<8x384xf32>
    %341 = vector.extract_strided_slice %334 {offsets = [0, 384], sizes = [8, 128], strides = [1, 1]} : vector<8x512xf32> to vector<8x128xf32>
    %342 = math.tanh %341 : vector<8x128xf32>
    %343 = vector.extract_strided_slice %340 {offsets = [0, 128], sizes = [8, 128], strides = [1, 1]} : vector<8x384xf32> to vector<8x128xf32>
    %344 = arith.mulf %343, %296 : vector<8x128xf32>
    %345 = vector.extract_strided_slice %340 {offsets = [0, 0], sizes = [8, 128], strides = [1, 1]} : vector<8x384xf32> to vector<8x128xf32>
    %346 = arith.mulf %345, %342 : vector<8x128xf32>
    %347 = arith.addf %344, %346 : vector<8x128xf32>
    %348 = vector.extract_strided_slice %340 {offsets = [0, 256], sizes = [8, 128], strides = [1, 1]} : vector<8x384xf32> to vector<8x128xf32>
    %349 = math.tanh %347 : vector<8x128xf32>
    %350 = arith.mulf %348, %349 : vector<8x128xf32>
    %c7_i32 = arith.constant 7 : i32
    %c1_i32_119 = arith.constant 1 : i32
    %351 = arith.subi %c7_i32, %c1_i32_119 : i32
    %352 = tpu.concatenate %350, %323 in 1 : vector<8x128xf32>, vector<8x128xf32> -> vector<8x256xf32>
    %353 = arith.truncf %352 : vector<8x256xf32> to vector<8x256xbf16>
    %c0_120 = arith.constant 0 : index
    %c0_121 = arith.constant 0 : index
    %354 = vector.load %arg16[%c0_120, %c0_121] : memref<256x512xbf16, #tpu.memory_space<vmem>>, vector<256x512xbf16>
    %cst_122 = arith.constant dense<0.000000e+00> : vector<8x512xf32>
    %355 = tpu.matmul %353, %354, %cst_122 {dimension_numbers = #tpu.dot_dimension_numbers<[1], [0], [0], [1], [0, 0, 1, 1], [], []>} : vector<8x256xbf16>, vector<256x512xbf16>, vector<8x512xf32> -> vector<8x512xf32>
    %c0_123 = arith.constant 0 : index
    %c0_124 = arith.constant 0 : index
    %356 = vector.load %arg7[%c0_123, %c0_124] : memref<1x512xf32, #tpu.memory_space<vmem>>, vector<1x512xf32>
    %357 = vector.broadcast %356 : vector<1x512xf32> to vector<8x512xf32>
    %358 = arith.addf %355, %357 : vector<8x512xf32>
    %359 = vector.extract_strided_slice %358 {offsets = [0, 0], sizes = [8, 384], strides = [1, 1]} : vector<8x512xf32> to vector<8x384xf32>
    %360 = arith.negf %359 : vector<8x384xf32>
    %361 = math.exp %360 : vector<8x384xf32>
    %cst_125 = arith.constant 1.000000e+00 : f32
    %362 = vector.broadcast %cst_125 : f32 to vector<8x384xf32>
    %363 = arith.addf %362, %361 : vector<8x384xf32>
    %364 = arith.divf %362, %363 : vector<8x384xf32>
    %365 = vector.extract_strided_slice %358 {offsets = [0, 384], sizes = [8, 128], strides = [1, 1]} : vector<8x512xf32> to vector<8x128xf32>
    %366 = math.tanh %365 : vector<8x128xf32>
    %367 = vector.extract_strided_slice %364 {offsets = [0, 128], sizes = [8, 128], strides = [1, 1]} : vector<8x384xf32> to vector<8x128xf32>
    %368 = arith.mulf %367, %320 : vector<8x128xf32>
    %369 = vector.extract_strided_slice %364 {offsets = [0, 0], sizes = [8, 128], strides = [1, 1]} : vector<8x384xf32> to vector<8x128xf32>
    %370 = arith.mulf %369, %366 : vector<8x128xf32>
    %371 = arith.addf %368, %370 : vector<8x128xf32>
    %372 = vector.extract_strided_slice %364 {offsets = [0, 256], sizes = [8, 128], strides = [1, 1]} : vector<8x384xf32> to vector<8x128xf32>
    %373 = math.tanh %371 : vector<8x128xf32>
    %374 = arith.mulf %372, %373 : vector<8x128xf32>
    %375 = arith.index_cast %351 : i32 to index
    %c0_126 = arith.constant 0 : index
    %c0_127 = arith.constant 0 : index
    %376 = vector.load %arg15[%375, %c0_126, %c0_127] : memref<8x8x128xf32, #tpu.memory_space<vmem>>, vector<1x8x128xf32>
    %377 = vector.shape_cast %376 : vector<1x8x128xf32> to vector<8x128xf32>
    %378 = vector.shape_cast %374 : vector<8x128xf32> to vector<1x8x128xf32>
    tpu.vector_store %arg15[%375, %c0_126, %c0_127], %378 {strides = array<i32>} : memref<8x8x128xf32, #tpu.memory_space<vmem>>, vector<1x8x128xf32>,
    %379 = arith.index_cast %c7_i32 : i32 to index
    %c0_128 = arith.constant 0 : index
    %c0_129 = arith.constant 0 : index
    %380 = vector.load %arg14[%379, %c0_128, %c0_129] : memref<8x8x512xf32, #tpu.memory_space<vmem>>, vector<1x8x512xf32>
    %381 = vector.shape_cast %380 : vector<1x8x512xf32> to vector<8x512xf32>
    %382 = arith.truncf %350 : vector<8x128xf32> to vector<8x128xbf16>
    %c0_130 = arith.constant 0 : index
    %c0_131 = arith.constant 0 : index
    %383 = vector.load %arg5[%c0_130, %c0_131] : memref<128x512xbf16, #tpu.memory_space<vmem>>, vector<128x512xbf16>
    %cst_132 = arith.constant dense<0.000000e+00> : vector<8x512xf32>
    %384 = tpu.matmul %382, %383, %cst_132 {dimension_numbers = #tpu.dot_dimension_numbers<[1], [0], [0], [1], [0, 0, 1, 1], [], []>} : vector<8x128xbf16>, vector<128x512xbf16>, vector<8x512xf32> -> vector<8x512xf32>
    %385 = arith.addf %381, %384 : vector<8x512xf32>
    %386 = vector.extract_strided_slice %385 {offsets = [0, 0], sizes = [8, 384], strides = [1, 1]} : vector<8x512xf32> to vector<8x384xf32>
    %387 = arith.negf %386 : vector<8x384xf32>
    %388 = math.exp %387 : vector<8x384xf32>
    %cst_133 = arith.constant 1.000000e+00 : f32
    %389 = vector.broadcast %cst_133 : f32 to vector<8x384xf32>
    %390 = arith.addf %389, %388 : vector<8x384xf32>
    %391 = arith.divf %389, %390 : vector<8x384xf32>
    %392 = vector.extract_strided_slice %385 {offsets = [0, 384], sizes = [8, 128], strides = [1, 1]} : vector<8x512xf32> to vector<8x128xf32>
    %393 = math.tanh %392 : vector<8x128xf32>
    %394 = vector.extract_strided_slice %391 {offsets = [0, 128], sizes = [8, 128], strides = [1, 1]} : vector<8x384xf32> to vector<8x128xf32>
    %395 = arith.mulf %394, %347 : vector<8x128xf32>
    %396 = vector.extract_strided_slice %391 {offsets = [0, 0], sizes = [8, 128], strides = [1, 1]} : vector<8x384xf32> to vector<8x128xf32>
    %397 = arith.mulf %396, %393 : vector<8x128xf32>
    %398 = arith.addf %395, %397 : vector<8x128xf32>
    %399 = vector.extract_strided_slice %391 {offsets = [0, 256], sizes = [8, 128], strides = [1, 1]} : vector<8x384xf32> to vector<8x128xf32>
    %400 = math.tanh %398 : vector<8x128xf32>
    %401 = arith.mulf %399, %400 : vector<8x128xf32>
    %c7_i32_134 = arith.constant 7 : i32
    %402 = tpu.concatenate %401, %374 in 1 : vector<8x128xf32>, vector<8x128xf32> -> vector<8x256xf32>
    %403 = arith.truncf %402 : vector<8x256xf32> to vector<8x256xbf16>
    %c0_135 = arith.constant 0 : index
    %c0_136 = arith.constant 0 : index
    %404 = vector.load %arg16[%c0_135, %c0_136] : memref<256x512xbf16, #tpu.memory_space<vmem>>, vector<256x512xbf16>
    %cst_137 = arith.constant dense<0.000000e+00> : vector<8x512xf32>
    %405 = tpu.matmul %403, %404, %cst_137 {dimension_numbers = #tpu.dot_dimension_numbers<[1], [0], [0], [1], [0, 0, 1, 1], [], []>} : vector<8x256xbf16>, vector<256x512xbf16>, vector<8x512xf32> -> vector<8x512xf32>
    %c0_138 = arith.constant 0 : index
    %c0_139 = arith.constant 0 : index
    %406 = vector.load %arg7[%c0_138, %c0_139] : memref<1x512xf32, #tpu.memory_space<vmem>>, vector<1x512xf32>
    %407 = vector.broadcast %406 : vector<1x512xf32> to vector<8x512xf32>
    %408 = arith.addf %405, %407 : vector<8x512xf32>
    %409 = vector.extract_strided_slice %408 {offsets = [0, 0], sizes = [8, 384], strides = [1, 1]} : vector<8x512xf32> to vector<8x384xf32>
    %410 = arith.negf %409 : vector<8x384xf32>
    %411 = math.exp %410 : vector<8x384xf32>
    %cst_140 = arith.constant 1.000000e+00 : f32
    %412 = vector.broadcast %cst_140 : f32 to vector<8x384xf32>
    %413 = arith.addf %412, %411 : vector<8x384xf32>
    %414 = arith.divf %412, %413 : vector<8x384xf32>
    %415 = vector.extract_strided_slice %408 {offsets = [0, 384], sizes = [8, 128], strides = [1, 1]} : vector<8x512xf32> to vector<8x128xf32>
    %416 = math.tanh %415 : vector<8x128xf32>
    %417 = vector.extract_strided_slice %414 {offsets = [0, 128], sizes = [8, 128], strides = [1, 1]} : vector<8x384xf32> to vector<8x128xf32>
    %418 = arith.mulf %417, %371 : vector<8x128xf32>
    %419 = vector.extract_strided_slice %414 {offsets = [0, 0], sizes = [8, 128], strides = [1, 1]} : vector<8x384xf32> to vector<8x128xf32>
    %420 = arith.mulf %419, %416 : vector<8x128xf32>
    %421 = arith.addf %418, %420 : vector<8x128xf32>
    %422 = vector.extract_strided_slice %414 {offsets = [0, 256], sizes = [8, 128], strides = [1, 1]} : vector<8x384xf32> to vector<8x128xf32>
    %423 = math.tanh %421 : vector<8x128xf32>
    %424 = arith.mulf %422, %423 : vector<8x128xf32>
    %c7 = arith.constant 7 : index
    %c0_141 = arith.constant 0 : index
    %c0_142 = arith.constant 0 : index
    %425 = vector.load %arg15[%c7, %c0_141, %c0_142] : memref<8x8x128xf32, #tpu.memory_space<vmem>>, vector<1x8x128xf32>
    %426 = vector.shape_cast %425 : vector<1x8x128xf32> to vector<8x128xf32>
    %427 = vector.shape_cast %424 : vector<8x128xf32> to vector<1x8x128xf32>
    tpu.vector_store %arg15[%c7, %c0_141, %c0_142], %427 {strides = array<i32>} : memref<8x8x128xf32, #tpu.memory_space<vmem>>, vector<1x8x128xf32>,
    %c0_143 = arith.constant 0 : index
    %c0_144 = arith.constant 0 : index
    %c0_145 = arith.constant 0 : index
    %428 = vector.load %arg12[%c0_143, %c0_144, %c0_145] : memref<2x8x128xf32, #tpu.memory_space<vmem>>, vector<1x8x128xf32>
    %429 = vector.shape_cast %428 : vector<1x8x128xf32> to vector<8x128xf32>
    %430 = vector.shape_cast %401 : vector<8x128xf32> to vector<1x8x128xf32>
    tpu.vector_store %arg12[%c0_143, %c0_144, %c0_145], %430 {strides = array<i32>} : memref<2x8x128xf32, #tpu.memory_space<vmem>>, vector<1x8x128xf32>,
    %c0_146 = arith.constant 0 : index
    %c0_147 = arith.constant 0 : index
    %c0_148 = arith.constant 0 : index
    %431 = vector.load %arg13[%c0_146, %c0_147, %c0_148] : memref<2x8x128xf32, #tpu.memory_space<vmem>>, vector<1x8x128xf32>
    %432 = vector.shape_cast %431 : vector<1x8x128xf32> to vector<8x128xf32>
    %433 = vector.shape_cast %398 : vector<8x128xf32> to vector<1x8x128xf32>
    tpu.vector_store %arg13[%c0_146, %c0_147, %c0_148], %433 {strides = array<i32>} : memref<2x8x128xf32, #tpu.memory_space<vmem>>, vector<1x8x128xf32>,
    %c1_149 = arith.constant 1 : index
    %c0_150 = arith.constant 0 : index
    %c0_151 = arith.constant 0 : index
    %434 = vector.load %arg12[%c1_149, %c0_150, %c0_151] : memref<2x8x128xf32, #tpu.memory_space<vmem>>, vector<1x8x128xf32>
    %435 = vector.shape_cast %434 : vector<1x8x128xf32> to vector<8x128xf32>
    %436 = vector.shape_cast %424 : vector<8x128xf32> to vector<1x8x128xf32>
    tpu.vector_store %arg12[%c1_149, %c0_150, %c0_151], %436 {strides = array<i32>} : memref<2x8x128xf32, #tpu.memory_space<vmem>>, vector<1x8x128xf32>,
    %c1_152 = arith.constant 1 : index
    %c0_153 = arith.constant 0 : index
    %c0_154 = arith.constant 0 : index
    %437 = vector.load %arg13[%c1_152, %c0_153, %c0_154] : memref<2x8x128xf32, #tpu.memory_space<vmem>>, vector<1x8x128xf32>
    %438 = vector.shape_cast %437 : vector<1x8x128xf32> to vector<8x128xf32>
    %439 = vector.shape_cast %421 : vector<8x128xf32> to vector<1x8x128xf32>
    tpu.vector_store %arg13[%c1_152, %c0_153, %c0_154], %439 {strides = array<i32>} : memref<2x8x128xf32, #tpu.memory_space<vmem>>, vector<1x8x128xf32>,
    %c1_i32_155 = arith.constant 1 : i32
    %440 = tpu.memref_slice %arg18[%c1_i32_155] : memref<2x!tpu.dma_semaphore, #tpu.memory_space<semaphore_mem>> -> memref<1x!tpu.dma_semaphore, #tpu.memory_space<semaphore_mem>>
    %441 = tpu.memref_squeeze %440 : memref<1x!tpu.dma_semaphore, #tpu.memory_space<semaphore_mem>> -> memref<!tpu.dma_semaphore, #tpu.memory_space<semaphore_mem>>
    tpu.wait_dma2 semaphore(%441 : memref<!tpu.dma_semaphore, #tpu.memory_space<semaphore_mem>>) src(%arg10 : memref<128x128xbf16, #tpu.memory_space<any>>) dst(%arg17 : memref<128x128xbf16, #tpu.memory_space<vmem>>)
    %c0_156 = arith.constant 0 : index
    %c0_157 = arith.constant 0 : index
    %c0_158 = arith.constant 0 : index
    %442 = vector.load %arg15[%c0_156, %c0_157, %c0_158] : memref<8x8x128xf32, #tpu.memory_space<vmem>>, vector<8x8x128xf32>
    %443 = vector.shape_cast %442 : vector<8x8x128xf32> to vector<64x128xf32>
    %444 = arith.truncf %443 : vector<64x128xf32> to vector<64x128xbf16>
    %c0_159 = arith.constant 0 : index
    %c0_160 = arith.constant 0 : index
    %445 = vector.load %arg17[%c0_159, %c0_160] : memref<128x128xbf16, #tpu.memory_space<vmem>>, vector<128x128xbf16>
    %cst_161 = arith.constant dense<0.000000e+00> : vector<64x128xf32>
    %446 = tpu.matmul %444, %445, %cst_161 {dimension_numbers = #tpu.dot_dimension_numbers<[1], [0], [0], [1], [0, 0, 1, 1], [], []>} : vector<64x128xbf16>, vector<128x128xbf16>, vector<64x128xf32> -> vector<64x128xf32>
    %c0_162 = arith.constant 0 : index
    %c0_163 = arith.constant 0 : index
    %447 = vector.load %arg8[%c0_162, %c0_163] : memref<1x128xf32, #tpu.memory_space<vmem>>, vector<1x128xf32>
    %448 = vector.broadcast %447 : vector<1x128xf32> to vector<64x128xf32>
    %449 = arith.addf %446, %448 : vector<64x128xf32>
    %c0_164 = arith.constant 0 : index
    %c0_165 = arith.constant 0 : index
    %450 = vector.load %arg11[%c0_164, %c0_165] : memref<64x128xf32, #tpu.memory_space<vmem>>, vector<64x128xf32>
    tpu.vector_store %arg11[%c0_164, %c0_165], %449 {strides = array<i32>} : memref<64x128xf32, #tpu.memory_space<vmem>>, vector<64x128xf32>,
    return
  }
  func.func @transform_0(%arg0: i32) -> (i32, i32, i32) {
    %c0_i32 = arith.constant 0 : i32
    %c0_i32_0 = arith.constant 0 : i32
    %c0_i32_1 = arith.constant 0 : i32
    %c0_i32_2 = arith.constant 0 : i32
    return %c0_i32, %c0_i32_0, %c0_i32_1 : i32, i32, i32
  }
  func.func @transform_1(%arg0: i32) -> (i32, i32, i32) {
    %c0_i32 = arith.constant 0 : i32
    %c0_i32_0 = arith.constant 0 : i32
    %c0_i32_1 = arith.constant 0 : i32
    %c0_i32_2 = arith.constant 0 : i32
    return %c0_i32, %c0_i32_0, %c0_i32_1 : i32, i32, i32
  }
  func.func @transform_2(%arg0: i32) -> (i32, i32, i32) {
    %c0_i32 = arith.constant 0 : i32
    %c0_i32_0 = arith.constant 0 : i32
    %c0_i32_1 = arith.constant 0 : i32
    %c0_i32_2 = arith.constant 0 : i32
    return %c0_i32, %c0_i32_0, %c0_i32_1 : i32, i32, i32
  }
  func.func @transform_3(%arg0: i32) -> (i32, i32) {
    %c0_i32 = arith.constant 0 : i32
    %c0_i32_0 = arith.constant 0 : i32
    %c0_i32_1 = arith.constant 0 : i32
    return %c0_i32, %c0_i32_0 : i32, i32
  }
  func.func @transform_4(%arg0: i32) -> (i32, i32) {
    %c0_i32 = arith.constant 0 : i32
    %c0_i32_0 = arith.constant 0 : i32
    %c0_i32_1 = arith.constant 0 : i32
    return %c0_i32, %c0_i32_0 : i32, i32
  }
  func.func @transform_5(%arg0: i32) -> (i32, i32) {
    %c0_i32 = arith.constant 0 : i32
    %c0_i32_0 = arith.constant 0 : i32
    %c0_i32_1 = arith.constant 0 : i32
    return %c0_i32, %c0_i32_0 : i32, i32
  }
  func.func @transform_6(%arg0: i32) -> (i32, i32) {
    %c0_i32 = arith.constant 0 : i32
    %c0_i32_0 = arith.constant 0 : i32
    %c0_i32_1 = arith.constant 0 : i32
    return %c0_i32, %c0_i32_0 : i32, i32
  }
  func.func @transform_7(%arg0: i32) -> (i32, i32) {
    %c0_i32 = arith.constant 0 : i32
    %c0_i32_0 = arith.constant 0 : i32
    %c0_i32_1 = arith.constant 0 : i32
    return %c0_i32, %c0_i32_0 : i32, i32
  }
  func.func @transform_10(%arg0: i32) -> (i32, i32) {
    %c0_i32 = arith.constant 0 : i32
    %c0_i32_0 = arith.constant 0 : i32
    %c0_i32_1 = arith.constant 0 : i32
    return %c0_i32, %c0_i32_0 : i32, i32
  }
  func.func @transform_11(%arg0: i32) -> (i32, i32, i32) {
    %c0_i32 = arith.constant 0 : i32
    %c0_i32_0 = arith.constant 0 : i32
    %c0_i32_1 = arith.constant 0 : i32
    %c0_i32_2 = arith.constant 0 : i32
    return %c0_i32, %c0_i32_0, %c0_i32_1 : i32, i32, i32
  }
  func.func @transform_12(%arg0: i32) -> (i32, i32, i32) {
    %c0_i32 = arith.constant 0 : i32
    %c0_i32_0 = arith.constant 0 : i32
    %c0_i32_1 = arith.constant 0 : i32
    %c0_i32_2 = arith.constant 0 : i32
    return %c0_i32, %c0_i32_0, %c0_i32_1 : i32, i32, i32
  }
}

</mosaic_0001>

<bundles_post_ra>
// kernel: rnnlm_forward.1
= control target key start
LH: loop header
LB: loop body
LE: loop exit
PB: predicated region body
PF: predicated region fallthrough
CT: control target
= control target key end

     0   :  { %18 = vsyncpa [#allocation8], 0  ;;  %s7905_s0 = inlined_call_operand.vmem [shape: bf16[8,8,128], index: 0, kind: input, shape index: {}]   ;;  %s7906_s1 = inlined_call_operand.vmem [shape: f32[2,8,128], index: 1, kind: input, shape index: {}]   ;;  %s7907_s2 = inlined_call_operand.vmem [shape: f32[2,8,128], index: 2, kind: input, shape index: {}]   ;;  %s7908_s3 = inlined_call_operand.vmem [shape: bf16[128,512], index: 3, kind: input, shape index: {}]   ;;  %s7909_s4 = inlined_call_operand.hbm [shape: bf16[128,512], index: 4, kind: input, shape index: {}]   ;;  %s7910_s5 = inlined_call_operand.vmem [shape: f32[1,512], index: 5, kind: input, shape index: {}]   ;;  %s7911_s6 = inlined_call_operand.vmem [shape: f32[1,512], index: 6, kind: input, shape index: {}]   ;;  %s7912_s7 = inlined_call_operand.vmem [shape: f32[1,128], index: 7, kind: input, shape index: {}]   ;;  %s7913_s8 = inlined_call_operand.hbm [shape: bf16[256,512], index: 8, kind: input, shape index: {}]   ;;  %s7914_s9 = inlined_call_operand.vmem [shape: bf16[128,128], index: 9, kind: input, shape index: {}]   ;;  %s7915_s10 = inlined_call_operand.vmem [shape: f32[64,128], index: 10, kind: output, shape index: {0}]   ;;  %s7916_s11 = inlined_call_operand.hbm [shape: f32[2,8,128], index: 11, kind: output, shape index: {1}]   ;;  %s7917_s12 = inlined_call_operand.hbm [shape: f32[2,8,128], index: 12, kind: output, shape index: {2}]  }
   0x1   :  { %19 = vsyncpa [#allocation9], 0 }
   0x2   :  { %20 = vsyncpa [#allocation12], 0  ;;  %s5742_s21 = smov [#allocation7]   ;;  %s5666_s25 = scalar_lea.hbm %s7909_s4, 4096 }
   0x3   :  { %s34_s22 = sshll.u32 %s5742_s21, 4  ;;  %p5667_p0 = scmp.ne.s32.totalorder %s7909_s4, %s5666_s25  ;;  %s35_s22 = int_to_ptr.vmem [resolvable:$true] %s34_s22 }
   0x4   :  { %p5670_p1 = scmp.lt.u32.totalorder %s5666_s25, %s7909_s4 }
   0x6   :  { %p5672_p2 = pnand %p5670_p1, %p5667_p0 }
   0x8   :  { %5675 = shalt.err (!%p5672_p2)
}
   0x9   :  { %s5676_s30 = scalar_lea.vmem %s35_s22, 4096  ;;  %p5681_p4 = scmp.lt.s32.totalorder %s35_s22, %s35_s22 }
   0xa   :  { %p5677_p3 = scmp.ne.s32.totalorder %s35_s22, %s5676_s30  ;;  %p5682_p5 = scmp.lt.s32.totalorder %s5676_s30, %s5676_s30 }
   0xc   :  { %p5683_p6 = por %p5682_p5, %p5681_p4 }
   0xe   :  { %p5684_p7 = pnand %p5683_p6, %p5677_p3 }
  0x10   :  { %5687 = shalt.err (!%p5684_p7)
}
  0x11   :  { %s5743_s13 = smov 256   ;;  %s5744_s14 = smov 16  }
  0x12   :  { %40 = dma.hbm_to_vmem [thread:$0]  %s7909_s4, 4096, %s35_s22, [#allocation8], %s5743_s13, %s5743_s13, %s5744_s14  }
  0x13   :  { %5732 = dma.done.wait [#allocation8], 4096  }
  0x14   :  { %5733 = vsyncadd [#allocation8], 4294963200  ;;  %s55_s17 = sld [smem:[#allocation0]]   ;;  %s5745_s18 = smov 512  }
  0x15   :  { %67 = sst [smem:[#allocation14]] %s5745_s18  ;;  %s5746_s19 = smov 4  }
  0x16   :  { %69 = sst [smem:[#allocation14 + $0x1]] %s5745_s18  ;;  %s5747_s20 = smov 64  }
  0x17   :  { %71 = sst [smem:[#allocation14 + $0x2]] %s5746_s19  ;;  %s5748_s21 = smov 128  }
  0x18   :  { %73 = sst [smem:[#allocation14 + $0x3]] %s5747_s20  ;;  %s5749_s23 = smov 2  }
  0x19   :  { %75 = sst [smem:[#allocation14 + $0x4]] %s5748_s21  ;;  %s5750_s24 = smov [#allocation4]  }
  0x1a   :  { %77 = sst [smem:[#allocation14 + $0x5]] %s5749_s23  ;;  %s63_s25 = sshll.u32 %s5750_s24, 4  ;;  %s64_s25 = int_to_ptr.vmem [resolvable:$true] %s63_s25 }
  0x1b   :  { %s4768_s26 = sshll.u32 %s55_s17, 26  ;;  %79 = sst [smem:[#allocation14 + $0x6]] %s5743_s13 }
  0x1c   :  { %s4769_s4 = sadd.s32 134217728, %s4768_s26  ;;  %81 = sst [smem:[#allocation14 + $0x7]] %s5747_s20 }
  0x1d   :  { %83 = sst [smem:[#allocation14 + $0x8]] %s5746_s19  ;;  %s5751_s22 = smov [#allocation6]  }
  0x1e   :  { %s5752_s27 = smov [#allocation13]  }
  0x1f   :  { %85 = dma.general %s7913_s8, 8192, %s64_s25, %s5751_s22, %s5752_s27, [#allocation14], %s4769_s4, 0  }
  0x20   :  { %v5841_v0 = vld [vmem:[%s7914_s9] sm:$0xff]  ;;  %v5846_v1 = vld [vmem:[%s7914_s9 + $0x8] sm:$0xff]  ;;  %v5851_v2 = vld [vmem:[%s7914_s9 + $0x10] sm:$0xff] }
  0x21   :  { %8165 = vst [vmem:[#allocation21_spill] sm:$0xff] %v5841_v0  ;;  %8166 = vst [vmem:[#allocation22_spill] sm:$0xff] %v5846_v1  ;;  %v5856_v3 = vld [vmem:[%s7914_s9 + $0x18] sm:$0xff]  ;;  %v5861_v4 = vld [vmem:[%s7914_s9 + $0x20] sm:$0xff] }
  0x22   :  { %8167 = vst [vmem:[#allocation23_spill] sm:$0xff] %v5851_v2  ;;  %8168 = vst [vmem:[#allocation24_spill] sm:$0xff] %v5856_v3  ;;  %v5866_v5 = vld [vmem:[%s7914_s9 + $0x28] sm:$0xff]  ;;  %v5871_v6 = vld [vmem:[%s7914_s9 + $0x30] sm:$0xff] }
  0x23   :  { %8169 = vst [vmem:[#allocation25_spill] sm:$0xff] %v5861_v4  ;;  %8170 = vst [vmem:[#allocation26_spill] sm:$0xff] %v5866_v5  ;;  %v5876_v7 = vld [vmem:[%s7914_s9 + $0x38] sm:$0xff] }
  0x24   :  { %8171 = vst [vmem:[#allocation27_spill] sm:$0xff] %v5871_v6  ;;  %8172 = vst [vmem:[#allocation28_spill] sm:$0xff] %v5876_v7 }
  0x25   :  { %142 = vsyncadd [#allocation6 + $0x1], 1024  ;;  %v5166_v8 = vld [vmem:[%s7908_s3 + $0x4] ss:$16 sps:$4 sm:$0xff]   ;;  %v5168_v9 = vld [vmem:[%s7908_s3] ss:$16 sps:$4 sm:$0xff]   ;;  %v185_v45 = vlaneseq }
  0x26   :  { %v7918_v10 = vmov 0   ;;  %v5169_v11 = vld [vmem:[%s7908_s3 + $0x24] ss:$16 sps:$4 sm:$0xff]   ;;  %389 = vmatprep.subr.bf16.mxu1 %v5166_v8  ;;  %v5171_v12 = vld [vmem:[%s7908_s3 + $0x20] ss:$16 sps:$4 sm:$0xff]   ;;  %v5197_v31 = vld [vmem:[%s7905_s0 + $0x8] sm:$0xff]  }
  0x27   :  { %421 = vmatprep.mubr.bf16.mxu1 %v7918_v10  ;;  %390 = vmatpush1.bf16.msra.mxu1 %v5168_v9  ;;  %v5172_v13 = vld [vmem:[%s7908_s3 + $0x44] ss:$16 sps:$4 sm:$0xff]   ;;  %v5174_v14 = vld [vmem:[%s7908_s3 + $0x40] ss:$16 sps:$4 sm:$0xff]   ;;  %v5193_v25 = vld [vmem:[%s7908_s3 + $0xc] ss:$16 sps:$4 sm:$0xff]  }
  0x28   :  { %391 = vmatprep.subr.bf16.mxu1 %v5169_v11  ;;  %v5175_v15 = vld [vmem:[%s7908_s3 + $0x64] ss:$16 sps:$4 sm:$0xff]   ;;  %v5177_v16 = vld [vmem:[%s7908_s3 + $0x60] ss:$16 sps:$4 sm:$0xff]   ;;  %v5191_v27 = vld [vmem:[%s7908_s3 + $0x8] ss:$16 sps:$4 sm:$0xff]  }
  0x29   :  { %v5178_v17 = vld [vmem:[%s7908_s3 + $0x84] ss:$16 sps:$4 sm:$0xff]   ;;  %v5180_v18 = vld [vmem:[%s7908_s3 + $0x80] ss:$16 sps:$4 sm:$0xff]   ;;  %v5196_v28 = vld [vmem:[%s7908_s3 + $0x2c] ss:$16 sps:$4 sm:$0xff]  }
  0x2a   :  { %v5181_v19 = vld [vmem:[%s7908_s3 + $0xa4] ss:$16 sps:$4 sm:$0xff]   ;;  %v5183_v20 = vld [vmem:[%s7908_s3 + $0xa0] ss:$16 sps:$4 sm:$0xff]   ;;  %v5194_v29 = vld [vmem:[%s7908_s3 + $0x28] ss:$16 sps:$4 sm:$0xff]  }
  0x2b   :  { %392 = vmatpush1.bf16.msra.mxu1 %v5171_v12  ;;  %v5184_v21 = vld [vmem:[%s7908_s3 + $0xc4] ss:$16 sps:$4 sm:$0xff]   ;;  %v5186_v22 = vld [vmem:[%s7908_s3 + $0xc0] ss:$16 sps:$4 sm:$0xff]   ;;  %v5200_v30 = vld [vmem:[%s7908_s3 + $0x4c] ss:$16 sps:$4 sm:$0xff]  }
  0x2c   :  { %393 = vmatprep.subr.bf16.mxu1 %v5172_v13  ;;  %v5187_v23 = vld [vmem:[%s7908_s3 + $0xe4] ss:$16 sps:$4 sm:$0xff]   ;;  %v5189_v24 = vld [vmem:[%s7908_s3 + $0xe0] ss:$16 sps:$4 sm:$0xff]   ;;  %v5198_v32 = vld [vmem:[%s7908_s3 + $0x48] ss:$16 sps:$4 sm:$0xff]  }
  0x2d   :  { %v5190_v26 = vld [vmem:[%s7905_s0] sm:$0xff]   ;;  %v5203_v33 = vld [vmem:[%s7908_s3 + $0x6c] ss:$16 sps:$4 sm:$0xff]   ;;  %v5201_v34 = vld [vmem:[%s7908_s3 + $0x68] ss:$16 sps:$4 sm:$0xff]   ;;  %v186_v46 = vshrl.u32 %v185_v45, 7 }
  0x2e   :  { %v5207_v35 = vld [vmem:[%s7908_s3 + $0x8c] ss:$16 sps:$4 sm:$0xff]   ;;  %v5204_v36 = vld [vmem:[%s7905_s0 + $0x10] sm:$0xff]   ;;  %v5205_v37 = vld [vmem:[%s7908_s3 + $0x88] ss:$16 sps:$4 sm:$0xff]  }
  0x2f   :  { %394 = vmatpush1.bf16.msra.mxu1 %v5174_v14  ;;  %v5210_v38 = vld [vmem:[%s7908_s3 + $0xac] ss:$16 sps:$4 sm:$0xff]   ;;  %v5208_v39 = vld [vmem:[%s7908_s3 + $0xa8] ss:$16 sps:$4 sm:$0xff]   ;;  %v5994_v47 = vsub.s32 0, %v186_v46  ;;  %v5999_v49 = vsub.s32 1, %v186_v46 }
  0x30   :  { %395 = vmatprep.subr.bf16.mxu1 %v5175_v15  ;;  %v5214_v40 = vld [vmem:[%s7908_s3 + $0xcc] ss:$16 sps:$4 sm:$0xff]   ;;  %v5212_v42 = vld [vmem:[%s7908_s3 + $0xc8] ss:$16 sps:$4 sm:$0xff]   ;;  %v183_v48 = vld [vmem:[%s7910_s5] sm:$0xf] }
  0x31   :  { %v5211_v41 = vld [vmem:[%s7905_s0 + $0x18] sm:$0xff]   ;;  %8173 = vst [vmem:[#allocation29_spill] sm:$0xff] %v5994_v47  ;;  %8174 = vst [vmem:[#allocation30_spill] sm:$0xff] %v5999_v49  ;;  %v188_v50 = vrot.slane %v183_v48, %v5994_v47  ;;  %v192_v51 = vrot.slane %v183_v48, %v5999_v49 }
  0x32   :  { %v5217_v43 = vld [vmem:[%s7908_s3 + $0xec] ss:$16 sps:$4 sm:$0xff]   ;;  %v5215_v44 = vld [vmem:[%s7908_s3 + $0xe8] ss:$16 sps:$4 sm:$0xff]  }
  0x33   :  { %396 = vmatpush1.bf16.msra.mxu1 %v5177_v16 }
  0x34   :  { %397 = vmatprep.subr.bf16.mxu1 %v5178_v17 }
  0x37   :  { %398 = vmatpush1.bf16.msra.mxu1 %v5180_v18 }
  0x38   :  { %399 = vmatprep.subr.bf16.mxu1 %v5181_v19 }
  0x3b   :  { %400 = vmatpush1.bf16.msra.mxu1 %v5183_v20 }
  0x3c   :  { %401 = vmatprep.subr.bf16.mxu1 %v5184_v21 }
  0x3f   :  { %402 = vmatpush1.bf16.msra.mxu1 %v5186_v22 }
  0x40   :  { %403 = vmatprep.subr.bf16.mxu1 %v5187_v23 }
  0x43   :  { %404 = vmatpush1.bf16.msra.mxu1 %v5189_v24  ;;  %v6029_v24 = vsub.s32 2, %v186_v46 }
  0x44   :  { %462 = vmatprep.subr.bf16.mxu1 %v5193_v25 }
  0x45   :  { %8186 = vst [vmem:[#allocation42_spill] sm:$0xff] %v6029_v24 }
  0x46   :  { %422 = vmatmul.mubr.bf16.vlgmr.msra.gmra.mrb[0].mxu1 %v5190_v26 }
  0x47   :  { %463 = vmatpush1.bf16.msra.mxu1 %v5191_v27  ;;  %431 = vmatprep.mubr.bf16.mxu1 %v7918_v10  ;;  %v6033_v27 = vsub.s32 3, %v186_v46 }
  0x48   :  { %464 = vmatprep.subr.bf16.mxu1 %v5196_v28 }
  0x49   :  { %8188 = vst [vmem:[#allocation44_spill] sm:$0xff] %v6033_v27 }
  0x4b   :  { %465 = vmatpush1.bf16.msra.mxu1 %v5194_v29 }
  0x4c   :  { %466 = vmatprep.subr.bf16.mxu1 %v5200_v30 }
  0x4e   :  { %432 = vmatmul.mubr.bf16.gmra.mrb[4].mxu1 %v5197_v31 }
  0x4f   :  { %467 = vmatpush1.bf16.msra.mxu1 %v5198_v32  ;;  %441 = vmatprep.mubr.bf16.mxu1 %v7918_v10  ;;  %v200_v32 = vrot.slane %v183_v48, %v6033_v27 }
  0x50   :  { %468 = vmatprep.subr.bf16.mxu1 %v5203_v33 }
  0x53   :  { %469 = vmatpush1.bf16.msra.mxu1 %v5201_v34 }
  0x54   :  { %470 = vmatprep.subr.bf16.mxu1 %v5207_v35 }
  0x56   :  { %442 = vmatmul.mubr.bf16.gmra.mrb[8].mxu1 %v5204_v36 }
  0x57   :  { %471 = vmatpush1.bf16.msra.mxu1 %v5205_v37  ;;  %451 = vmatprep.mubr.bf16.mxu1 %v7918_v10 }
  0x58   :  { %472 = vmatprep.subr.bf16.mxu1 %v5210_v38 }
  0x5b   :  { %473 = vmatpush1.bf16.msra.mxu1 %v5208_v39 }
  0x5c   :  { %474 = vmatprep.subr.bf16.mxu1 %v5214_v40 }
  0x5e   :  { %452 = vmatmul.mubr.bf16.gmra.mrb[12].mxu1 %v5211_v41 }
  0x5f   :  { %475 = vmatpush1.bf16.msra.mxu1 %v5212_v42  ;;  %494 = vmatprep.mubr.bf16.mxu1 %v7918_v10 }
  0x60   :  { %476 = vmatprep.subr.bf16.mxu1 %v5217_v43 }
  0x63   :  { %477 = vmatpush1.bf16.msra.mxu1 %v5215_v44 }
  0x66   :  { %495 = vmatmul.mubr.bf16.vlgmr.msra.gmra.mrb[16].mxu1 %v5190_v26 }
  0x67   :  { %504 = vmatprep.mubr.bf16.mxu1 %v7918_v10 }
  0x6e   :  { %505 = vmatmul.mubr.bf16.gmra.mrb[20].mxu1 %v5197_v31  ;;  %v196_v31 = vrot.slane %v183_v48, %v6029_v24 }
  0x6f   :  { %514 = vmatprep.mubr.bf16.mxu1 %v7918_v10 }
  0x76   :  { %515 = vmatmul.mubr.bf16.gmra.mrb[24].mxu1 %v5204_v36 }
  0x77   :  { %524 = vmatprep.mubr.bf16.mxu1 %v7918_v10 }
  0x7e   :  { %525 = vmatmul.mubr.bf16.gmra.mrb[28].mxu1 %v5211_v41 }
 0x119   :  { %v423_v52 = vpop.f32.mrb[0].mxu1 }
 0x11a   :  { %v6003_v53 = vadd.f32 %v423_v52, %v188_v50  ;;  %v425_v54 = vpop.f32.mrb[1].mxu1 }
 0x11b   :  { %v6005_v55 = vadd.f32 %v425_v54, %v192_v51  ;;  %v427_v56 = vpop.f32.mrb[2].mxu1 }
 0x11c   :  { %v6007_v57 = vadd.f32 %v427_v56, %v188_v50  ;;  %v429_v58 = vpop.f32.mrb[3].mxu1 }
 0x11d   :  { %v6009_v59 = vadd.f32 %v429_v58, %v192_v51 }
 0x11e   :  { %8175 = vst [vmem:[#allocation31_spill] sm:$0xff] %v6007_v57 }
 0x11f   :  { %8176 = vst [vmem:[#allocation32_spill] sm:$0xff] %v6009_v59 }
 0x121   :  { %v433_v60 = vpop.f32.mrb[4].mxu1 }
 0x122   :  { %v6011_v61 = vadd.f32 %v433_v60, %v188_v50  ;;  %v435_v62 = vpop.f32.mrb[5].mxu1 }
 0x123   :  { %v6013_v63 = vadd.f32 %v435_v62, %v192_v51  ;;  %v437_v8 = vpop.f32.mrb[6].mxu1 }
 0x124   :  { %8177 = vst [vmem:[#allocation33_spill] sm:$0xff] %v6011_v61  ;;  %v6015_v9 = vadd.f32 %v437_v8, %v188_v50  ;;  %v439_v11 = vpop.f32.mrb[7].mxu1 }
 0x125   :  { %8178 = vst [vmem:[#allocation34_spill] sm:$0xff] %v6013_v63  ;;  %v6017_v12 = vadd.f32 %v439_v11, %v192_v51 }
 0x126   :  { %8179 = vst [vmem:[#allocation35_spill] sm:$0xff] %v6015_v9 }
 0x127   :  { %8180 = vst [vmem:[#allocation36_spill] sm:$0xff] %v6017_v12 }
 0x129   :  { %v443_v13 = vpop.f32.mrb[8].mxu1 }
 0x12a   :  { %v6019_v14 = vadd.f32 %v443_v13, %v188_v50  ;;  %v445_v15 = vpop.f32.mrb[9].mxu1 }
 0x12b   :  { %v6021_v16 = vadd.f32 %v445_v15, %v192_v51  ;;  %v447_v17 = vpop.f32.mrb[10].mxu1 }
 0x12c   :  { %8181 = vst [vmem:[#allocation37_spill] sm:$0xff] %v6019_v14  ;;  %v6023_v18 = vadd.f32 %v447_v17, %v188_v50  ;;  %v449_v19 = vpop.f32.mrb[11].mxu1 }
 0x12d   :  { %8182 = vst [vmem:[#allocation38_spill] sm:$0xff] %v6021_v16  ;;  %v6025_v20 = vadd.f32 %v449_v19, %v192_v51 }
 0x12e   :  { %8183 = vst [vmem:[#allocation39_spill] sm:$0xff] %v6023_v18 }
 0x12f   :  { %8184 = vst [vmem:[#allocation40_spill] sm:$0xff] %v6025_v20 }
 0x131   :  { %v453_v21 = vpop.f32.mrb[12].mxu1 }
 0x132   :  { %v6027_v22 = vadd.f32 %v453_v21, %v188_v50  ;;  %v455_v23 = vpop.f32.mrb[13].mxu1 }
 0x133   :  { %v6031_v25 = vadd.f32 %v455_v23, %v192_v51  ;;  %v457_v26 = vpop.f32.mrb[14].mxu1 }
 0x134   :  { %8185 = vst [vmem:[#allocation41_spill] sm:$0xff] %v6027_v22  ;;  %v6035_v28 = vadd.f32 %v457_v26, %v188_v50  ;;  %v459_v29 = vpop.f32.mrb[15].mxu1 }
 0x135   :  { %8187 = vst [vmem:[#allocation43_spill] sm:$0xff] %v6031_v25  ;;  %v6037_v30 = vadd.f32 %v459_v29, %v192_v51 }
 0x136   :  { %8189 = vst [vmem:[#allocation45_spill] sm:$0xff] %v6035_v28 }
 0x137   :  { %8190 = vst [vmem:[#allocation46_spill] sm:$0xff] %v6037_v30 }
 0x139   :  { %v496_v33 = vpop.f32.mrb[16].mxu1 }
 0x13a   :  { %v6041_v34 = vadd.f32 %v496_v33, %v196_v31  ;;  %v498_v35 = vpop.f32.mrb[17].mxu1 }
 0x13b   :  { %v6043_v36 = vadd.f32 %v498_v35, %v200_v32  ;;  %v500_v37 = vpop.f32.mrb[18].mxu1 }
 0x13c   :  { %v6045_v38 = vadd.f32 %v500_v37, %v196_v31  ;;  %v502_v39 = vpop.f32.mrb[19].mxu1 }
 0x13d   :  { %v6047_v40 = vadd.f32 %v502_v39, %v200_v32 }
 0x13e   :  { %8191 = vst [vmem:[#allocation47_spill] sm:$0xff] %v6045_v38 }
 0x13f   :  { %8192 = vst [vmem:[#allocation48_spill] sm:$0xff] %v6047_v40 }
 0x141   :  { %v506_v41 = vpop.f32.mrb[20].mxu1 }
 0x142   :  { %v6049_v42 = vadd.f32 %v506_v41, %v196_v31  ;;  %v508_v43 = vpop.f32.mrb[21].mxu1 }
 0x143   :  { %v6051_v44 = vadd.f32 %v508_v43, %v200_v32  ;;  %v510_v45 = vpop.f32.mrb[22].mxu1 }
 0x144   :  { %8193 = vst [vmem:[#allocation49_spill] sm:$0xff] %v6049_v42  ;;  %v6053_v46 = vadd.f32 %v510_v45, %v196_v31  ;;  %v512_v48 = vpop.f32.mrb[23].mxu1 }
 0x145   :  { %8194 = vst [vmem:[#allocation50_spill] sm:$0xff] %v6051_v44  ;;  %v6055_v50 = vadd.f32 %v512_v48, %v200_v32 }
 0x146   :  { %8195 = vst [vmem:[#allocation51_spill] sm:$0xff] %v6053_v46 }
 0x147   :  { %8196 = vst [vmem:[#allocation52_spill] sm:$0xff] %v6055_v50 }
 0x149   :  { %v516_v51 = vpop.f32.mrb[24].mxu1 }
 0x14a   :  { %v6057_v52 = vadd.f32 %v516_v51, %v196_v31  ;;  %v518_v54 = vpop.f32.mrb[25].mxu1 }
 0x14b   :  { %v6059_v56 = vadd.f32 %v518_v54, %v200_v32  ;;  %v520_v58 = vpop.f32.mrb[26].mxu1 }
 0x14c   :  { %8197 = vst [vmem:[#allocation53_spill] sm:$0xff] %v6057_v52  ;;  %v6061_v60 = vadd.f32 %v520_v58, %v196_v31  ;;  %v522_v62 = vpop.f32.mrb[27].mxu1 }
 0x14d   :  { %8198 = vst [vmem:[#allocation54_spill] sm:$0xff] %v6059_v56  ;;  %v6063_v8 = vadd.f32 %v522_v62, %v200_v32 }
 0x14e   :  { %8199 = vst [vmem:[#allocation55_spill] sm:$0xff] %v6061_v60 }
 0x14f   :  { %8200 = vst [vmem:[#allocation56_spill] sm:$0xff] %v6063_v8 }
 0x151   :  { %v526_v11 = vpop.f32.mrb[28].mxu1 }
 0x152   :  { %v6065_v13 = vadd.f32 %v526_v11, %v196_v31  ;;  %v528_v15 = vpop.f32.mrb[29].mxu1 }
 0x153   :  { %v6067_v17 = vadd.f32 %v528_v15, %v200_v32  ;;  %v530_v19 = vpop.f32.mrb[30].mxu1 }
 0x154   :  { %8201 = vst [vmem:[#allocation57_spill] sm:$0xff] %v6065_v13  ;;  %v6069_v21 = vadd.f32 %v530_v19, %v196_v31  ;;  %v532_v23 = vpop.f32.mrb[31].mxu1 }
 0x155   :  { %8202 = vst [vmem:[#allocation58_spill] sm:$0xff] %v6067_v17  ;;  %v6071_v26 = vadd.f32 %v532_v23, %v200_v32 }
 0x156   :  { %8203 = vst [vmem:[#allocation59_spill] sm:$0xff] %v6069_v21 }
 0x157   :  { %8204 = vst [vmem:[#allocation60_spill] sm:$0xff] %v6071_v26 }
 0x158   :  { %5734 = dma.done.wait [#allocation6], 8192 }
 0x159   :  { %5735 = vsyncadd [#allocation6], 4294959104  ;;  %802 = vmatprep.mubr.bf16.mxu0 %v7918_v10  ;;  %843 = vmatprep.mubr.bf16.mxu1 %v7918_v10  ;;  %v6075_v29 = vld [vmem:[#allocation7 + $0x4] ss:$16 sps:$4 sm:$0xff]   ;;  %v6077_v33 = vld [vmem:[#allocation7] ss:$16 sps:$4 sm:$0xff]  }
 0x15a   :  { %770 = vmatprep.subr.bf16.mxu0 %v6075_v29  ;;  %v6080_v35 = vld [vmem:[#allocation7 + $0x24] ss:$16 sps:$4 sm:$0xff]   ;;  %v6083_v31 = vld [vmem:[#allocation7 + $0x20] ss:$16 sps:$4 sm:$0xff]   ;;  %v6088_v37 = vld [vmem:[#allocation7 + $0xc] ss:$16 sps:$4 sm:$0xff]  }
 0x15b   :  { %771 = vmatpush1.bf16.msra.mxu0 %v6077_v33  ;;  %v6086_v32 = vld [vmem:[#allocation7 + $0x44] ss:$16 sps:$4 sm:$0xff]   ;;  %v6090_v39 = vld [vmem:[#allocation7 + $0x8] ss:$16 sps:$4 sm:$0xff]   ;;  %v6093_v41 = vld [vmem:[#allocation7 + $0x40] ss:$16 sps:$4 sm:$0xff]   ;;  %811 = vmatprep.subr.bf16.mxu1 %v6088_v37 }
 0x15c   :  { %772 = vmatprep.subr.bf16.mxu0 %v6080_v35  ;;  %v6097_v43 = vld [vmem:[#allocation7 + $0x64] ss:$16 sps:$4 sm:$0xff]   ;;  %812 = vmatpush1.bf16.msra.mxu1 %v6090_v39  ;;  %v6100_v45 = vld [vmem:[#allocation7 + $0x2c] ss:$16 sps:$4 sm:$0xff]   ;;  %v6102_v48 = vld [vmem:[#allocation7 + $0x28] ss:$16 sps:$4 sm:$0xff]  }
 0x15d   :  { %813 = vmatprep.subr.bf16.mxu1 %v6100_v45  ;;  %v6106_v51 = vld [vmem:[#allocation7 + $0x60] ss:$16 sps:$4 sm:$0xff]   ;;  %v6108_v54 = vld [vmem:[#allocation7 + $0x84] ss:$16 sps:$4 sm:$0xff]   ;;  %v6110_v58 = vld [vmem:[#allocation7 + $0x4c] ss:$16 sps:$4 sm:$0xff]  }
 0x15e   :  { %v6114_v62 = vld [vmem:[#allocation7 + $0x48] ss:$16 sps:$4 sm:$0xff]   ;;  %v6117_v11 = vld [vmem:[#allocation7 + $0x6c] ss:$16 sps:$4 sm:$0xff]   ;;  %v6120_v15 = vld [vmem:[#allocation7 + $0x80] ss:$16 sps:$4 sm:$0xff]  }
 0x15f   :  { %773 = vmatpush1.bf16.msra.mxu0 %v6083_v31  ;;  %v6123_v19 = vld [vmem:[#allocation7 + $0xa4] ss:$16 sps:$4 sm:$0xff]   ;;  %v6126_v23 = vld [vmem:[#allocation7 + $0x68] ss:$16 sps:$4 sm:$0xff]   ;;  %v6129_v10 = vld [vmem:[#allocation7 + $0x8c] ss:$16 sps:$4 sm:$0xff]  }
 0x160   :  { %774 = vmatprep.subr.bf16.mxu0 %v6086_v32  ;;  %814 = vmatpush1.bf16.msra.mxu1 %v6102_v48  ;;  %v6131_v7 = vld [vmem:[#allocation7 + $0xa0] ss:$16 sps:$4 sm:$0xff]   ;;  %v6134_v6 = vld [vmem:[#allocation7 + $0xc4] ss:$16 sps:$4 sm:$0xff]   ;;  %v6138_v5 = vld [vmem:[#allocation7 + $0x88] ss:$16 sps:$4 sm:$0xff]  }
 0x161   :  { %815 = vmatprep.subr.bf16.mxu1 %v6110_v58  ;;  %v6141_v4 = vld [vmem:[#allocation7 + $0xac] ss:$16 sps:$4 sm:$0xff]   ;;  %v6144_v3 = vld [vmem:[#allocation7 + $0xc0] ss:$16 sps:$4 sm:$0xff]   ;;  %v6147_v2 = vld [vmem:[#allocation7 + $0xe4] ss:$16 sps:$4 sm:$0xff]  }
 0x162   :  { %v6150_v1 = vld [vmem:[#allocation7 + $0xa8] ss:$16 sps:$4 sm:$0xff]   ;;  %v6153_v0 = vld [vmem:[#allocation7 + $0xcc] ss:$16 sps:$4 sm:$0xff]   ;;  %v6155_v26 = vld [vmem:[#allocation7 + $0xe0] ss:$16 sps:$4 sm:$0xff]  }
 0x163   :  { %775 = vmatpush1.bf16.msra.mxu0 %v6093_v41  ;;  %v571_v21 = vld [vmem:[%s7906_s1] sm:$0xff]  ;;  %v6160_v30 = vld [vmem:[#allocation7 + $0xc8] ss:$16 sps:$4 sm:$0xff]   ;;  %v6163_v28 = vld [vmem:[#allocation7 + $0xec] ss:$16 sps:$4 sm:$0xff]  }
 0x164   :  { %776 = vmatprep.subr.bf16.mxu0 %v6097_v43  ;;  %816 = vmatpush1.bf16.msra.mxu1 %v6114_v62  ;;  %v6165_v17 = vld [vmem:[#allocation4 + $0x8] sm:$0xff]  ;;  %v577_v13 = vpack.c.bf16 %v571_v21, %v571_v21  ;;  %v6172_v22 = vld [vmem:[#allocation4] sm:$0xff]  ;;  %v6179_v60 = vld [vmem:[#allocation4 + $0x18] sm:$0xff] }
 0x165   :  { %817 = vmatprep.subr.bf16.mxu1 %v6117_v11  ;;  %v6170_v25 = vld [vmem:[#allocation7 + $0xe8] ss:$16 sps:$4 sm:$0xff]   ;;  %v6182_v20 = vld [vmem:[#allocation4 + $0x20] sm:$0xff]  ;;  %v6185_v21 = vld [vmem:[#allocation4 + $0x10] sm:$0xff] }
 0x166   :  { %v6175_v8 = vld [vmem:[#allocation4 + $0x28] sm:$0xff]  ;;  %v6191_v56 = vld [vmem:[#allocation4 + $0x38] sm:$0xff]  ;;  %v6194_v52 = vld [vmem:[#allocation4 + $0x40] sm:$0xff] }
 0x167   :  { %777 = vmatpush1.bf16.msra.mxu0 %v6106_v51  ;;  %v6187_v18 = vld [vmem:[#allocation4 + $0x48] sm:$0xff]  ;;  %v6197_v16 = vld [vmem:[#allocation4 + $0x30] sm:$0xff]  ;;  %v6203_v50 = vld [vmem:[#allocation4 + $0x58] sm:$0xff] }
 0x168   :  { %778 = vmatprep.subr.bf16.mxu0 %v6108_v54  ;;  %818 = vmatpush1.bf16.msra.mxu1 %v6126_v23  ;;  %v6199_v14 = vld [vmem:[#allocation4 + $0x68] sm:$0xff]  ;;  %v6206_v46 = vld [vmem:[#allocation4 + $0x60] sm:$0xff]  ;;  %v6209_v12 = vld [vmem:[#allocation4 + $0x50] sm:$0xff] }
 0x169   :  { %819 = vmatprep.subr.bf16.mxu1 %v6129_v10  ;;  %8205 = vst [vmem:[#allocation61_spill] sm:$0xff] %v6206_v46  ;;  %v6217_v9 = vld [vmem:[#allocation4 + $0x70] sm:$0xff]  ;;  %v6222_v44 = vld [vmem:[#allocation4 + $0x88] sm:$0xff]  ;;  %v6224_v42 = vld [vmem:[#allocation4 + $0x98] sm:$0xff] }
 0x16a   :  { %8206 = vst [vmem:[#allocation62_spill] sm:$0xff] %v6217_v9  ;;  %8207 = vst [vmem:[#allocation63_spill] sm:$0xff] %v6222_v44  ;;  %v6228_v63 = vld [vmem:[#allocation4 + $0x80] sm:$0xff]  ;;  %v6230_v61 = vld [vmem:[#allocation4 + $0x90] sm:$0xff] }
 0x16b   :  { %779 = vmatpush1.bf16.msra.mxu0 %v6120_v15  ;;  %8208 = vst [vmem:[#allocation64_spill] sm:$0xff] %v6224_v42  ;;  %8209 = vst [vmem:[#allocation65_spill] sm:$0xff] %v6228_v63  ;;  %v6234_v40 = vld [vmem:[#allocation4 + $0xa8] sm:$0xff]  ;;  %v6236_v38 = vld [vmem:[#allocation4 + $0xb8] sm:$0xff] }
 0x16c   :  { %780 = vmatprep.subr.bf16.mxu0 %v6123_v19  ;;  %820 = vmatpush1.bf16.msra.mxu1 %v6138_v5  ;;  %8210 = vst [vmem:[#allocation66_spill] sm:$0xff] %v6230_v61  ;;  %8211 = vst [vmem:[#allocation67_spill] sm:$0xff] %v6234_v40  ;;  %v6240_v59 = vld [vmem:[#allocation4 + $0xa0] sm:$0xff]  ;;  %v6242_v57 = vld [vmem:[#allocation4 + $0xb0] sm:$0xff] }
 0x16d   :  { %821 = vmatprep.subr.bf16.mxu1 %v6141_v4  ;;  %8212 = vst [vmem:[#allocation68_spill] sm:$0xff] %v6236_v38  ;;  %8213 = vst [vmem:[#allocation69_spill] sm:$0xff] %v6240_v59  ;;  %v6246_v27 = vld [vmem:[#allocation4 + $0xc8] sm:$0xff]  ;;  %v6248_v24 = vld [vmem:[#allocation4 + $0xd8] sm:$0xff] }
 0x16e   :  { %8214 = vst [vmem:[#allocation70_spill] sm:$0xff] %v6242_v57  ;;  %8215 = vst [vmem:[#allocation71_spill] sm:$0xff] %v6246_v27  ;;  %v6252_v49 = vld [vmem:[#allocation4 + $0xc0] sm:$0xff]  ;;  %v6254_v47 = vld [vmem:[#allocation4 + $0xd0] sm:$0xff] }
 0x16f   :  { %781 = vmatpush1.bf16.msra.mxu0 %v6131_v7  ;;  %8216 = vst [vmem:[#allocation72_spill] sm:$0xff] %v6248_v24  ;;  %8217 = vst [vmem:[#allocation73_spill] sm:$0xff] %v6252_v49 }
 0x170   :  { %782 = vmatprep.subr.bf16.mxu0 %v6134_v6  ;;  %822 = vmatpush1.bf16.msra.mxu1 %v6150_v1  ;;  %8218 = vst [vmem:[#allocation74_spill] sm:$0xff] %v6254_v47 }
 0x171   :  { %823 = vmatprep.subr.bf16.mxu1 %v6153_v0 }
 0x173   :  { %783 = vmatpush1.bf16.msra.mxu0 %v6144_v3 }
 0x174   :  { %784 = vmatprep.subr.bf16.mxu0 %v6147_v2  ;;  %824 = vmatpush1.bf16.msra.mxu1 %v6160_v30 }
 0x175   :  { %825 = vmatprep.subr.bf16.mxu1 %v6163_v28 }
 0x177   :  { %785 = vmatpush1.bf16.msra.mxu0 %v6155_v26 }
 0x178   :  { %972 = vmatprep.subr.bf16.mxu0 %v6165_v17  ;;  %826 = vmatpush1.bf16.msra.mxu1 %v6170_v25 }
 0x179   :  { %1013 = vmatprep.subr.bf16.mxu1 %v6179_v60 }
 0x17a   :  { %803 = vmatmul.mubr.bf16.vlgmr.msra.gmra.mrb[0].mxu0 %v577_v13 }
 0x17b   :  { %973 = vmatpush1.bf16.msra.mxu0 %v6172_v22  ;;  %844 = vmatmul.mubr.bf16.vlgmr.msra.gmra.mrb[32].mxu1 %v577_v13  ;;  %v6213_v13 = vld [vmem:[#allocation4 + $0x78] sm:$0xff] }
 0x17c   :  { %974 = vmatprep.subr.bf16.mxu0 %v6175_v8  ;;  %1014 = vmatpush1.bf16.msra.mxu1 %v6185_v21 }
 0x17d   :  { %1015 = vmatprep.subr.bf16.mxu1 %v6191_v56 }
 0x17f   :  { %975 = vmatpush1.bf16.msra.mxu0 %v6182_v20 }
 0x180   :  { %976 = vmatprep.subr.bf16.mxu0 %v6187_v18  ;;  %1016 = vmatpush1.bf16.msra.mxu1 %v6197_v16 }
 0x181   :  { %1017 = vmatprep.subr.bf16.mxu1 %v6203_v50 }
 0x183   :  { %977 = vmatpush1.bf16.msra.mxu0 %v6194_v52 }
 0x184   :  { %978 = vmatprep.subr.bf16.mxu0 %v6199_v14  ;;  %1018 = vmatpush1.bf16.msra.mxu1 %v6209_v12 }
 0x185   :  { %1019 = vmatprep.subr.bf16.mxu1 %v6213_v13 }
 0x187   :  { %979 = vmatpush1.bf16.msra.mxu0 %v6206_v46 }
 0x188   :  { %1020 = vmatpush1.bf16.msra.mxu1 %v6217_v9  ;;  %980 = vmatprep.subr.bf16.mxu0 %v6222_v44 }
 0x189   :  { %1021 = vmatprep.subr.bf16.mxu1 %v6224_v42 }
 0x18b   :  { %981 = vmatpush1.bf16.msra.mxu0 %v6228_v63 }
 0x18c   :  { %1022 = vmatpush1.bf16.msra.mxu1 %v6230_v61  ;;  %982 = vmatprep.subr.bf16.mxu0 %v6234_v40  ;;  %v6342_v40 = vld [vmem:[#allocation4 + $0x1d8] sm:$0xff] }
 0x18d   :  { %1023 = vmatprep.subr.bf16.mxu1 %v6236_v38  ;;  %v6258_v38 = vld [vmem:[#allocation4 + $0xe8] sm:$0xff]  ;;  %8248 = vst [vmem:[#allocation104_spill] sm:$0xff] %v6342_v40  ;;  %v6357_v61 = vld [vmem:[#allocation4 + $0x1f8] sm:$0xff] }
 0x18e   :  { %8219 = vst [vmem:[#allocation75_spill] sm:$0xff] %v6258_v38  ;;  %8252 = vst [vmem:[#allocation108_spill] sm:$0xff] %v6357_v61 }
 0x18f   :  { %983 = vmatpush1.bf16.msra.mxu0 %v6240_v59  ;;  %v6260_v59 = vld [vmem:[#allocation4 + $0xf8] sm:$0xff] }
 0x190   :  { %1024 = vmatpush1.bf16.msra.mxu1 %v6242_v57  ;;  %984 = vmatprep.subr.bf16.mxu0 %v6246_v27  ;;  %8220 = vst [vmem:[#allocation76_spill] sm:$0xff] %v6260_v59  ;;  %v6264_v57 = vld [vmem:[#allocation4 + $0xe0] sm:$0xff]  ;;  %v6266_v27 = vld [vmem:[#allocation4 + $0xf0] sm:$0xff] }
 0x191   :  { %1025 = vmatprep.subr.bf16.mxu1 %v6248_v24  ;;  %8221 = vst [vmem:[#allocation77_spill] sm:$0xff] %v6264_v57  ;;  %8222 = vst [vmem:[#allocation78_spill] sm:$0xff] %v6266_v27  ;;  %v6270_v24 = vld [vmem:[#allocation4 + $0x108] sm:$0xff] }
 0x192   :  { %8223 = vst [vmem:[#allocation79_spill] sm:$0xff] %v6270_v24 }
 0x193   :  { %985 = vmatpush1.bf16.msra.mxu0 %v6252_v49  ;;  %v6272_v49 = vld [vmem:[#allocation4 + $0x118] sm:$0xff] }
 0x194   :  { %1026 = vmatpush1.bf16.msra.mxu1 %v6254_v47  ;;  %986 = vmatprep.subr.bf16.mxu0 %v6258_v38  ;;  %8224 = vst [vmem:[#allocation80_spill] sm:$0xff] %v6272_v49  ;;  %v6276_v47 = vld [vmem:[#allocation4 + $0x100] sm:$0xff]  ;;  %v6278_v38 = vld [vmem:[#allocation4 + $0x110] sm:$0xff] }
 0x195   :  { %1027 = vmatprep.subr.bf16.mxu1 %v6260_v59  ;;  %8225 = vst [vmem:[#allocation81_spill] sm:$0xff] %v6276_v47  ;;  %8226 = vst [vmem:[#allocation82_spill] sm:$0xff] %v6278_v38  ;;  %v6282_v59 = vld [vmem:[#allocation4 + $0x128] sm:$0xff] }
 0x196   :  { %8227 = vst [vmem:[#allocation83_spill] sm:$0xff] %v6282_v59 }
 0x197   :  { %987 = vmatpush1.bf16.msra.mxu0 %v6264_v57  ;;  %v6284_v57 = vld [vmem:[#allocation4 + $0x138] sm:$0xff] }
 0x198   :  { %1028 = vmatpush1.bf16.msra.mxu1 %v6266_v27  ;;  %988 = vmatprep.subr.bf16.mxu0 %v6270_v24  ;;  %8228 = vst [vmem:[#allocation84_spill] sm:$0xff] %v6284_v57  ;;  %v6288_v27 = vld [vmem:[#allocation4 + $0x120] sm:$0xff]  ;;  %v6290_v24 = vld [vmem:[#allocation4 + $0x130] sm:$0xff] }
 0x199   :  { %1029 = vmatprep.subr.bf16.mxu1 %v6272_v49  ;;  %8229 = vst [vmem:[#allocation85_spill] sm:$0xff] %v6288_v27  ;;  %8230 = vst [vmem:[#allocation86_spill] sm:$0xff] %v6290_v24  ;;  %v6294_v49 = vld [vmem:[#allocation4 + $0x148] sm:$0xff] }
 0x19a   :  { %8231 = vst [vmem:[#allocation87_spill] sm:$0xff] %v6294_v49 }
 0x19b   :  { %989 = vmatpush1.bf16.msra.mxu0 %v6276_v47  ;;  %v6296_v47 = vld [vmem:[#allocation4 + $0x158] sm:$0xff] }
 0x19c   :  { %1030 = vmatpush1.bf16.msra.mxu1 %v6278_v38  ;;  %990 = vmatprep.subr.bf16.mxu0 %v6282_v59  ;;  %8232 = vst [vmem:[#allocation88_spill] sm:$0xff] %v6296_v47  ;;  %v6300_v38 = vld [vmem:[#allocation4 + $0x140] sm:$0xff]  ;;  %v6302_v59 = vld [vmem:[#allocation4 + $0x150] sm:$0xff] }
 0x19d   :  { %1031 = vmatprep.subr.bf16.mxu1 %v6284_v57  ;;  %8233 = vst [vmem:[#allocation89_spill] sm:$0xff] %v6300_v38  ;;  %8234 = vst [vmem:[#allocation90_spill] sm:$0xff] %v6302_v59  ;;  %v6306_v57 = vld [vmem:[#allocation4 + $0x168] sm:$0xff] }
 0x19e   :  { %8235 = vst [vmem:[#allocation91_spill] sm:$0xff] %v6306_v57 }
 0x19f   :  { %991 = vmatpush1.bf16.msra.mxu0 %v6288_v27  ;;  %v6308_v27 = vld [vmem:[#allocation4 + $0x178] sm:$0xff] }
 0x1a0   :  { %1032 = vmatpush1.bf16.msra.mxu1 %v6290_v24  ;;  %992 = vmatprep.subr.bf16.mxu0 %v6294_v49  ;;  %8236 = vst [vmem:[#allocation92_spill] sm:$0xff] %v6308_v27  ;;  %v6312_v24 = vld [vmem:[#allocation4 + $0x160] sm:$0xff]  ;;  %v6314_v49 = vld [vmem:[#allocation4 + $0x170] sm:$0xff] }
 0x1a1   :  { %1033 = vmatprep.subr.bf16.mxu1 %v6296_v47  ;;  %8237 = vst [vmem:[#allocation93_spill] sm:$0xff] %v6312_v24  ;;  %8238 = vst [vmem:[#allocation94_spill] sm:$0xff] %v6314_v49  ;;  %v6318_v47 = vld [vmem:[#allocation4 + $0x188] sm:$0xff] }
 0x1a2   :  { %8239 = vst [vmem:[#allocation95_spill] sm:$0xff] %v6318_v47 }
 0x1a3   :  { %993 = vmatpush1.bf16.msra.mxu0 %v6300_v38  ;;  %v6320_v38 = vld [vmem:[#allocation4 + $0x198] sm:$0xff] }
 0x1a4   :  { %1034 = vmatpush1.bf16.msra.mxu1 %v6302_v59  ;;  %994 = vmatprep.subr.bf16.mxu0 %v6306_v57  ;;  %8240 = vst [vmem:[#allocation96_spill] sm:$0xff] %v6320_v38  ;;  %v6324_v59 = vld [vmem:[#allocation4 + $0x180] sm:$0xff]  ;;  %v6326_v57 = vld [vmem:[#allocation4 + $0x190] sm:$0xff] }
 0x1a5   :  { %1035 = vmatprep.subr.bf16.mxu1 %v6308_v27  ;;  %8241 = vst [vmem:[#allocation97_spill] sm:$0xff] %v6324_v59  ;;  %8242 = vst [vmem:[#allocation98_spill] sm:$0xff] %v6326_v57  ;;  %v6330_v27 = vld [vmem:[#allocation4 + $0x1a8] sm:$0xff] }
 0x1a6   :  { %8243 = vst [vmem:[#allocation99_spill] sm:$0xff] %v6330_v27 }
 0x1a7   :  { %995 = vmatpush1.bf16.msra.mxu0 %v6312_v24  ;;  %v6332_v24 = vld [vmem:[#allocation4 + $0x1b8] sm:$0xff] }
 0x1a8   :  { %1036 = vmatpush1.bf16.msra.mxu1 %v6314_v49  ;;  %996 = vmatprep.subr.bf16.mxu0 %v6318_v47  ;;  %8244 = vst [vmem:[#allocation100_spill] sm:$0xff] %v6332_v24  ;;  %v6334_v49 = vld [vmem:[#allocation4 + $0x1a0] sm:$0xff]  ;;  %v6338_v47 = vld [vmem:[#allocation4 + $0x1b0] sm:$0xff] }
 0x1a9   :  { %1037 = vmatprep.subr.bf16.mxu1 %v6320_v38  ;;  %8245 = vst [vmem:[#allocation101_spill] sm:$0xff] %v6334_v49  ;;  %8246 = vst [vmem:[#allocation102_spill] sm:$0xff] %v6338_v47  ;;  %v6340_v38 = vld [vmem:[#allocation4 + $0x1c8] sm:$0xff] }
 0x1aa   :  { %8247 = vst [vmem:[#allocation103_spill] sm:$0xff] %v6340_v38 }
 0x1ab   :  { %997 = vmatpush1.bf16.msra.mxu0 %v6324_v59  ;;  %v6350_v59 = vld [vmem:[#allocation4 + $0x1d0] sm:$0xff] }
 0x1ac   :  { %1038 = vmatpush1.bf16.msra.mxu1 %v6326_v57  ;;  %998 = vmatprep.subr.bf16.mxu0 %v6330_v27  ;;  %v6348_v57 = vld [vmem:[#allocation4 + $0x1c0] sm:$0xff]  ;;  %8250 = vst [vmem:[#allocation106_spill] sm:$0xff] %v6350_v59  ;;  %v6355_v27 = vld [vmem:[#allocation4 + $0x1e8] sm:$0xff] }
 0x1ad   :  { %1039 = vmatprep.subr.bf16.mxu1 %v6332_v24  ;;  %8249 = vst [vmem:[#allocation105_spill] sm:$0xff] %v6348_v57  ;;  %v4841_v24 = vld [vmem:[%s7906_s1 + $0x8] sm:$0xff]  ;;  %8251 = vst [vmem:[#allocation107_spill] sm:$0xff] %v6355_v27 }
 0x1ae   :  { %v885_v63 = vpack.c.bf16 %v4841_v24, %v4841_v24 }
 0x1af   :  { %999 = vmatpush1.bf16.msra.mxu0 %v6334_v49 }
 0x1b0   :  { %1040 = vmatpush1.bf16.msra.mxu1 %v6338_v47  ;;  %1000 = vmatprep.subr.bf16.mxu0 %v6340_v38  ;;  %v6365_v38 = vld [vmem:[#allocation4 + $0x1f0] sm:$0xff] }
 0x1b1   :  { %1041 = vmatprep.subr.bf16.mxu1 %v6342_v40  ;;  %v6363_v40 = vld [vmem:[#allocation4 + $0x1e0] sm:$0xff]  ;;  %8254 = vst [vmem:[#allocation110_spill] sm:$0xff] %v6365_v38  ;;  %1004 = vmatprep.mubr.bf16.mxu0 %v885_v63 }
 0x1b2   :  { %8253 = vst [vmem:[#allocation109_spill] sm:$0xff] %v6363_v40  ;;  %1045 = vmatprep.mubr.bf16.mxu1 %v885_v63 }
 0x1b3   :  { %1001 = vmatpush1.bf16.msra.mxu0 %v6348_v57 }
 0x1b4   :  { %1042 = vmatpush1.bf16.msra.mxu1 %v6350_v59  ;;  %1002 = vmatprep.subr.bf16.mxu0 %v6355_v27 }
 0x1b5   :  { %1043 = vmatprep.subr.bf16.mxu1 %v6357_v61 }
 0x1b7   :  { %1003 = vmatpush1.bf16.msra.mxu0 %v6363_v40 }
 0x1b8   :  { %1044 = vmatpush1.bf16.msra.mxu1 %v6365_v38  ;;  %1276 = vmatprep.subr.bf16.mxu0 %v6075_v29 }
 0x1b9   :  { %1317 = vmatprep.subr.bf16.mxu1 %v6088_v37 }
 0x24d   :  { %v804_v24 = vpop.f32.mrb[0].mxu0 }
 0x24e   :  { %v852_v59 = vadd.f32 %v804_v24, %v6003_v53  ;;  %v806_v27 = vpop.f32.mrb[1].mxu0  ;;  %v845_v63 = vpop.f32.mrb[32].mxu1 }
 0x24f   :  { %v853_v61 = vadd.f32 %v806_v27, %v6005_v55  ;;  %v808_v57 = vpop.f32.mrb[2].mxu0  ;;  %v847_v40 = vpop.f32.mrb[33].mxu1  ;;  %v854_v38 = vadd.f32 %v845_v63, %v6041_v34  ;;  %v8300_v63 = vld [vmem:[#allocation105_spill] sm:$0xff] }
 0x250   :  { %v4838_v47 = vmul.f32 -1.442695, %v852_v59  ;;  %v809_v49 = vpop.f32.mrb[3].mxu0  ;;  %v849_v44 = vpop.f32.mrb[34].mxu1  ;;  %v855_v37 = vadd.f32 %v847_v40, %v6043_v36  ;;  %v572_v57 = vld [vmem:[%s7907_s2] sm:$0xff] }
 0x251   :  { %v4839_v42 = vmul.f32 -1.442695, %v853_v61  ;;  %v850_v29 = vpop.f32.mrb[35].mxu1  ;;  %v4840_v9 = vmul.f32 -1.442695, %v854_v38 }
 0x252   :  { %5410 = vpow2.f32 %v4838_v47  ;;  %v8301_v29 = vld [vmem:[#allocation106_spill] sm:$0xff] }
 0x253   :  { %5412 = vpow2.f32 %v4839_v42 }
 0x254   :  { %5414 = vpow2.f32 %v4840_v9 }
 0x255   :  { %5416 = vtanh.f32 %v855_v37  ;;  %v8302_v37 = vld [vmem:[#allocation107_spill] sm:$0xff] }
 0x25c   :  { %v5411_v46 = vpop.eup %5410 }
 0x25d   :  { %v5413_v53 = vpop.eup %5412  ;;  %v865_v24 = vadd.f32 1.0, %v5411_v46  ;;  %v8255_v46 = vmov 0  }
 0x25e   :  { %v866_v55 = vadd.f32 1.0, %v5413_v53  ;;  %v5415_v49 = vpop.eup %5414  ;;  %v8303_v53 = vld [vmem:[#allocation108_spill] sm:$0xff] }
 0x25f   :  { %5418 = vrcp.f32 %v865_v24  ;;  %v5417_v47 = vpop.eup %5416  ;;  %v867_v61 = vadd.f32 1.0, %v5415_v49  ;;  %v8304_v24 = vld [vmem:[#allocation109_spill] sm:$0xff] }
 0x260   :  { %5420 = vrcp.f32 %v866_v55  ;;  %v8305_v55 = vld [vmem:[#allocation110_spill] sm:$0xff]  ;;  %v6477_v49 = vld [vmem:[#allocation7 + $0x4] ss:$16 sps:$4 sm:$0xff]  }
 0x261   :  { %5422 = vrcp.f32 %v867_v61 }
 0x269   :  { %v5419_v59 = vpop.eup %5418 }
 0x26a   :  { %v5421_v27 = vpop.eup %5420  ;;  %v876_v34 = vmul.f32 %v5419_v59, %v5417_v47  ;;  %v6479_v47 = vld [vmem:[#allocation7 + $0xc] ss:$16 sps:$4 sm:$0xff]   ;;  %v8306_v59 = vld [vmem:[#allocation29_spill] sm:$0xff] }
 0x26b   :  { %v875_v38 = vmul.f32 %v5421_v27, %v572_v57  ;;  %v5423_v9 = vpop.eup %5422  ;;  %v950_v57 = vld [vmem:[%s7911_s6] sm:$0xf]  ;;  %v8307_v27 = vld [vmem:[#allocation30_spill] sm:$0xff] }
 0x26c   :  { %v955_v61 = vrot.slane %v950_v57, %v8306_v59 }
 0x26d   :  { %v6378_v36 = vadd.f32 %v876_v34, %v875_v38  ;;  %v959_v34 = vrot.slane %v950_v57, %v8307_v27 }
 0x26f   :  { %5424 = vtanh.f32 %v6378_v36 }
 0x279   :  { %v5425_v40 = vpop.eup %5424 }
 0x27a   :  { %v879_v42 = vmul.f32 %v5425_v40, %v5423_v9 }
 0x27c   :  { %v884_v44 = vpack.c.bf16 %v879_v42, %v879_v42 }
 0x27e   :  { %1005 = vmatmul.mubr.bf16.vlgmr.msra.gmra.mrb[4].mxu0 %v884_v44  ;;  %1046 = vmatmul.mubr.bf16.vlgmr.msra.gmra.mrb[36].mxu1 %v884_v44 }
 0x27f   :  { %1277 = vmatpush1.bf16.msra.mxu0 %v6077_v33  ;;  %1318 = vmatpush1.bf16.msra.mxu1 %v6090_v39  ;;  %v8281_v33 = vld [vmem:[#allocation86_spill] sm:$0xff] }
 0x280   :  { %1278 = vmatprep.subr.bf16.mxu0 %v6080_v35  ;;  %1319 = vmatprep.subr.bf16.mxu1 %v6100_v45  ;;  %v8282_v35 = vld [vmem:[#allocation87_spill] sm:$0xff]  ;;  %v8285_v39 = vld [vmem:[#allocation90_spill] sm:$0xff]  ;;  %v8288_v45 = vld [vmem:[#allocation93_spill] sm:$0xff] }
 0x281   :  { %1308 = vmatprep.mubr.bf16.mxu0 %v8255_v46  ;;  %1349 = vmatprep.mubr.bf16.mxu1 %v8255_v46 }
 0x283   :  { %1279 = vmatpush1.bf16.msra.mxu0 %v6083_v31  ;;  %1320 = vmatpush1.bf16.msra.mxu1 %v6102_v48  ;;  %v8283_v31 = vld [vmem:[#allocation88_spill] sm:$0xff]  ;;  %v8289_v48 = vld [vmem:[#allocation94_spill] sm:$0xff] }
 0x284   :  { %1280 = vmatprep.subr.bf16.mxu0 %v6086_v32  ;;  %1321 = vmatprep.subr.bf16.mxu1 %v6110_v58  ;;  %v8284_v32 = vld [vmem:[#allocation89_spill] sm:$0xff] }
 0x285   :  { %v8292_v58 = vld [vmem:[#allocation97_spill] sm:$0xff] }
 0x287   :  { %1281 = vmatpush1.bf16.msra.mxu0 %v6093_v41  ;;  %1322 = vmatpush1.bf16.msra.mxu1 %v6114_v62  ;;  %v8286_v41 = vld [vmem:[#allocation91_spill] sm:$0xff]  ;;  %v8293_v62 = vld [vmem:[#allocation98_spill] sm:$0xff] }
 0x288   :  { %1282 = vmatprep.subr.bf16.mxu0 %v6097_v43  ;;  %1323 = vmatprep.subr.bf16.mxu1 %v6117_v11  ;;  %v8287_v43 = vld [vmem:[#allocation92_spill] sm:$0xff]  ;;  %v8294_v11 = vld [vmem:[#allocation99_spill] sm:$0xff] }
 0x28b   :  { %1283 = vmatpush1.bf16.msra.mxu0 %v6106_v51  ;;  %1324 = vmatpush1.bf16.msra.mxu1 %v6126_v23  ;;  %v8290_v51 = vld [vmem:[#allocation95_spill] sm:$0xff]  ;;  %v8297_v23 = vld [vmem:[#allocation102_spill] sm:$0xff] }
 0x28c   :  { %1284 = vmatprep.subr.bf16.mxu0 %v6108_v54  ;;  %1325 = vmatprep.subr.bf16.mxu1 %v6129_v10  ;;  %v8264_v10 = vld [vmem:[#allocation69_spill] sm:$0xff]  ;;  %v8291_v54 = vld [vmem:[#allocation96_spill] sm:$0xff] }
 0x28f   :  { %1285 = vmatpush1.bf16.msra.mxu0 %v6120_v15  ;;  %1326 = vmatpush1.bf16.msra.mxu1 %v6138_v5  ;;  %v8261_v5 = vld [vmem:[#allocation66_spill] sm:$0xff]  ;;  %v8295_v15 = vld [vmem:[#allocation100_spill] sm:$0xff] }
 0x290   :  { %1286 = vmatprep.subr.bf16.mxu0 %v6123_v19  ;;  %1327 = vmatprep.subr.bf16.mxu1 %v6141_v4  ;;  %v8260_v4 = vld [vmem:[#allocation65_spill] sm:$0xff] }
 0x291   :  { %v8296_v19 = vld [vmem:[#allocation101_spill] sm:$0xff] }
 0x293   :  { %1287 = vmatpush1.bf16.msra.mxu0 %v6131_v7  ;;  %1328 = vmatpush1.bf16.msra.mxu1 %v6150_v1  ;;  %v8257_v1 = vld [vmem:[#allocation62_spill] sm:$0xff]  ;;  %v8263_v7 = vld [vmem:[#allocation68_spill] sm:$0xff] }
 0x294   :  { %1288 = vmatprep.subr.bf16.mxu0 %v6134_v6  ;;  %1329 = vmatprep.subr.bf16.mxu1 %v6153_v0  ;;  %v8256_v0 = vld [vmem:[#allocation61_spill] sm:$0xff]  ;;  %v8262_v6 = vld [vmem:[#allocation67_spill] sm:$0xff] }
 0x297   :  { %1289 = vmatpush1.bf16.msra.mxu0 %v6144_v3  ;;  %1330 = vmatpush1.bf16.msra.mxu1 %v6160_v30  ;;  %v8259_v3 = vld [vmem:[#allocation64_spill] sm:$0xff]  ;;  %v8273_v30 = vld [vmem:[#allocation78_spill] sm:$0xff] }
 0x298   :  { %1290 = vmatprep.subr.bf16.mxu0 %v6147_v2  ;;  %1331 = vmatprep.subr.bf16.mxu1 %v6163_v28  ;;  %v8258_v2 = vld [vmem:[#allocation63_spill] sm:$0xff]  ;;  %v8272_v28 = vld [vmem:[#allocation77_spill] sm:$0xff] }
 0x29b   :  { %1291 = vmatpush1.bf16.msra.mxu0 %v6155_v26  ;;  %1332 = vmatpush1.bf16.msra.mxu1 %v6170_v25  ;;  %v8271_v25 = vld [vmem:[#allocation76_spill] sm:$0xff]  ;;  %v8280_v26 = vld [vmem:[#allocation85_spill] sm:$0xff] }
 0x29c   :  { %1474 = vmatprep.subr.bf16.mxu0 %v6165_v17  ;;  %1515 = vmatprep.subr.bf16.mxu1 %v6179_v60  ;;  %v8277_v60 = vld [vmem:[#allocation82_spill] sm:$0xff]  ;;  %v8279_v17 = vld [vmem:[#allocation84_spill] sm:$0xff] }
 0x29e   :  { %1309 = vmatmul.mubr.bf16.vlgmr.msra.gmra.mrb[8].mxu0 %v884_v44  ;;  %1350 = vmatmul.mubr.bf16.vlgmr.msra.gmra.mrb[40].mxu1 %v884_v44 }
 0x29f   :  { %1475 = vmatpush1.bf16.msra.mxu0 %v6172_v22  ;;  %1516 = vmatpush1.bf16.msra.mxu1 %v6185_v21  ;;  %v8270_v22 = vld [vmem:[#allocation75_spill] sm:$0xff] }
 0x2a0   :  { %1476 = vmatprep.subr.bf16.mxu0 %v6175_v8  ;;  %1517 = vmatprep.subr.bf16.mxu1 %v6191_v56  ;;  %v8276_v56 = vld [vmem:[#allocation81_spill] sm:$0xff]  ;;  %v8278_v8 = vld [vmem:[#allocation83_spill] sm:$0xff] }
 0x2a1   :  { %v8298_v21 = vld [vmem:[#allocation103_spill] sm:$0xff] }
 0x2a3   :  { %1477 = vmatpush1.bf16.msra.mxu0 %v6182_v20  ;;  %1518 = vmatpush1.bf16.msra.mxu1 %v6197_v16  ;;  %v8267_v16 = vld [vmem:[#allocation72_spill] sm:$0xff]  ;;  %v8269_v20 = vld [vmem:[#allocation74_spill] sm:$0xff] }
 0x2a4   :  { %1478 = vmatprep.subr.bf16.mxu0 %v6187_v18  ;;  %1519 = vmatprep.subr.bf16.mxu1 %v6203_v50  ;;  %v8268_v18 = vld [vmem:[#allocation73_spill] sm:$0xff]  ;;  %v8274_v50 = vld [vmem:[#allocation79_spill] sm:$0xff] }
 0x2a7   :  { %1479 = vmatpush1.bf16.msra.mxu0 %v6194_v52  ;;  %1520 = vmatpush1.bf16.msra.mxu1 %v6209_v12  ;;  %v8265_v12 = vld [vmem:[#allocation70_spill] sm:$0xff]  ;;  %v8275_v52 = vld [vmem:[#allocation80_spill] sm:$0xff] }
 0x2a8   :  { %1480 = vmatprep.subr.bf16.mxu0 %v6199_v14  ;;  %1521 = vmatprep.subr.bf16.mxu1 %v6213_v13  ;;  %v8266_v14 = vld [vmem:[#allocation71_spill] sm:$0xff]  ;;  %v8299_v13 = vld [vmem:[#allocation104_spill] sm:$0xff] }
 0x2ab   :  { %1481 = vmatpush1.bf16.msra.mxu0 %v8256_v0  ;;  %1522 = vmatpush1.bf16.msra.mxu1 %v8257_v1 }
 0x2ac   :  { %1482 = vmatprep.subr.bf16.mxu0 %v8258_v2  ;;  %1523 = vmatprep.subr.bf16.mxu1 %v8259_v3 }
 0x2af   :  { %1483 = vmatpush1.bf16.msra.mxu0 %v8260_v4  ;;  %1524 = vmatpush1.bf16.msra.mxu1 %v8261_v5 }
 0x2b0   :  { %1484 = vmatprep.subr.bf16.mxu0 %v8262_v6  ;;  %1525 = vmatprep.subr.bf16.mxu1 %v8263_v7  ;;  %v8308_v7 = vld [vmem:[#allocation42_spill] sm:$0xff] }
 0x2b3   :  { %1485 = vmatpush1.bf16.msra.mxu0 %v8264_v10  ;;  %1526 = vmatpush1.bf16.msra.mxu1 %v8265_v12  ;;  %v963_v10 = vrot.slane %v950_v57, %v8308_v7  ;;  %v8309_v12 = vld [vmem:[#allocation44_spill] sm:$0xff] }
 0x2b4   :  { %1486 = vmatprep.subr.bf16.mxu0 %v8266_v14  ;;  %1527 = vmatprep.subr.bf16.mxu1 %v8267_v16  ;;  %v967_v14 = vrot.slane %v950_v57, %v8309_v12 }
 0x2b7   :  { %1487 = vmatpush1.bf16.msra.mxu0 %v8268_v18  ;;  %1528 = vmatpush1.bf16.msra.mxu1 %v8269_v20 }
 0x2b8   :  { %1488 = vmatprep.subr.bf16.mxu0 %v8270_v22  ;;  %1529 = vmatprep.subr.bf16.mxu1 %v8271_v25 }
 0x2bb   :  { %1489 = vmatpush1.bf16.msra.mxu0 %v8272_v28  ;;  %1530 = vmatpush1.bf16.msra.mxu1 %v8273_v30 }
 0x2bc   :  { %1490 = vmatprep.subr.bf16.mxu0 %v8274_v50  ;;  %1531 = vmatprep.subr.bf16.mxu1 %v8275_v52 }
 0x2bf   :  { %1491 = vmatpush1.bf16.msra.mxu0 %v8276_v56  ;;  %1532 = vmatpush1.bf16.msra.mxu1 %v8277_v60  ;;  %v4842_v60 = vld [vmem:[%s7907_s2 + $0x8] sm:$0xff] }
 0x2c0   :  { %1492 = vmatprep.subr.bf16.mxu0 %v8278_v8  ;;  %1533 = vmatprep.subr.bf16.mxu1 %v8279_v17 }
 0x2c3   :  { %1493 = vmatpush1.bf16.msra.mxu0 %v8280_v26  ;;  %1534 = vmatpush1.bf16.msra.mxu1 %v8281_v33 }
 0x2c4   :  { %1494 = vmatprep.subr.bf16.mxu0 %v8282_v35  ;;  %1535 = vmatprep.subr.bf16.mxu1 %v8283_v31 }
 0x2c7   :  { %1495 = vmatpush1.bf16.msra.mxu0 %v8284_v32  ;;  %1536 = vmatpush1.bf16.msra.mxu1 %v8285_v39  ;;  %v8310_v39 = vld [vmem:[#allocation31_spill] sm:$0xff] }
 0x2c8   :  { %1496 = vmatprep.subr.bf16.mxu0 %v8286_v41  ;;  %1537 = vmatprep.subr.bf16.mxu1 %v8287_v43 }
 0x2cb   :  { %1497 = vmatpush1.bf16.msra.mxu0 %v8288_v45  ;;  %1538 = vmatpush1.bf16.msra.mxu1 %v8289_v48  ;;  %v8311_v48 = vld [vmem:[#allocation32_spill] sm:$0xff] }
 0x2cc   :  { %1498 = vmatprep.subr.bf16.mxu0 %v8290_v51  ;;  %1539 = vmatprep.subr.bf16.mxu1 %v8291_v54 }
 0x2cf   :  { %1499 = vmatpush1.bf16.msra.mxu0 %v8292_v58  ;;  %1540 = vmatpush1.bf16.msra.mxu1 %v8293_v62 }
 0x2d0   :  { %1500 = vmatprep.subr.bf16.mxu0 %v8294_v11  ;;  %1541 = vmatprep.subr.bf16.mxu1 %v8295_v15 }
 0x2d3   :  { %1501 = vmatpush1.bf16.msra.mxu0 %v8296_v19  ;;  %1542 = vmatpush1.bf16.msra.mxu1 %v8297_v23  ;;  %v8312_v23 = vld [vmem:[#allocation47_spill] sm:$0xff] }
 0x2d4   :  { %1502 = vmatprep.subr.bf16.mxu0 %v8298_v21  ;;  %1543 = vmatprep.subr.bf16.mxu1 %v8299_v13 }
 0x2d7   :  { %1503 = vmatpush1.bf16.msra.mxu0 %v8300_v63  ;;  %1544 = vmatpush1.bf16.msra.mxu1 %v8301_v29  ;;  %v8313_v63 = vld [vmem:[#allocation48_spill] sm:$0xff] }
 0x2d8   :  { %1504 = vmatprep.subr.bf16.mxu0 %v8302_v37  ;;  %1545 = vmatprep.subr.bf16.mxu1 %v8303_v53 }
 0x2db   :  { %1505 = vmatpush1.bf16.msra.mxu0 %v8304_v24  ;;  %1546 = vmatpush1.bf16.msra.mxu1 %v8305_v55 }
 0x2dc   :  { %1779 = vmatprep.subr.bf16.mxu0 %v6477_v49  ;;  %1820 = vmatprep.subr.bf16.mxu1 %v6479_v47 }
 0x351   :  { %v1006_v38 = vpop.f32.mrb[4].mxu0  ;;  %v1047_v9 = vpop.f32.mrb[36].mxu1 }
 0x352   :  { %v1007_v40 = vadd.f32 %v1006_v38, %v955_v61  ;;  %v1008_v42 = vpop.f32.mrb[5].mxu0  ;;  %v1049_v44 = vpop.f32.mrb[37].mxu1  ;;  %v1048_v16 = vadd.f32 %v1047_v9, %v963_v10  ;;  %v6508_v10 = vld [vmem:[#allocation7] ss:$16 sps:$4 sm:$0xff]  }
 0x353   :  { %v1009_v0 = vadd.f32 %v1008_v42, %v959_v34  ;;  %v1010_v1 = vpop.f32.mrb[6].mxu0  ;;  %v1051_v2 = vpop.f32.mrb[38].mxu1  ;;  %v1050_v18 = vadd.f32 %v1049_v44, %v967_v14  ;;  %v6510_v14 = vld [vmem:[#allocation7 + $0x8] ss:$16 sps:$4 sm:$0xff]  }
 0x354   :  { %v4843_v3 = vmul.f32 -1.442695, %v1007_v40  ;;  %v1011_v4 = vpop.f32.mrb[7].mxu0  ;;  %v1052_v5 = vpop.f32.mrb[39].mxu1  ;;  %v4845_v20 = vmul.f32 -1.442695, %v1048_v16 }
 0x355   :  { %v4844_v6 = vmul.f32 -1.442695, %v1009_v0 }
 0x356   :  { %5426 = vpow2.f32 %v4843_v3 }
 0x357   :  { %5428 = vpow2.f32 %v4844_v6 }
 0x358   :  { %5430 = vtanh.f32 %v1050_v18  ;;  %v6514_v18 = vld [vmem:[#allocation7 + $0x24] ss:$16 sps:$4 sm:$0xff]  }
 0x359   :  { %5432 = vpow2.f32 %v4845_v20  ;;  %v6516_v20 = vld [vmem:[#allocation7 + $0x2c] ss:$16 sps:$4 sm:$0xff]  }
 0x360   :  { %v5427_v22 = vpop.eup %5426 }
 0x361   :  { %v1063_v25 = vadd.f32 1.0, %v5427_v22  ;;  %v5429_v28 = vpop.eup %5428  ;;  %v6524_v22 = vld [vmem:[#allocation7 + $0x28] ss:$16 sps:$4 sm:$0xff]  }
 0x362   :  { %v1064_v30 = vadd.f32 1.0, %v5429_v28  ;;  %v5431_v50 = vpop.eup %5430  ;;  %v6530_v28 = vld [vmem:[#allocation7 + $0x4c] ss:$16 sps:$4 sm:$0xff]  }
 0x363   :  { %5434 = vrcp.f32 %v1063_v25  ;;  %v5433_v52 = vpop.eup %5432  ;;  %v6528_v25 = vld [vmem:[#allocation7 + $0x44] ss:$16 sps:$4 sm:$0xff]  }
 0x364   :  { %5436 = vrcp.f32 %v1064_v30  ;;  %v1065_v26 = vadd.f32 1.0, %v5433_v52  ;;  %v6536_v30 = vld [vmem:[#allocation7 + $0x40] ss:$16 sps:$4 sm:$0xff]   ;;  %v6542_v52 = vld [vmem:[#allocation7 + $0x64] ss:$16 sps:$4 sm:$0xff]  }
 0x366   :  { %5438 = vrcp.f32 %v1065_v26  ;;  %v6556_v26 = vld [vmem:[#allocation7 + $0x8c] ss:$16 sps:$4 sm:$0xff]  }
 0x36d   :  { %v5435_v56 = vpop.eup %5434 }
 0x36e   :  { %v1074_v8 = vmul.f32 %v5435_v56, %v5431_v50  ;;  %v5437_v17 = vpop.eup %5436  ;;  %v6538_v50 = vld [vmem:[#allocation7 + $0x48] ss:$16 sps:$4 sm:$0xff]   ;;  %v6544_v56 = vld [vmem:[#allocation7 + $0x6c] ss:$16 sps:$4 sm:$0xff]  }
 0x36f   :  { %v1073_v33 = vmul.f32 %v5437_v17, %v4842_v60  ;;  %v6548_v60 = vld [vmem:[#allocation7 + $0x60] ss:$16 sps:$4 sm:$0xff]   ;;  %v6554_v17 = vld [vmem:[#allocation7 + $0x84] ss:$16 sps:$4 sm:$0xff]  }
 0x370   :  { %v5439_v13 = vpop.eup %5438 }
 0x371   :  { %v1310_v35 = vpop.f32.mrb[8].mxu0  ;;  %v1351_v31 = vpop.f32.mrb[40].mxu1  ;;  %v6493_v32 = vadd.f32 %v1074_v8, %v1073_v33  ;;  %v6550_v8 = vld [vmem:[#allocation7 + $0x68] ss:$16 sps:$4 sm:$0xff]   ;;  %v6560_v33 = vld [vmem:[#allocation7 + $0x80] ss:$16 sps:$4 sm:$0xff]  }
 0x372   :  { %v1358_v41 = vadd.f32 %v1310_v35, %v8310_v39  ;;  %v1312_v43 = vpop.f32.mrb[9].mxu0  ;;  %v1353_v45 = vpop.f32.mrb[41].mxu1  ;;  %v1360_v21 = vadd.f32 %v1351_v31, %v8312_v23  ;;  %v6562_v35 = vld [vmem:[#allocation7 + $0x88] ss:$16 sps:$4 sm:$0xff]   ;;  %v6566_v31 = vld [vmem:[#allocation7 + $0xa4] ss:$16 sps:$4 sm:$0xff]  }
 0x373   :  { %v1359_v51 = vadd.f32 %v1312_v43, %v8311_v48  ;;  %v1314_v54 = vpop.f32.mrb[10].mxu0  ;;  %v1355_v58 = vpop.f32.mrb[42].mxu1  ;;  %5440 = vtanh.f32 %v6493_v32  ;;  %v1361_v29 = vadd.f32 %v1353_v45, %v8313_v63  ;;  %v6568_v39 = vld [vmem:[#allocation7 + $0xac] ss:$16 sps:$4 sm:$0xff]   ;;  %v6574_v43 = vld [vmem:[#allocation7 + $0xa8] ss:$16 sps:$4 sm:$0xff]  }
 0x374   :  { %v4878_v62 = vmul.f32 -1.442695, %v1358_v41  ;;  %v1315_v11 = vpop.f32.mrb[11].mxu0  ;;  %v1356_v15 = vpop.f32.mrb[43].mxu1  ;;  %v4880_v53 = vmul.f32 -1.442695, %v1360_v21 }
 0x375   :  { %v4879_v19 = vmul.f32 -1.442695, %v1359_v51  ;;  %v6572_v41 = vld [vmem:[#allocation7 + $0xa0] ss:$16 sps:$4 sm:$0xff]   ;;  %v6578_v45 = vld [vmem:[#allocation7 + $0xc4] ss:$16 sps:$4 sm:$0xff]  }
 0x376   :  { %5442 = vpow2.f32 %v4878_v62  ;;  %v6580_v48 = vld [vmem:[#allocation7 + $0xcc] ss:$16 sps:$4 sm:$0xff]   ;;  %v6584_v51 = vld [vmem:[#allocation7 + $0xc0] ss:$16 sps:$4 sm:$0xff]   ;;  %v6586_v54 = vld [vmem:[#allocation7 + $0xc8] ss:$16 sps:$4 sm:$0xff]  }
 0x377   :  { %5444 = vpow2.f32 %v4879_v19  ;;  %v6590_v58 = vld [vmem:[#allocation7 + $0xe4] ss:$16 sps:$4 sm:$0xff]   ;;  %v6592_v62 = vld [vmem:[#allocation7 + $0xec] ss:$16 sps:$4 sm:$0xff]   ;;  %v6596_v11 = vld [vmem:[#allocation7 + $0xe0] ss:$16 sps:$4 sm:$0xff]  }
 0x378   :  { %5446 = vtanh.f32 %v1361_v29  ;;  %v6598_v15 = vld [vmem:[#allocation7 + $0xe8] ss:$16 sps:$4 sm:$0xff]   ;;  %v6612_v21 = vld [vmem:[#allocation4] sm:$0xff] }
 0x379   :  { %5448 = vpow2.f32 %v4880_v53  ;;  %v6606_v19 = vld [vmem:[#allocation4 + $0x8] sm:$0xff]  ;;  %v6608_v23 = vld [vmem:[#allocation4 + $0x18] sm:$0xff]  ;;  %v6626_v53 = vld [vmem:[#allocation4 + $0x30] sm:$0xff] }
 0x37a   :  { %v6618_v63 = vld [vmem:[#allocation4 + $0x28] sm:$0xff]  ;;  %v6620_v29 = vld [vmem:[#allocation4 + $0x38] sm:$0xff] }
 0x37d   :  { %v5441_v37 = vpop.eup %5440 }
 0x37e   :  { %v6500_v24 = vmul.f32 %v5441_v37, %v5439_v13  ;;  %v6614_v13 = vld [vmem:[#allocation4 + $0x10] sm:$0xff]  ;;  %v6624_v37 = vld [vmem:[#allocation4 + $0x20] sm:$0xff] }
 0x380   :  { %8314 = vst [vmem:[#allocation61_spill] sm:$0xff] %v6500_v24  ;;  %v5443_v55 = vpop.eup %5442  ;;  %v1387_v61 = vpack.c.bf16 %v6500_v24, %v6500_v24  ;;  %v6678_v24 = vld [vmem:[#allocation4 + $0xc8] sm:$0xff] }
 0x381   :  { %v1371_v57 = vadd.f32 1.0, %v5443_v55  ;;  %v5445_v34 = vpop.eup %5444  ;;  %v6630_v55 = vld [vmem:[#allocation4 + $0x48] sm:$0xff]  ;;  %8331 = vst [vmem:[#allocation78_spill] sm:$0xff] %v6678_v24 }
 0x382   :  { %v1372_v38 = vadd.f32 1.0, %v5445_v34  ;;  %1506 = vmatprep.mubr.bf16.mxu0 %v1387_v61  ;;  %1547 = vmatprep.mubr.bf16.mxu1 %v1387_v61  ;;  %v5447_v9 = vpop.eup %5446  ;;  %8315 = vst [vmem:[#allocation62_spill] sm:$0xff] %v6630_v55  ;;  %v6636_v61 = vld [vmem:[#allocation4 + $0x40] sm:$0xff]  ;;  %v6638_v34 = vld [vmem:[#allocation4 + $0x50] sm:$0xff] }
 0x383   :  { %5450 = vrcp.f32 %v1371_v57  ;;  %v5449_v40 = vpop.eup %5448  ;;  %v6632_v57 = vld [vmem:[#allocation4 + $0x58] sm:$0xff]  ;;  %8317 = vst [vmem:[#allocation64_spill] sm:$0xff] %v6636_v61  ;;  %8318 = vst [vmem:[#allocation65_spill] sm:$0xff] %v6638_v34 }
 0x384   :  { %5452 = vrcp.f32 %v1372_v38  ;;  %v1373_v1 = vadd.f32 1.0, %v5449_v40  ;;  %8316 = vst [vmem:[#allocation63_spill] sm:$0xff] %v6632_v57  ;;  %v6642_v38 = vld [vmem:[#allocation4 + $0x68] sm:$0xff]  ;;  %v6648_v40 = vld [vmem:[#allocation4 + $0x60] sm:$0xff] }
 0x385   :  { %8319 = vst [vmem:[#allocation66_spill] sm:$0xff] %v6642_v38  ;;  %8321 = vst [vmem:[#allocation68_spill] sm:$0xff] %v6648_v40 }
 0x386   :  { %5454 = vrcp.f32 %v1373_v1  ;;  %v6660_v1 = vld [vmem:[#allocation4 + $0x80] sm:$0xff] }
 0x387   :  { %8325 = vst [vmem:[#allocation72_spill] sm:$0xff] %v6660_v1 }
 0x38d   :  { %v5451_v42 = vpop.eup %5450 }
 0x38e   :  { %v1382_v44 = vmul.f32 %v5451_v42, %v5447_v9  ;;  %v5453_v0 = vpop.eup %5452  ;;  %v6644_v9 = vld [vmem:[#allocation4 + $0x78] sm:$0xff]  ;;  %v6650_v42 = vld [vmem:[#allocation4 + $0x70] sm:$0xff] }
 0x38f   :  { %v1381_v2 = vmul.f32 %v5453_v0, %v6378_v36  ;;  %v6522_v36 = vld [vmem:[#allocation7 + $0x20] ss:$16 sps:$4 sm:$0xff]   ;;  %8320 = vst [vmem:[#allocation67_spill] sm:$0xff] %v6644_v9  ;;  %8322 = vst [vmem:[#allocation69_spill] sm:$0xff] %v6650_v42  ;;  %v6656_v0 = vld [vmem:[#allocation4 + $0x98] sm:$0xff] }
 0x390   :  { %v5455_v4 = vpop.eup %5454  ;;  %8324 = vst [vmem:[#allocation71_spill] sm:$0xff] %v6656_v0 }
 0x391   :  { %v6505_v3 = vadd.f32 %v1382_v44, %v1381_v2  ;;  %v6654_v44 = vld [vmem:[#allocation4 + $0x88] sm:$0xff]  ;;  %v6662_v2 = vld [vmem:[#allocation4 + $0x90] sm:$0xff] }
 0x392   :  { %8323 = vst [vmem:[#allocation70_spill] sm:$0xff] %v6654_v44  ;;  %8326 = vst [vmem:[#allocation73_spill] sm:$0xff] %v6662_v2 }
 0x393   :  { %5456 = vtanh.f32 %v6505_v3 }
 0x39d   :  { %v5457_v5 = vpop.eup %5456 }
 0x39e   :  { %v1385_v6 = vmul.f32 %v5457_v5, %v5455_v4  ;;  %v6666_v4 = vld [vmem:[#allocation4 + $0xa8] sm:$0xff]  ;;  %v6668_v5 = vld [vmem:[#allocation4 + $0xb8] sm:$0xff] }
 0x39f   :  { %8327 = vst [vmem:[#allocation74_spill] sm:$0xff] %v6666_v4  ;;  %8328 = vst [vmem:[#allocation75_spill] sm:$0xff] %v6668_v5 }
 0x3a0   :  { %v6512_v16 = vpack.c.bf16 %v1385_v6, %v1385_v6  ;;  %v6672_v6 = vld [vmem:[#allocation4 + $0xa0] sm:$0xff] }
 0x3a1   :  { %8329 = vst [vmem:[#allocation76_spill] sm:$0xff] %v6672_v6 }
 0x3a2   :  { %1507 = vmatmul.mubr.bf16.vlgmr.msra.gmra.mrb[12].mxu0 %v6512_v16  ;;  %1548 = vmatmul.mubr.bf16.vlgmr.msra.gmra.mrb[44].mxu1 %v6512_v16 }
 0x3a3   :  { %1780 = vmatpush1.bf16.msra.mxu0 %v6508_v10  ;;  %1821 = vmatpush1.bf16.msra.mxu1 %v6510_v14 }
 0x3a4   :  { %1781 = vmatprep.subr.bf16.mxu0 %v6514_v18  ;;  %1822 = vmatprep.subr.bf16.mxu1 %v6516_v20 }
 0x3a5   :  { %1811 = vmatprep.mubr.bf16.mxu0 %v8255_v46  ;;  %1852 = vmatprep.mubr.bf16.mxu1 %v8255_v46 }
 0x3a7   :  { %1782 = vmatpush1.bf16.msra.mxu0 %v6522_v36  ;;  %1823 = vmatpush1.bf16.msra.mxu1 %v6524_v22 }
 0x3a8   :  { %1783 = vmatprep.subr.bf16.mxu0 %v6528_v25  ;;  %1824 = vmatprep.subr.bf16.mxu1 %v6530_v28 }
 0x3ab   :  { %1784 = vmatpush1.bf16.msra.mxu0 %v6536_v30  ;;  %1825 = vmatpush1.bf16.msra.mxu1 %v6538_v50 }
 0x3ac   :  { %1785 = vmatprep.subr.bf16.mxu0 %v6542_v52  ;;  %1826 = vmatprep.subr.bf16.mxu1 %v6544_v56 }
 0x3af   :  { %1786 = vmatpush1.bf16.msra.mxu0 %v6548_v60  ;;  %1827 = vmatpush1.bf16.msra.mxu1 %v6550_v8 }
 0x3b0   :  { %1787 = vmatprep.subr.bf16.mxu0 %v6554_v17  ;;  %1828 = vmatprep.subr.bf16.mxu1 %v6556_v26 }
 0x3b3   :  { %1788 = vmatpush1.bf16.msra.mxu0 %v6560_v33  ;;  %1829 = vmatpush1.bf16.msra.mxu1 %v6562_v35 }
 0x3b4   :  { %1789 = vmatprep.subr.bf16.mxu0 %v6566_v31  ;;  %1830 = vmatprep.subr.bf16.mxu1 %v6568_v39 }
 0x3b7   :  { %1790 = vmatpush1.bf16.msra.mxu0 %v6572_v41  ;;  %1831 = vmatpush1.bf16.msra.mxu1 %v6574_v43 }
 0x3b8   :  { %1791 = vmatprep.subr.bf16.mxu0 %v6578_v45  ;;  %1832 = vmatprep.subr.bf16.mxu1 %v6580_v48 }
 0x3bb   :  { %1792 = vmatpush1.bf16.msra.mxu0 %v6584_v51  ;;  %1833 = vmatpush1.bf16.msra.mxu1 %v6586_v54 }
 0x3bc   :  { %1793 = vmatprep.subr.bf16.mxu0 %v6590_v58  ;;  %1834 = vmatprep.subr.bf16.mxu1 %v6592_v62 }
 0x3bf   :  { %1794 = vmatpush1.bf16.msra.mxu0 %v6596_v11  ;;  %1835 = vmatpush1.bf16.msra.mxu1 %v6598_v15 }
 0x3c0   :  { %1977 = vmatprep.subr.bf16.mxu0 %v6606_v19  ;;  %2018 = vmatprep.subr.bf16.mxu1 %v6608_v23 }
 0x3c2   :  { %1812 = vmatmul.mubr.bf16.vlgmr.msra.gmra.mrb[16].mxu0 %v6512_v16  ;;  %1853 = vmatmul.mubr.bf16.vlgmr.msra.gmra.mrb[48].mxu1 %v6512_v16  ;;  %v6674_v16 = vld [vmem:[#allocation4 + $0xb0] sm:$0xff] }
 0x3c3   :  { %1978 = vmatpush1.bf16.msra.mxu0 %v6612_v21  ;;  %2019 = vmatpush1.bf16.msra.mxu1 %v6614_v13  ;;  %8330 = vst [vmem:[#allocation77_spill] sm:$0xff] %v6674_v16 }
 0x3c4   :  { %1979 = vmatprep.subr.bf16.mxu0 %v6618_v63  ;;  %2020 = vmatprep.subr.bf16.mxu1 %v6620_v29 }
 0x3c7   :  { %1980 = vmatpush1.bf16.msra.mxu0 %v6624_v37  ;;  %2021 = vmatpush1.bf16.msra.mxu1 %v6626_v53 }
 0x3c8   :  { %1981 = vmatprep.subr.bf16.mxu0 %v6630_v55  ;;  %2022 = vmatprep.subr.bf16.mxu1 %v6632_v57 }
 0x3cb   :  { %1982 = vmatpush1.bf16.msra.mxu0 %v6636_v61  ;;  %2023 = vmatpush1.bf16.msra.mxu1 %v6638_v34 }
 0x3cc   :  { %1983 = vmatprep.subr.bf16.mxu0 %v6642_v38  ;;  %2024 = vmatprep.subr.bf16.mxu1 %v6644_v9 }
 0x3cf   :  { %1984 = vmatpush1.bf16.msra.mxu0 %v6648_v40  ;;  %2025 = vmatpush1.bf16.msra.mxu1 %v6650_v42 }
 0x3d0   :  { %1985 = vmatprep.subr.bf16.mxu0 %v6654_v44  ;;  %2026 = vmatprep.subr.bf16.mxu1 %v6656_v0  ;;  %v6774_v0 = vld [vmem:[#allocation4 + $0x1d8] sm:$0xff] }
 0x3d1   :  { %8364 = vst [vmem:[#allocation42_spill] sm:$0xff] %v6774_v0 }
 0x3d3   :  { %1986 = vmatpush1.bf16.msra.mxu0 %v6660_v1  ;;  %2027 = vmatpush1.bf16.msra.mxu1 %v6662_v2  ;;  %v6680_v1 = vld [vmem:[#allocation4 + $0xd8] sm:$0xff]  ;;  %v6684_v2 = vld [vmem:[#allocation4 + $0xc0] sm:$0xff] }
 0x3d4   :  { %1987 = vmatprep.subr.bf16.mxu0 %v6666_v4  ;;  %2028 = vmatprep.subr.bf16.mxu1 %v6668_v5  ;;  %8332 = vst [vmem:[#allocation79_spill] sm:$0xff] %v6680_v1  ;;  %8333 = vst [vmem:[#allocation80_spill] sm:$0xff] %v6684_v2  ;;  %v6686_v4 = vld [vmem:[#allocation4 + $0xd0] sm:$0xff]  ;;  %v6690_v5 = vld [vmem:[#allocation4 + $0xe8] sm:$0xff] }
 0x3d5   :  { %8334 = vst [vmem:[#allocation81_spill] sm:$0xff] %v6686_v4  ;;  %8335 = vst [vmem:[#allocation82_spill] sm:$0xff] %v6690_v5 }
 0x3d7   :  { %1988 = vmatpush1.bf16.msra.mxu0 %v6672_v6  ;;  %2029 = vmatpush1.bf16.msra.mxu1 %v6674_v16  ;;  %v6692_v6 = vld [vmem:[#allocation4 + $0xf8] sm:$0xff]  ;;  %v6696_v16 = vld [vmem:[#allocation4 + $0xe0] sm:$0xff] }
 0x3d8   :  { %1989 = vmatprep.subr.bf16.mxu0 %v6678_v24  ;;  %2030 = vmatprep.subr.bf16.mxu1 %v6680_v1  ;;  %8336 = vst [vmem:[#allocation83_spill] sm:$0xff] %v6692_v6  ;;  %8337 = vst [vmem:[#allocation84_spill] sm:$0xff] %v6696_v16  ;;  %v6698_v24 = vld [vmem:[#allocation4 + $0xf0] sm:$0xff]  ;;  %v6702_v1 = vld [vmem:[#allocation4 + $0x108] sm:$0xff] }
 0x3d9   :  { %8338 = vst [vmem:[#allocation85_spill] sm:$0xff] %v6698_v24  ;;  %8339 = vst [vmem:[#allocation86_spill] sm:$0xff] %v6702_v1 }
 0x3db   :  { %1990 = vmatpush1.bf16.msra.mxu0 %v6684_v2  ;;  %2031 = vmatpush1.bf16.msra.mxu1 %v6686_v4  ;;  %v6704_v2 = vld [vmem:[#allocation4 + $0x118] sm:$0xff]  ;;  %v6708_v4 = vld [vmem:[#allocation4 + $0x100] sm:$0xff] }
 0x3dc   :  { %1991 = vmatprep.subr.bf16.mxu0 %v6690_v5  ;;  %2032 = vmatprep.subr.bf16.mxu1 %v6692_v6  ;;  %8340 = vst [vmem:[#allocation87_spill] sm:$0xff] %v6704_v2  ;;  %8341 = vst [vmem:[#allocation88_spill] sm:$0xff] %v6708_v4  ;;  %v6710_v5 = vld [vmem:[#allocation4 + $0x110] sm:$0xff]  ;;  %v6714_v6 = vld [vmem:[#allocation4 + $0x128] sm:$0xff] }
 0x3dd   :  { %8342 = vst [vmem:[#allocation89_spill] sm:$0xff] %v6710_v5  ;;  %8343 = vst [vmem:[#allocation90_spill] sm:$0xff] %v6714_v6 }
 0x3df   :  { %1992 = vmatpush1.bf16.msra.mxu0 %v6696_v16  ;;  %2033 = vmatpush1.bf16.msra.mxu1 %v6698_v24  ;;  %v6716_v16 = vld [vmem:[#allocation4 + $0x138] sm:$0xff]  ;;  %v6720_v24 = vld [vmem:[#allocation4 + $0x120] sm:$0xff] }
 0x3e0   :  { %1993 = vmatprep.subr.bf16.mxu0 %v6702_v1  ;;  %2034 = vmatprep.subr.bf16.mxu1 %v6704_v2  ;;  %8344 = vst [vmem:[#allocation91_spill] sm:$0xff] %v6716_v16  ;;  %8345 = vst [vmem:[#allocation92_spill] sm:$0xff] %v6720_v24  ;;  %v6722_v1 = vld [vmem:[#allocation4 + $0x130] sm:$0xff]  ;;  %v6726_v2 = vld [vmem:[#allocation4 + $0x148] sm:$0xff] }
 0x3e1   :  { %8346 = vst [vmem:[#allocation93_spill] sm:$0xff] %v6722_v1  ;;  %8347 = vst [vmem:[#allocation94_spill] sm:$0xff] %v6726_v2 }
 0x3e3   :  { %1994 = vmatpush1.bf16.msra.mxu0 %v6708_v4  ;;  %2035 = vmatpush1.bf16.msra.mxu1 %v6710_v5  ;;  %v6728_v4 = vld [vmem:[#allocation4 + $0x158] sm:$0xff]  ;;  %v6732_v5 = vld [vmem:[#allocation4 + $0x140] sm:$0xff] }
 0x3e4   :  { %1995 = vmatprep.subr.bf16.mxu0 %v6714_v6  ;;  %2036 = vmatprep.subr.bf16.mxu1 %v6716_v16  ;;  %8348 = vst [vmem:[#allocation95_spill] sm:$0xff] %v6728_v4  ;;  %8349 = vst [vmem:[#allocation96_spill] sm:$0xff] %v6732_v5  ;;  %v6734_v6 = vld [vmem:[#allocation4 + $0x150] sm:$0xff]  ;;  %v6738_v16 = vld [vmem:[#allocation4 + $0x168] sm:$0xff] }
 0x3e5   :  { %8350 = vst [vmem:[#allocation97_spill] sm:$0xff] %v6734_v6  ;;  %8351 = vst [vmem:[#allocation98_spill] sm:$0xff] %v6738_v16 }
 0x3e7   :  { %1996 = vmatpush1.bf16.msra.mxu0 %v6720_v24  ;;  %2037 = vmatpush1.bf16.msra.mxu1 %v6722_v1  ;;  %v6740_v24 = vld [vmem:[#allocation4 + $0x178] sm:$0xff]  ;;  %v6744_v1 = vld [vmem:[#allocation4 + $0x160] sm:$0xff] }
 0x3e8   :  { %1997 = vmatprep.subr.bf16.mxu0 %v6726_v2  ;;  %2038 = vmatprep.subr.bf16.mxu1 %v6728_v4  ;;  %8352 = vst [vmem:[#allocation99_spill] sm:$0xff] %v6740_v24  ;;  %8353 = vst [vmem:[#allocation100_spill] sm:$0xff] %v6744_v1  ;;  %v6746_v2 = vld [vmem:[#allocation4 + $0x170] sm:$0xff]  ;;  %v6750_v4 = vld [vmem:[#allocation4 + $0x188] sm:$0xff] }
 0x3e9   :  { %8354 = vst [vmem:[#allocation101_spill] sm:$0xff] %v6746_v2  ;;  %8355 = vst [vmem:[#allocation102_spill] sm:$0xff] %v6750_v4 }
 0x3eb   :  { %1998 = vmatpush1.bf16.msra.mxu0 %v6732_v5  ;;  %2039 = vmatpush1.bf16.msra.mxu1 %v6734_v6  ;;  %v6752_v5 = vld [vmem:[#allocation4 + $0x198] sm:$0xff]  ;;  %v6756_v6 = vld [vmem:[#allocation4 + $0x180] sm:$0xff] }
 0x3ec   :  { %1999 = vmatprep.subr.bf16.mxu0 %v6738_v16  ;;  %2040 = vmatprep.subr.bf16.mxu1 %v6740_v24  ;;  %8356 = vst [vmem:[#allocation103_spill] sm:$0xff] %v6752_v5  ;;  %8357 = vst [vmem:[#allocation104_spill] sm:$0xff] %v6756_v6  ;;  %v6758_v16 = vld [vmem:[#allocation4 + $0x190] sm:$0xff]  ;;  %v6762_v24 = vld [vmem:[#allocation4 + $0x1a8] sm:$0xff] }
 0x3ed   :  { %8358 = vst [vmem:[#allocation105_spill] sm:$0xff] %v6758_v16  ;;  %8359 = vst [vmem:[#allocation106_spill] sm:$0xff] %v6762_v24 }
 0x3ef   :  { %2000 = vmatpush1.bf16.msra.mxu0 %v6744_v1  ;;  %2041 = vmatpush1.bf16.msra.mxu1 %v6746_v2  ;;  %v6764_v1 = vld [vmem:[#allocation4 + $0x1b8] sm:$0xff]  ;;  %v6766_v2 = vld [vmem:[#allocation4 + $0x1a0] sm:$0xff] }
 0x3f0   :  { %2001 = vmatprep.subr.bf16.mxu0 %v6750_v4  ;;  %2042 = vmatprep.subr.bf16.mxu1 %v6752_v5  ;;  %8360 = vst [vmem:[#allocation107_spill] sm:$0xff] %v6764_v1  ;;  %8361 = vst [vmem:[#allocation108_spill] sm:$0xff] %v6766_v2  ;;  %v6770_v4 = vld [vmem:[#allocation4 + $0x1b0] sm:$0xff]  ;;  %v6772_v5 = vld [vmem:[#allocation4 + $0x1c8] sm:$0xff] }
 0x3f1   :  { %8362 = vst [vmem:[#allocation109_spill] sm:$0xff] %v6770_v4  ;;  %8363 = vst [vmem:[#allocation110_spill] sm:$0xff] %v6772_v5 }
 0x3f3   :  { %2002 = vmatpush1.bf16.msra.mxu0 %v6756_v6  ;;  %2043 = vmatpush1.bf16.msra.mxu1 %v6758_v16  ;;  %v6780_v16 = vld [vmem:[#allocation4 + $0x1c0] sm:$0xff]  ;;  %v6782_v6 = vld [vmem:[#allocation4 + $0x1d0] sm:$0xff] }
 0x3f4   :  { %2003 = vmatprep.subr.bf16.mxu0 %v6762_v24  ;;  %2044 = vmatprep.subr.bf16.mxu1 %v6764_v1  ;;  %8365 = vst [vmem:[#allocation44_spill] sm:$0xff] %v6780_v16  ;;  %8366 = vst [vmem:[#allocation31_spill] sm:$0xff] %v6782_v6  ;;  %v6784_v24 = vld [vmem:[#allocation4 + $0x1e8] sm:$0xff]  ;;  %v6786_v1 = vld [vmem:[#allocation4 + $0x1f8] sm:$0xff] }
 0x3f5   :  { %8367 = vst [vmem:[#allocation32_spill] sm:$0xff] %v6784_v24  ;;  %8368 = vst [vmem:[#allocation47_spill] sm:$0xff] %v6786_v1 }
 0x3f7   :  { %2004 = vmatpush1.bf16.msra.mxu0 %v6766_v2  ;;  %2045 = vmatpush1.bf16.msra.mxu1 %v6770_v4  ;;  %v6792_v4 = vld [vmem:[#allocation4 + $0x1e0] sm:$0xff] }
 0x3f8   :  { %2005 = vmatprep.subr.bf16.mxu0 %v6772_v5  ;;  %2046 = vmatprep.subr.bf16.mxu1 %v6774_v0  ;;  %8369 = vst [vmem:[#allocation48_spill] sm:$0xff] %v6792_v4  ;;  %v6794_v5 = vld [vmem:[#allocation4 + $0x1f0] sm:$0xff] }
 0x3f9   :  { %8370 = vst [vmem:[#allocation111_spill] sm:$0xff] %v6794_v5 }
 0x3fb   :  { %2006 = vmatpush1.bf16.msra.mxu0 %v6780_v16  ;;  %2047 = vmatpush1.bf16.msra.mxu1 %v6782_v6  ;;  %v1452_v6 = vld [vmem:[%s7911_s6] sm:$0xf] }
 0x3fc   :  { %2007 = vmatprep.subr.bf16.mxu0 %v6784_v24  ;;  %2048 = vmatprep.subr.bf16.mxu1 %v6786_v1  ;;  %v1457_v24 = vrot.slane %v1452_v6, %v8306_v59  ;;  %v1461_v1 = vrot.slane %v1452_v6, %v8307_v27  ;;  %v1465_v34 = vrot.slane %v1452_v6, %v8308_v7 }
 0x3fd   :  { %v1469_v59 = vrot.slane %v1452_v6, %v8309_v12 }
 0x3ff   :  { %2008 = vmatpush1.bf16.msra.mxu0 %v6792_v4  ;;  %2049 = vmatpush1.bf16.msra.mxu1 %v6794_v5 }
 0x400   :  { %2282 = vmatprep.subr.bf16.mxu0 %v6477_v49  ;;  %2323 = vmatprep.subr.bf16.mxu1 %v6479_v47 }
 0x475   :  { %v1508_v16 = vpop.f32.mrb[12].mxu0  ;;  %v1549_v0 = vpop.f32.mrb[44].mxu1 }
 0x476   :  { %v1509_v2 = vadd.f32 %v1508_v16, %v1457_v24  ;;  %v1510_v44 = vpop.f32.mrb[13].mxu0  ;;  %v1551_v42 = vpop.f32.mrb[45].mxu1  ;;  %v1550_v61 = vadd.f32 %v1549_v0, %v1465_v34 }
 0x477   :  { %v1511_v4 = vadd.f32 %v1510_v44, %v1461_v1  ;;  %v1512_v40 = vpop.f32.mrb[14].mxu0  ;;  %v1553_v5 = vpop.f32.mrb[46].mxu1  ;;  %v1552_v27 = vadd.f32 %v1551_v42, %v1469_v59 }
 0x478   :  { %v4881_v9 = vmul.f32 -1.442695, %v1509_v2  ;;  %v1513_v49 = vpop.f32.mrb[15].mxu0  ;;  %v1554_v38 = vpop.f32.mrb[47].mxu1  ;;  %v4883_v57 = vmul.f32 -1.442695, %v1550_v61 }
 0x479   :  { %v4882_v47 = vmul.f32 -1.442695, %v1511_v4  ;;  %v8371_v61 = vld [vmem:[#allocation33_spill] sm:$0xff] }
 0x47a   :  { %5458 = vpow2.f32 %v4881_v9 }
 0x47b   :  { %5460 = vpow2.f32 %v4882_v47 }
 0x47c   :  { %5462 = vtanh.f32 %v1552_v27 }
 0x47d   :  { %5464 = vpow2.f32 %v4883_v57  ;;  %v8372_v57 = vld [vmem:[#allocation34_spill] sm:$0xff] }
 0x484   :  { %v5459_v55 = vpop.eup %5458 }
 0x485   :  { %v1565_v24 = vadd.f32 1.0, %v5459_v55  ;;  %v5461_v16 = vpop.eup %5460 }
 0x486   :  { %v1566_v40 = vadd.f32 1.0, %v5461_v16  ;;  %v5463_v44 = vpop.eup %5462 }
 0x487   :  { %5466 = vrcp.f32 %v1565_v24  ;;  %v5465_v38 = vpop.eup %5464 }
 0x488   :  { %5468 = vrcp.f32 %v1566_v40  ;;  %v1567_v4 = vadd.f32 1.0, %v5465_v38 }
 0x48a   :  { %5470 = vrcp.f32 %v1567_v4 }
 0x491   :  { %v5467_v1 = vpop.eup %5466 }
 0x492   :  { %v1576_v9 = vmul.f32 %v5467_v1, %v5463_v44  ;;  %v5469_v2 = vpop.eup %5468 }
 0x493   :  { %v1575_v5 = vmul.f32 %v5469_v2, %v6493_v32  ;;  %v8373_v32 = vld [vmem:[#allocation49_spill] sm:$0xff] }
 0x494   :  { %v5471_v1 = vpop.eup %5470 }
 0x495   :  { %v1813_v6 = vpop.f32.mrb[16].mxu0  ;;  %v1854_v34 = vpop.f32.mrb[48].mxu1  ;;  %v6808_v59 = vadd.f32 %v1576_v9, %v1575_v5  ;;  %v8374_v9 = vld [vmem:[#allocation50_spill] sm:$0xff] }
 0x496   :  { %v1861_v55 = vadd.f32 %v1813_v6, %v8371_v61  ;;  %v1815_v27 = vpop.f32.mrb[17].mxu0  ;;  %v1856_v42 = vpop.f32.mrb[49].mxu1  ;;  %v1863_v38 = vadd.f32 %v1854_v34, %v8373_v32 }
 0x497   :  { %v1862_v0 = vadd.f32 %v1815_v27, %v8372_v57  ;;  %v1817_v49 = vpop.f32.mrb[18].mxu0  ;;  %v1858_v47 = vpop.f32.mrb[50].mxu1  ;;  %5472 = vtanh.f32 %v6808_v59  ;;  %v1864_v2 = vadd.f32 %v1856_v42, %v8374_v9 }
 0x498   :  { %v4916_v24 = vmul.f32 -1.442695, %v1861_v55  ;;  %v1818_v16 = vpop.f32.mrb[19].mxu0  ;;  %v1859_v40 = vpop.f32.mrb[51].mxu1  ;;  %v4918_v6 = vmul.f32 -1.442695, %v1863_v38 }
 0x499   :  { %v4917_v44 = vmul.f32 -1.442695, %v1862_v0 }
 0x49a   :  { %5474 = vpow2.f32 %v4916_v24 }
 0x49b   :  { %5476 = vpow2.f32 %v4917_v44 }
 0x49c   :  { %5478 = vtanh.f32 %v1864_v2  ;;  %v8415_v2 = vld [vmem:[#allocation101_spill] sm:$0xff] }
 0x49d   :  { %5480 = vpow2.f32 %v4918_v6  ;;  %v8417_v6 = vld [vmem:[#allocation103_spill] sm:$0xff] }
 0x4a1   :  { %v5473_v5 = vpop.eup %5472 }
 0x4a2   :  { %v6815_v4 = vmul.f32 %v5473_v5, %v5471_v1  ;;  %v8416_v5 = vld [vmem:[#allocation102_spill] sm:$0xff] }
 0x4a4   :  { %8375 = vst [vmem:[#allocation33_spill] sm:$0xff] %v6815_v4  ;;  %v5475_v61 = vpop.eup %5474  ;;  %v1890_v55 = vpack.c.bf16 %v6815_v4, %v6815_v4  ;;  %v7118_v4 = vld [vmem:[#allocation4 + $0xc8] sm:$0xff] }
 0x4a5   :  { %v1874_v27 = vadd.f32 1.0, %v5475_v61  ;;  %v5477_v57 = vpop.eup %5476  ;;  %v8418_v61 = vld [vmem:[#allocation104_spill] sm:$0xff] }
 0x4a6   :  { %v1875_v0 = vadd.f32 1.0, %v5477_v57  ;;  %2009 = vmatprep.mubr.bf16.mxu0 %v1890_v55  ;;  %2050 = vmatprep.mubr.bf16.mxu1 %v1890_v55  ;;  %v5479_v34 = vpop.eup %5478  ;;  %v8420_v55 = vld [vmem:[#allocation106_spill] sm:$0xff]  ;;  %v8421_v57 = vld [vmem:[#allocation107_spill] sm:$0xff] }
 0x4a7   :  { %5482 = vrcp.f32 %v1874_v27  ;;  %v5481_v49 = vpop.eup %5480  ;;  %v8419_v27 = vld [vmem:[#allocation105_spill] sm:$0xff] }
 0x4a8   :  { %5484 = vrcp.f32 %v1875_v0  ;;  %v1876_v16 = vadd.f32 1.0, %v5481_v49  ;;  %v8422_v0 = vld [vmem:[#allocation108_spill] sm:$0xff]  ;;  %v8424_v49 = vld [vmem:[#allocation110_spill] sm:$0xff] }
 0x4aa   :  { %5486 = vrcp.f32 %v1876_v16  ;;  %v8428_v16 = vld [vmem:[#allocation32_spill] sm:$0xff] }
 0x4b1   :  { %v5483_v42 = vpop.eup %5482 }
 0x4b2   :  { %v1885_v47 = vmul.f32 %v5483_v42, %v5479_v34  ;;  %v5485_v24 = vpop.eup %5484  ;;  %v8423_v34 = vld [vmem:[#allocation109_spill] sm:$0xff]  ;;  %v8425_v42 = vld [vmem:[#allocation42_spill] sm:$0xff] }
 0x4b3   :  { %v1884_v40 = vmul.f32 %v5485_v24, %v6505_v3  ;;  %v8376_v3 = vld [vmem:[#allocation62_spill] sm:$0xff]  ;;  %v8427_v24 = vld [vmem:[#allocation31_spill] sm:$0xff] }
 0x4b4   :  { %v5487_v32 = vpop.eup %5486 }
 0x4b5   :  { %v6820_v44 = vadd.f32 %v1885_v47, %v1884_v40  ;;  %v8426_v47 = vld [vmem:[#allocation44_spill] sm:$0xff]  ;;  %v8429_v40 = vld [vmem:[#allocation47_spill] sm:$0xff] }
 0x4b7   :  { %5488 = vtanh.f32 %v6820_v44 }
 0x4c1   :  { %v5489_v38 = vpop.eup %5488 }
 0x4c2   :  { %v1888_v1 = vmul.f32 %v5489_v38, %v5487_v32  ;;  %v8430_v32 = vld [vmem:[#allocation48_spill] sm:$0xff]  ;;  %v8431_v38 = vld [vmem:[#allocation111_spill] sm:$0xff] }
 0x4c4   :  { %v1889_v9 = vpack.c.bf16 %v1888_v1, %v1888_v1  ;;  %v6919_v1 = vld [vmem:[#allocation7 + $0x4] ss:$16 sps:$4 sm:$0xff]  }
 0x4c6   :  { %2010 = vmatmul.mubr.bf16.vlgmr.msra.gmra.mrb[20].mxu0 %v1889_v9  ;;  %2051 = vmatmul.mubr.bf16.vlgmr.msra.gmra.mrb[52].mxu1 %v1889_v9 }
 0x4c7   :  { %2283 = vmatpush1.bf16.msra.mxu0 %v6508_v10  ;;  %2324 = vmatpush1.bf16.msra.mxu1 %v6510_v14  ;;  %v8377_v10 = vld [vmem:[#allocation63_spill] sm:$0xff]  ;;  %v8378_v14 = vld [vmem:[#allocation64_spill] sm:$0xff] }
 0x4c8   :  { %2284 = vmatprep.subr.bf16.mxu0 %v6514_v18  ;;  %2325 = vmatprep.subr.bf16.mxu1 %v6516_v20  ;;  %v8379_v18 = vld [vmem:[#allocation65_spill] sm:$0xff]  ;;  %v8380_v20 = vld [vmem:[#allocation66_spill] sm:$0xff] }
 0x4c9   :  { %2314 = vmatprep.mubr.bf16.mxu0 %v8255_v46  ;;  %2355 = vmatprep.mubr.bf16.mxu1 %v8255_v46 }
 0x4cb   :  { %2285 = vmatpush1.bf16.msra.mxu0 %v6522_v36  ;;  %2326 = vmatpush1.bf16.msra.mxu1 %v6524_v22  ;;  %v8381_v36 = vld [vmem:[#allocation67_spill] sm:$0xff]  ;;  %v8382_v22 = vld [vmem:[#allocation68_spill] sm:$0xff] }
 0x4cc   :  { %2286 = vmatprep.subr.bf16.mxu0 %v6528_v25  ;;  %2327 = vmatprep.subr.bf16.mxu1 %v6530_v28  ;;  %v8383_v25 = vld [vmem:[#allocation69_spill] sm:$0xff]  ;;  %v8384_v28 = vld [vmem:[#allocation70_spill] sm:$0xff] }
 0x4cf   :  { %2287 = vmatpush1.bf16.msra.mxu0 %v6536_v30  ;;  %2328 = vmatpush1.bf16.msra.mxu1 %v6538_v50  ;;  %v8385_v30 = vld [vmem:[#allocation71_spill] sm:$0xff]  ;;  %v8386_v50 = vld [vmem:[#allocation72_spill] sm:$0xff] }
 0x4d0   :  { %2288 = vmatprep.subr.bf16.mxu0 %v6542_v52  ;;  %2329 = vmatprep.subr.bf16.mxu1 %v6544_v56  ;;  %v8387_v52 = vld [vmem:[#allocation73_spill] sm:$0xff]  ;;  %v8388_v56 = vld [vmem:[#allocation74_spill] sm:$0xff] }
 0x4d3   :  { %2289 = vmatpush1.bf16.msra.mxu0 %v6548_v60  ;;  %2330 = vmatpush1.bf16.msra.mxu1 %v6550_v8  ;;  %v8389_v60 = vld [vmem:[#allocation75_spill] sm:$0xff]  ;;  %v8390_v8 = vld [vmem:[#allocation76_spill] sm:$0xff] }
 0x4d4   :  { %2290 = vmatprep.subr.bf16.mxu0 %v6554_v17  ;;  %2331 = vmatprep.subr.bf16.mxu1 %v6556_v26  ;;  %v8391_v17 = vld [vmem:[#allocation77_spill] sm:$0xff]  ;;  %v8392_v26 = vld [vmem:[#allocation78_spill] sm:$0xff]  ;;  %8455 = vst [vmem:[#allocation76_spill] sm:$0xff] %v7118_v4 }
 0x4d7   :  { %2291 = vmatpush1.bf16.msra.mxu0 %v6560_v33  ;;  %2332 = vmatpush1.bf16.msra.mxu1 %v6562_v35  ;;  %v8393_v33 = vld [vmem:[#allocation79_spill] sm:$0xff]  ;;  %v8394_v35 = vld [vmem:[#allocation80_spill] sm:$0xff] }
 0x4d8   :  { %2292 = vmatprep.subr.bf16.mxu0 %v6566_v31  ;;  %2333 = vmatprep.subr.bf16.mxu1 %v6568_v39  ;;  %v8395_v31 = vld [vmem:[#allocation81_spill] sm:$0xff]  ;;  %v8396_v39 = vld [vmem:[#allocation82_spill] sm:$0xff] }
 0x4db   :  { %2293 = vmatpush1.bf16.msra.mxu0 %v6572_v41  ;;  %2334 = vmatpush1.bf16.msra.mxu1 %v6574_v43  ;;  %v8397_v41 = vld [vmem:[#allocation83_spill] sm:$0xff]  ;;  %v8398_v43 = vld [vmem:[#allocation84_spill] sm:$0xff] }
 0x4dc   :  { %2294 = vmatprep.subr.bf16.mxu0 %v6578_v45  ;;  %2335 = vmatprep.subr.bf16.mxu1 %v6580_v48  ;;  %v8399_v45 = vld [vmem:[#allocation85_spill] sm:$0xff]  ;;  %v8400_v48 = vld [vmem:[#allocation86_spill] sm:$0xff] }
 0x4df   :  { %2295 = vmatpush1.bf16.msra.mxu0 %v6584_v51  ;;  %2336 = vmatpush1.bf16.msra.mxu1 %v6586_v54  ;;  %v8401_v51 = vld [vmem:[#allocation87_spill] sm:$0xff]  ;;  %v8402_v54 = vld [vmem:[#allocation88_spill] sm:$0xff] }
 0x4e0   :  { %2296 = vmatprep.subr.bf16.mxu0 %v6590_v58  ;;  %2337 = vmatprep.subr.bf16.mxu1 %v6592_v62  ;;  %v8403_v58 = vld [vmem:[#allocation89_spill] sm:$0xff]  ;;  %v8404_v62 = vld [vmem:[#allocation90_spill] sm:$0xff] }
 0x4e3   :  { %2297 = vmatpush1.bf16.msra.mxu0 %v6596_v11  ;;  %2338 = vmatpush1.bf16.msra.mxu1 %v6598_v15  ;;  %v8405_v11 = vld [vmem:[#allocation91_spill] sm:$0xff]  ;;  %v8406_v15 = vld [vmem:[#allocation92_spill] sm:$0xff] }
 0x4e4   :  { %2480 = vmatprep.subr.bf16.mxu0 %v6606_v19  ;;  %2521 = vmatprep.subr.bf16.mxu1 %v6608_v23  ;;  %v8407_v19 = vld [vmem:[#allocation93_spill] sm:$0xff]  ;;  %v8408_v23 = vld [vmem:[#allocation94_spill] sm:$0xff] }
 0x4e6   :  { %2315 = vmatmul.mubr.bf16.vlgmr.msra.gmra.mrb[24].mxu0 %v1889_v9  ;;  %2356 = vmatmul.mubr.bf16.vlgmr.msra.gmra.mrb[56].mxu1 %v1889_v9  ;;  %v6921_v9 = vld [vmem:[#allocation7 + $0xc] ss:$16 sps:$4 sm:$0xff]  }
 0x4e7   :  { %2481 = vmatpush1.bf16.msra.mxu0 %v6612_v21  ;;  %2522 = vmatpush1.bf16.msra.mxu1 %v6614_v13  ;;  %v8409_v21 = vld [vmem:[#allocation95_spill] sm:$0xff]  ;;  %v8410_v13 = vld [vmem:[#allocation96_spill] sm:$0xff] }
 0x4e8   :  { %2482 = vmatprep.subr.bf16.mxu0 %v6618_v63  ;;  %2523 = vmatprep.subr.bf16.mxu1 %v6620_v29  ;;  %v8411_v63 = vld [vmem:[#allocation97_spill] sm:$0xff]  ;;  %v8412_v29 = vld [vmem:[#allocation98_spill] sm:$0xff] }
 0x4eb   :  { %2483 = vmatpush1.bf16.msra.mxu0 %v6624_v37  ;;  %2524 = vmatpush1.bf16.msra.mxu1 %v6626_v53  ;;  %v8413_v37 = vld [vmem:[#allocation99_spill] sm:$0xff]  ;;  %v8414_v53 = vld [vmem:[#allocation100_spill] sm:$0xff] }
 0x4ec   :  { %2484 = vmatprep.subr.bf16.mxu0 %v8376_v3  ;;  %2525 = vmatprep.subr.bf16.mxu1 %v8377_v10  ;;  %v1955_v3 = vld [vmem:[%s7911_s6] sm:$0xf] }
 0x4ed   :  { %v8432_v10 = vld [vmem:[#allocation29_spill] sm:$0xff] }
 0x4ef   :  { %2485 = vmatpush1.bf16.msra.mxu0 %v8378_v14  ;;  %2526 = vmatpush1.bf16.msra.mxu1 %v8379_v18  ;;  %v1960_v14 = vrot.slane %v1955_v3, %v8432_v10  ;;  %v8433_v18 = vld [vmem:[#allocation30_spill] sm:$0xff] }
 0x4f0   :  { %2486 = vmatprep.subr.bf16.mxu0 %v8380_v20  ;;  %2527 = vmatprep.subr.bf16.mxu1 %v8381_v36  ;;  %v1964_v20 = vrot.slane %v1955_v3, %v8433_v18 }
 0x4f3   :  { %2487 = vmatpush1.bf16.msra.mxu0 %v8382_v22  ;;  %2528 = vmatpush1.bf16.msra.mxu1 %v8383_v25 }
 0x4f4   :  { %2488 = vmatprep.subr.bf16.mxu0 %v8384_v28  ;;  %2529 = vmatprep.subr.bf16.mxu1 %v8385_v30 }
 0x4f7   :  { %2489 = vmatpush1.bf16.msra.mxu0 %v8386_v50  ;;  %2530 = vmatpush1.bf16.msra.mxu1 %v8387_v52 }
 0x4f8   :  { %2490 = vmatprep.subr.bf16.mxu0 %v8388_v56  ;;  %2531 = vmatprep.subr.bf16.mxu1 %v8389_v60 }
 0x4fb   :  { %2491 = vmatpush1.bf16.msra.mxu0 %v8390_v8  ;;  %2532 = vmatpush1.bf16.msra.mxu1 %v8391_v17 }
 0x4fc   :  { %2492 = vmatprep.subr.bf16.mxu0 %v8392_v26  ;;  %2533 = vmatprep.subr.bf16.mxu1 %v8393_v33  ;;  %v1968_v33 = vrot.slane %v1955_v3, %v8308_v7 }
 0x4ff   :  { %2493 = vmatpush1.bf16.msra.mxu0 %v8394_v35  ;;  %2534 = vmatpush1.bf16.msra.mxu1 %v8395_v31  ;;  %v1972_v35 = vrot.slane %v1955_v3, %v8309_v12 }
 0x500   :  { %2494 = vmatprep.subr.bf16.mxu0 %v8396_v39  ;;  %2535 = vmatprep.subr.bf16.mxu1 %v8397_v41 }
 0x503   :  { %2495 = vmatpush1.bf16.msra.mxu0 %v8398_v43  ;;  %2536 = vmatpush1.bf16.msra.mxu1 %v8399_v45 }
 0x504   :  { %2496 = vmatprep.subr.bf16.mxu0 %v8400_v48  ;;  %2537 = vmatprep.subr.bf16.mxu1 %v8401_v51 }
 0x507   :  { %2497 = vmatpush1.bf16.msra.mxu0 %v8402_v54  ;;  %2538 = vmatpush1.bf16.msra.mxu1 %v8403_v58 }
 0x508   :  { %2498 = vmatprep.subr.bf16.mxu0 %v8404_v62  ;;  %2539 = vmatprep.subr.bf16.mxu1 %v8405_v11 }
 0x50b   :  { %2499 = vmatpush1.bf16.msra.mxu0 %v8406_v15  ;;  %2540 = vmatpush1.bf16.msra.mxu1 %v8407_v19 }
 0x50c   :  { %2500 = vmatprep.subr.bf16.mxu0 %v8408_v23  ;;  %2541 = vmatprep.subr.bf16.mxu1 %v8409_v21 }
 0x50f   :  { %2501 = vmatpush1.bf16.msra.mxu0 %v8410_v13  ;;  %2542 = vmatpush1.bf16.msra.mxu1 %v8411_v63 }
 0x510   :  { %2502 = vmatprep.subr.bf16.mxu0 %v8412_v29  ;;  %2543 = vmatprep.subr.bf16.mxu1 %v8413_v37  ;;  %v8434_v29 = vld [vmem:[#allocation35_spill] sm:$0xff] }
 0x513   :  { %2503 = vmatpush1.bf16.msra.mxu0 %v8414_v53  ;;  %2544 = vmatpush1.bf16.msra.mxu1 %v8415_v2 }
 0x514   :  { %2504 = vmatprep.subr.bf16.mxu0 %v8416_v5  ;;  %2545 = vmatprep.subr.bf16.mxu1 %v8417_v6  ;;  %v8435_v5 = vld [vmem:[#allocation36_spill] sm:$0xff] }
 0x517   :  { %2505 = vmatpush1.bf16.msra.mxu0 %v8418_v61  ;;  %2546 = vmatpush1.bf16.msra.mxu1 %v8419_v27 }
 0x518   :  { %2506 = vmatprep.subr.bf16.mxu0 %v8420_v55  ;;  %2547 = vmatprep.subr.bf16.mxu1 %v8421_v57 }
 0x51b   :  { %2507 = vmatpush1.bf16.msra.mxu0 %v8422_v0  ;;  %2548 = vmatpush1.bf16.msra.mxu1 %v8423_v34 }
 0x51c   :  { %2508 = vmatprep.subr.bf16.mxu0 %v8424_v49  ;;  %2549 = vmatprep.subr.bf16.mxu1 %v8425_v42 }
 0x51f   :  { %2509 = vmatpush1.bf16.msra.mxu0 %v8426_v47  ;;  %2550 = vmatpush1.bf16.msra.mxu1 %v8427_v24  ;;  %v8437_v47 = vld [vmem:[#allocation52_spill] sm:$0xff] }
 0x520   :  { %2510 = vmatprep.subr.bf16.mxu0 %v8428_v16  ;;  %2551 = vmatprep.subr.bf16.mxu1 %v8429_v40 }
 0x523   :  { %2511 = vmatpush1.bf16.msra.mxu0 %v8430_v32  ;;  %2552 = vmatpush1.bf16.msra.mxu1 %v8431_v38 }
 0x524   :  { %2785 = vmatprep.subr.bf16.mxu0 %v6919_v1  ;;  %2826 = vmatprep.subr.bf16.mxu1 %v6921_v9 }
 0x599   :  { %v2011_v36 = vpop.f32.mrb[20].mxu0  ;;  %v2052_v22 = vpop.f32.mrb[52].mxu1 }
 0x59a   :  { %v2012_v25 = vadd.f32 %v2011_v36, %v1960_v14  ;;  %v2013_v28 = vpop.f32.mrb[21].mxu0  ;;  %v2054_v30 = vpop.f32.mrb[53].mxu1  ;;  %v2053_v31 = vadd.f32 %v2052_v22, %v1968_v33  ;;  %v6948_v33 = vld [vmem:[#allocation7] ss:$16 sps:$4 sm:$0xff]  }
 0x59b   :  { %v2014_v50 = vadd.f32 %v2013_v28, %v1964_v20  ;;  %v2015_v52 = vpop.f32.mrb[22].mxu0  ;;  %v2056_v56 = vpop.f32.mrb[54].mxu1  ;;  %v2055_v39 = vadd.f32 %v2054_v30, %v1972_v35  ;;  %v6950_v35 = vld [vmem:[#allocation7 + $0x8] ss:$16 sps:$4 sm:$0xff]  }
 0x59c   :  { %v4919_v60 = vmul.f32 -1.442695, %v2012_v25  ;;  %v2016_v8 = vpop.f32.mrb[23].mxu0  ;;  %v2057_v17 = vpop.f32.mrb[55].mxu1  ;;  %v4921_v41 = vmul.f32 -1.442695, %v2053_v31 }
 0x59d   :  { %v4920_v26 = vmul.f32 -1.442695, %v2014_v50 }
 0x59e   :  { %5490 = vpow2.f32 %v4919_v60 }
 0x59f   :  { %5492 = vpow2.f32 %v4920_v26 }
 0x5a0   :  { %5494 = vtanh.f32 %v2055_v39  ;;  %v6954_v39 = vld [vmem:[#allocation7 + $0x24] ss:$16 sps:$4 sm:$0xff]  }
 0x5a1   :  { %5496 = vpow2.f32 %v4921_v41  ;;  %v6956_v41 = vld [vmem:[#allocation7 + $0x2c] ss:$16 sps:$4 sm:$0xff]  }
 0x5a8   :  { %v5491_v43 = vpop.eup %5490 }
 0x5a9   :  { %v2068_v45 = vadd.f32 1.0, %v5491_v43  ;;  %v5493_v48 = vpop.eup %5492  ;;  %v6964_v43 = vld [vmem:[#allocation7 + $0x28] ss:$16 sps:$4 sm:$0xff]  }
 0x5aa   :  { %v2069_v51 = vadd.f32 1.0, %v5493_v48  ;;  %v5495_v54 = vpop.eup %5494  ;;  %v6970_v48 = vld [vmem:[#allocation7 + $0x4c] ss:$16 sps:$4 sm:$0xff]  }
 0x5ab   :  { %5498 = vrcp.f32 %v2068_v45  ;;  %v5497_v58 = vpop.eup %5496  ;;  %v6968_v45 = vld [vmem:[#allocation7 + $0x44] ss:$16 sps:$4 sm:$0xff]  }
 0x5ac   :  { %5500 = vrcp.f32 %v2069_v51  ;;  %v2070_v19 = vadd.f32 1.0, %v5497_v58  ;;  %v6976_v51 = vld [vmem:[#allocation7 + $0x40] ss:$16 sps:$4 sm:$0xff]   ;;  %v6982_v58 = vld [vmem:[#allocation7 + $0x64] ss:$16 sps:$4 sm:$0xff]  }
 0x5ae   :  { %5502 = vrcp.f32 %v2070_v19  ;;  %v6994_v19 = vld [vmem:[#allocation7 + $0x84] ss:$16 sps:$4 sm:$0xff]  }
 0x5b5   :  { %v5499_v62 = vpop.eup %5498 }
 0x5b6   :  { %v2079_v11 = vmul.f32 %v5499_v62, %v5495_v54  ;;  %v5501_v15 = vpop.eup %5500  ;;  %v6978_v54 = vld [vmem:[#allocation7 + $0x48] ss:$16 sps:$4 sm:$0xff]   ;;  %v6984_v62 = vld [vmem:[#allocation7 + $0x6c] ss:$16 sps:$4 sm:$0xff]  }
 0x5b7   :  { %v2078_v23 = vmul.f32 %v5501_v15, %v6808_v59  ;;  %v8436_v59 = vld [vmem:[#allocation51_spill] sm:$0xff]  ;;  %v6990_v15 = vld [vmem:[#allocation7 + $0x68] ss:$16 sps:$4 sm:$0xff]  }
 0x5b8   :  { %v5503_v42 = vpop.eup %5502 }
 0x5b9   :  { %v2316_v21 = vpop.f32.mrb[24].mxu0  ;;  %v2357_v13 = vpop.f32.mrb[56].mxu1  ;;  %v6933_v63 = vadd.f32 %v2079_v11, %v2078_v23  ;;  %v6988_v11 = vld [vmem:[#allocation7 + $0x60] ss:$16 sps:$4 sm:$0xff]   ;;  %v6996_v23 = vld [vmem:[#allocation7 + $0x8c] ss:$16 sps:$4 sm:$0xff]  }
 0x5ba   :  { %v2364_v37 = vadd.f32 %v2316_v21, %v8434_v29  ;;  %v2318_v53 = vpop.f32.mrb[25].mxu0  ;;  %v2359_v2 = vpop.f32.mrb[57].mxu1  ;;  %v2366_v49 = vadd.f32 %v2357_v13, %v8436_v59  ;;  %v7000_v21 = vld [vmem:[#allocation7 + $0x80] ss:$16 sps:$4 sm:$0xff]   ;;  %v7002_v13 = vld [vmem:[#allocation7 + $0x88] ss:$16 sps:$4 sm:$0xff]  }
 0x5bb   :  { %v2365_v6 = vadd.f32 %v2318_v53, %v8435_v5  ;;  %v2320_v61 = vpop.f32.mrb[26].mxu0  ;;  %v2361_v27 = vpop.f32.mrb[58].mxu1  ;;  %5504 = vtanh.f32 %v6933_v63  ;;  %v2367_v24 = vadd.f32 %v2359_v2, %v8437_v47  ;;  %v7006_v29 = vld [vmem:[#allocation7 + $0xa4] ss:$16 sps:$4 sm:$0xff]   ;;  %v7012_v53 = vld [vmem:[#allocation7 + $0xa0] ss:$16 sps:$4 sm:$0xff]  }
 0x5bc   :  { %v4954_v55 = vmul.f32 -1.442695, %v2364_v37  ;;  %v2321_v57 = vpop.f32.mrb[27].mxu0  ;;  %v2362_v0 = vpop.f32.mrb[59].mxu1  ;;  %v4956_v40 = vmul.f32 -1.442695, %v2366_v49 }
 0x5bd   :  { %v4955_v34 = vmul.f32 -1.442695, %v2365_v6  ;;  %v7008_v37 = vld [vmem:[#allocation7 + $0xac] ss:$16 sps:$4 sm:$0xff]   ;;  %v7014_v2 = vld [vmem:[#allocation7 + $0xa8] ss:$16 sps:$4 sm:$0xff]  }
 0x5be   :  { %5506 = vpow2.f32 %v4954_v55  ;;  %v7018_v5 = vld [vmem:[#allocation7 + $0xc4] ss:$16 sps:$4 sm:$0xff]   ;;  %v7020_v6 = vld [vmem:[#allocation7 + $0xcc] ss:$16 sps:$4 sm:$0xff]   ;;  %v7024_v61 = vld [vmem:[#allocation7 + $0xc0] ss:$16 sps:$4 sm:$0xff]  }
 0x5bf   :  { %5508 = vpow2.f32 %v4955_v34  ;;  %v7026_v27 = vld [vmem:[#allocation7 + $0xc8] ss:$16 sps:$4 sm:$0xff]   ;;  %v7030_v55 = vld [vmem:[#allocation7 + $0xe4] ss:$16 sps:$4 sm:$0xff]   ;;  %v7032_v57 = vld [vmem:[#allocation7 + $0xec] ss:$16 sps:$4 sm:$0xff]  }
 0x5c0   :  { %5510 = vtanh.f32 %v2367_v24  ;;  %v7036_v0 = vld [vmem:[#allocation7 + $0xe0] ss:$16 sps:$4 sm:$0xff]   ;;  %v7038_v34 = vld [vmem:[#allocation7 + $0xe8] ss:$16 sps:$4 sm:$0xff]  }
 0x5c1   :  { %5512 = vpow2.f32 %v4956_v40  ;;  %v7046_v59 = vld [vmem:[#allocation4 + $0x8] sm:$0xff]  ;;  %v7048_v49 = vld [vmem:[#allocation4 + $0x18] sm:$0xff]  ;;  %v7054_v47 = vld [vmem:[#allocation4 + $0x10] sm:$0xff] }
 0x5c2   :  { %v7058_v24 = vld [vmem:[#allocation4 + $0x28] sm:$0xff]  ;;  %v7064_v40 = vld [vmem:[#allocation4 + $0x20] sm:$0xff] }
 0x5c5   :  { %v5505_v16 = vpop.eup %5504 }
 0x5c6   :  { %v6940_v32 = vmul.f32 %v5505_v16, %v5503_v42  ;;  %v7052_v42 = vld [vmem:[#allocation4] sm:$0xff]  ;;  %v7060_v16 = vld [vmem:[#allocation4 + $0x38] sm:$0xff] }
 0x5c8   :  { %8438 = vst [vmem:[#allocation34_spill] sm:$0xff] %v6940_v32  ;;  %v5507_v38 = vpop.eup %5506  ;;  %v2393_v14 = vpack.c.bf16 %v6940_v32, %v6940_v32  ;;  %v7114_v32 = vld [vmem:[#allocation4 + $0xb0] sm:$0xff] }
 0x5c9   :  { %v2377_v3 = vadd.f32 1.0, %v5507_v38  ;;  %v5509_v20 = vpop.eup %5508  ;;  %v7066_v38 = vld [vmem:[#allocation4 + $0x30] sm:$0xff]  ;;  %8454 = vst [vmem:[#allocation75_spill] sm:$0xff] %v7114_v32 }
 0x5ca   :  { %v2378_v36 = vadd.f32 1.0, %v5509_v20  ;;  %2512 = vmatprep.mubr.bf16.mxu0 %v2393_v14  ;;  %2553 = vmatprep.mubr.bf16.mxu1 %v2393_v14  ;;  %v5511_v22 = vpop.eup %5510  ;;  %v7072_v14 = vld [vmem:[#allocation4 + $0x58] sm:$0xff]  ;;  %v7076_v20 = vld [vmem:[#allocation4 + $0x40] sm:$0xff] }
 0x5cb   :  { %5514 = vrcp.f32 %v2377_v3  ;;  %v5513_v25 = vpop.eup %5512  ;;  %v7070_v3 = vld [vmem:[#allocation4 + $0x48] sm:$0xff]  ;;  %8440 = vst [vmem:[#allocation50_spill] sm:$0xff] %v7072_v14  ;;  %8441 = vst [vmem:[#allocation62_spill] sm:$0xff] %v7076_v20 }
 0x5cc   :  { %5516 = vrcp.f32 %v2378_v36  ;;  %v2379_v52 = vadd.f32 1.0, %v5513_v25  ;;  %8439 = vst [vmem:[#allocation49_spill] sm:$0xff] %v7070_v3  ;;  %v7078_v36 = vld [vmem:[#allocation4 + $0x50] sm:$0xff]  ;;  %v7084_v25 = vld [vmem:[#allocation4 + $0x78] sm:$0xff] }
 0x5cd   :  { %8442 = vst [vmem:[#allocation63_spill] sm:$0xff] %v7078_v36  ;;  %8444 = vst [vmem:[#allocation65_spill] sm:$0xff] %v7084_v25 }
 0x5ce   :  { %5518 = vrcp.f32 %v2379_v52  ;;  %v7096_v52 = vld [vmem:[#allocation4 + $0x98] sm:$0xff] }
 0x5cf   :  { %8448 = vst [vmem:[#allocation69_spill] sm:$0xff] %v7096_v52 }
 0x5d5   :  { %v5515_v28 = vpop.eup %5514 }
 0x5d6   :  { %v2388_v30 = vmul.f32 %v5515_v28, %v5511_v22  ;;  %v5517_v50 = vpop.eup %5516  ;;  %v7082_v22 = vld [vmem:[#allocation4 + $0x68] sm:$0xff]  ;;  %v7088_v28 = vld [vmem:[#allocation4 + $0x60] sm:$0xff] }
 0x5d7   :  { %v2387_v56 = vmul.f32 %v5517_v50, %v6820_v44  ;;  %v6962_v44 = vld [vmem:[#allocation7 + $0x20] ss:$16 sps:$4 sm:$0xff]   ;;  %8443 = vst [vmem:[#allocation64_spill] sm:$0xff] %v7082_v22  ;;  %8445 = vst [vmem:[#allocation66_spill] sm:$0xff] %v7088_v28  ;;  %v7094_v50 = vld [vmem:[#allocation4 + $0x88] sm:$0xff] }
 0x5d8   :  { %v5519_v8 = vpop.eup %5518  ;;  %8447 = vst [vmem:[#allocation68_spill] sm:$0xff] %v7094_v50 }
 0x5d9   :  { %v6945_v60 = vadd.f32 %v2388_v30, %v2387_v56  ;;  %v7090_v30 = vld [vmem:[#allocation4 + $0x70] sm:$0xff]  ;;  %v7100_v56 = vld [vmem:[#allocation4 + $0x80] sm:$0xff] }
 0x5da   :  { %8446 = vst [vmem:[#allocation67_spill] sm:$0xff] %v7090_v30  ;;  %8449 = vst [vmem:[#allocation70_spill] sm:$0xff] %v7100_v56 }
 0x5db   :  { %5520 = vtanh.f32 %v6945_v60 }
 0x5e5   :  { %v5521_v17 = vpop.eup %5520 }
 0x5e6   :  { %v2391_v26 = vmul.f32 %v5521_v17, %v5519_v8  ;;  %v7102_v8 = vld [vmem:[#allocation4 + $0x90] sm:$0xff]  ;;  %v7106_v17 = vld [vmem:[#allocation4 + $0xa8] sm:$0xff] }
 0x5e7   :  { %8450 = vst [vmem:[#allocation71_spill] sm:$0xff] %v7102_v8  ;;  %8451 = vst [vmem:[#allocation72_spill] sm:$0xff] %v7106_v17 }
 0x5e8   :  { %v6952_v31 = vpack.c.bf16 %v2391_v26, %v2391_v26  ;;  %v7108_v26 = vld [vmem:[#allocation4 + $0xb8] sm:$0xff] }
 0x5e9   :  { %8452 = vst [vmem:[#allocation73_spill] sm:$0xff] %v7108_v26 }
 0x5ea   :  { %2513 = vmatmul.mubr.bf16.vlgmr.msra.gmra.mrb[28].mxu0 %v6952_v31  ;;  %2554 = vmatmul.mubr.bf16.vlgmr.msra.gmra.mrb[60].mxu1 %v6952_v31 }
 0x5eb   :  { %2786 = vmatpush1.bf16.msra.mxu0 %v6948_v33  ;;  %2827 = vmatpush1.bf16.msra.mxu1 %v6950_v35 }
 0x5ec   :  { %2787 = vmatprep.subr.bf16.mxu0 %v6954_v39  ;;  %2828 = vmatprep.subr.bf16.mxu1 %v6956_v41 }
 0x5ed   :  { %2817 = vmatprep.mubr.bf16.mxu0 %v8255_v46  ;;  %2858 = vmatprep.mubr.bf16.mxu1 %v8255_v46 }
 0x5ef   :  { %2788 = vmatpush1.bf16.msra.mxu0 %v6962_v44  ;;  %2829 = vmatpush1.bf16.msra.mxu1 %v6964_v43 }
 0x5f0   :  { %2789 = vmatprep.subr.bf16.mxu0 %v6968_v45  ;;  %2830 = vmatprep.subr.bf16.mxu1 %v6970_v48 }
 0x5f3   :  { %2790 = vmatpush1.bf16.msra.mxu0 %v6976_v51  ;;  %2831 = vmatpush1.bf16.msra.mxu1 %v6978_v54 }
 0x5f4   :  { %2791 = vmatprep.subr.bf16.mxu0 %v6982_v58  ;;  %2832 = vmatprep.subr.bf16.mxu1 %v6984_v62 }
 0x5f7   :  { %2792 = vmatpush1.bf16.msra.mxu0 %v6988_v11  ;;  %2833 = vmatpush1.bf16.msra.mxu1 %v6990_v15 }
 0x5f8   :  { %2793 = vmatprep.subr.bf16.mxu0 %v6994_v19  ;;  %2834 = vmatprep.subr.bf16.mxu1 %v6996_v23 }
 0x5fb   :  { %2794 = vmatpush1.bf16.msra.mxu0 %v7000_v21  ;;  %2835 = vmatpush1.bf16.msra.mxu1 %v7002_v13 }
 0x5fc   :  { %2795 = vmatprep.subr.bf16.mxu0 %v7006_v29  ;;  %2836 = vmatprep.subr.bf16.mxu1 %v7008_v37 }
 0x5ff   :  { %2796 = vmatpush1.bf16.msra.mxu0 %v7012_v53  ;;  %2837 = vmatpush1.bf16.msra.mxu1 %v7014_v2 }
 0x600   :  { %2797 = vmatprep.subr.bf16.mxu0 %v7018_v5  ;;  %2838 = vmatprep.subr.bf16.mxu1 %v7020_v6 }
 0x603   :  { %2798 = vmatpush1.bf16.msra.mxu0 %v7024_v61  ;;  %2839 = vmatpush1.bf16.msra.mxu1 %v7026_v27 }
 0x604   :  { %2799 = vmatprep.subr.bf16.mxu0 %v7030_v55  ;;  %2840 = vmatprep.subr.bf16.mxu1 %v7032_v57 }
 0x607   :  { %2800 = vmatpush1.bf16.msra.mxu0 %v7036_v0  ;;  %2841 = vmatpush1.bf16.msra.mxu1 %v7038_v34 }
 0x608   :  { %2983 = vmatprep.subr.bf16.mxu0 %v7046_v59  ;;  %3024 = vmatprep.subr.bf16.mxu1 %v7048_v49 }
 0x60a   :  { %2818 = vmatmul.mubr.bf16.vlgmr.msra.gmra.mrb[32].mxu0 %v6952_v31  ;;  %2859 = vmatmul.mubr.bf16.vlgmr.msra.gmra.mrb[64].mxu1 %v6952_v31  ;;  %v7112_v31 = vld [vmem:[#allocation4 + $0xa0] sm:$0xff] }
 0x60b   :  { %2984 = vmatpush1.bf16.msra.mxu0 %v7052_v42  ;;  %3025 = vmatpush1.bf16.msra.mxu1 %v7054_v47  ;;  %8453 = vst [vmem:[#allocation74_spill] sm:$0xff] %v7112_v31 }
 0x60c   :  { %2985 = vmatprep.subr.bf16.mxu0 %v7058_v24  ;;  %3026 = vmatprep.subr.bf16.mxu1 %v7060_v16 }
 0x60f   :  { %2986 = vmatpush1.bf16.msra.mxu0 %v7064_v40  ;;  %3027 = vmatpush1.bf16.msra.mxu1 %v7066_v38 }
 0x610   :  { %2987 = vmatprep.subr.bf16.mxu0 %v7070_v3  ;;  %3028 = vmatprep.subr.bf16.mxu1 %v7072_v14 }
 0x613   :  { %2988 = vmatpush1.bf16.msra.mxu0 %v7076_v20  ;;  %3029 = vmatpush1.bf16.msra.mxu1 %v7078_v36 }
 0x614   :  { %2989 = vmatprep.subr.bf16.mxu0 %v7082_v22  ;;  %3030 = vmatprep.subr.bf16.mxu1 %v7084_v25 }
 0x617   :  { %2990 = vmatpush1.bf16.msra.mxu0 %v7088_v28  ;;  %3031 = vmatpush1.bf16.msra.mxu1 %v7090_v30 }
 0x618   :  { %2991 = vmatprep.subr.bf16.mxu0 %v7094_v50  ;;  %3032 = vmatprep.subr.bf16.mxu1 %v7096_v52  ;;  %v7214_v52 = vld [vmem:[#allocation4 + $0x1d8] sm:$0xff] }
 0x619   :  { %8488 = vst [vmem:[#allocation109_spill] sm:$0xff] %v7214_v52 }
 0x61b   :  { %2992 = vmatpush1.bf16.msra.mxu0 %v7100_v56  ;;  %3033 = vmatpush1.bf16.msra.mxu1 %v7102_v8  ;;  %v7120_v56 = vld [vmem:[#allocation4 + $0xd8] sm:$0xff]  ;;  %v7124_v8 = vld [vmem:[#allocation4 + $0xc0] sm:$0xff] }
 0x61c   :  { %2993 = vmatprep.subr.bf16.mxu0 %v7106_v17  ;;  %3034 = vmatprep.subr.bf16.mxu1 %v7108_v26  ;;  %8456 = vst [vmem:[#allocation77_spill] sm:$0xff] %v7120_v56  ;;  %8457 = vst [vmem:[#allocation78_spill] sm:$0xff] %v7124_v8  ;;  %v7126_v17 = vld [vmem:[#allocation4 + $0xd0] sm:$0xff]  ;;  %v7130_v26 = vld [vmem:[#allocation4 + $0xe8] sm:$0xff] }
 0x61d   :  { %8458 = vst [vmem:[#allocation79_spill] sm:$0xff] %v7126_v17  ;;  %8459 = vst [vmem:[#allocation80_spill] sm:$0xff] %v7130_v26 }
 0x61f   :  { %2994 = vmatpush1.bf16.msra.mxu0 %v7112_v31  ;;  %3035 = vmatpush1.bf16.msra.mxu1 %v7114_v32  ;;  %v7132_v31 = vld [vmem:[#allocation4 + $0xf8] sm:$0xff]  ;;  %v7136_v32 = vld [vmem:[#allocation4 + $0xe0] sm:$0xff] }
 0x620   :  { %2995 = vmatprep.subr.bf16.mxu0 %v7118_v4  ;;  %3036 = vmatprep.subr.bf16.mxu1 %v7120_v56  ;;  %8460 = vst [vmem:[#allocation81_spill] sm:$0xff] %v7132_v31  ;;  %8461 = vst [vmem:[#allocation82_spill] sm:$0xff] %v7136_v32  ;;  %v7138_v4 = vld [vmem:[#allocation4 + $0xf0] sm:$0xff]  ;;  %v7142_v56 = vld [vmem:[#allocation4 + $0x108] sm:$0xff] }
 0x621   :  { %8462 = vst [vmem:[#allocation83_spill] sm:$0xff] %v7138_v4  ;;  %8463 = vst [vmem:[#allocation84_spill] sm:$0xff] %v7142_v56 }
 0x623   :  { %2996 = vmatpush1.bf16.msra.mxu0 %v7124_v8  ;;  %3037 = vmatpush1.bf16.msra.mxu1 %v7126_v17  ;;  %v7144_v8 = vld [vmem:[#allocation4 + $0x118] sm:$0xff]  ;;  %v7148_v17 = vld [vmem:[#allocation4 + $0x100] sm:$0xff] }
 0x624   :  { %2997 = vmatprep.subr.bf16.mxu0 %v7130_v26  ;;  %3038 = vmatprep.subr.bf16.mxu1 %v7132_v31  ;;  %8464 = vst [vmem:[#allocation85_spill] sm:$0xff] %v7144_v8  ;;  %8465 = vst [vmem:[#allocation86_spill] sm:$0xff] %v7148_v17  ;;  %v7150_v26 = vld [vmem:[#allocation4 + $0x110] sm:$0xff]  ;;  %v7154_v31 = vld [vmem:[#allocation4 + $0x128] sm:$0xff] }
 0x625   :  { %8466 = vst [vmem:[#allocation87_spill] sm:$0xff] %v7150_v26  ;;  %8467 = vst [vmem:[#allocation88_spill] sm:$0xff] %v7154_v31 }
 0x627   :  { %2998 = vmatpush1.bf16.msra.mxu0 %v7136_v32  ;;  %3039 = vmatpush1.bf16.msra.mxu1 %v7138_v4  ;;  %v7156_v32 = vld [vmem:[#allocation4 + $0x138] sm:$0xff]  ;;  %v7160_v4 = vld [vmem:[#allocation4 + $0x120] sm:$0xff] }
 0x628   :  { %2999 = vmatprep.subr.bf16.mxu0 %v7142_v56  ;;  %3040 = vmatprep.subr.bf16.mxu1 %v7144_v8  ;;  %8468 = vst [vmem:[#allocation89_spill] sm:$0xff] %v7156_v32  ;;  %8469 = vst [vmem:[#allocation90_spill] sm:$0xff] %v7160_v4  ;;  %v7162_v56 = vld [vmem:[#allocation4 + $0x130] sm:$0xff]  ;;  %v7166_v8 = vld [vmem:[#allocation4 + $0x148] sm:$0xff] }
 0x629   :  { %8470 = vst [vmem:[#allocation91_spill] sm:$0xff] %v7162_v56  ;;  %8471 = vst [vmem:[#allocation92_spill] sm:$0xff] %v7166_v8 }
 0x62b   :  { %3000 = vmatpush1.bf16.msra.mxu0 %v7148_v17  ;;  %3041 = vmatpush1.bf16.msra.mxu1 %v7150_v26  ;;  %v7168_v17 = vld [vmem:[#allocation4 + $0x158] sm:$0xff]  ;;  %v7172_v26 = vld [vmem:[#allocation4 + $0x140] sm:$0xff] }
 0x62c   :  { %3001 = vmatprep.subr.bf16.mxu0 %v7154_v31  ;;  %3042 = vmatprep.subr.bf16.mxu1 %v7156_v32  ;;  %8472 = vst [vmem:[#allocation93_spill] sm:$0xff] %v7168_v17  ;;  %8473 = vst [vmem:[#allocation94_spill] sm:$0xff] %v7172_v26  ;;  %v7174_v31 = vld [vmem:[#allocation4 + $0x150] sm:$0xff]  ;;  %v7178_v32 = vld [vmem:[#allocation4 + $0x168] sm:$0xff] }
 0x62d   :  { %8474 = vst [vmem:[#allocation95_spill] sm:$0xff] %v7174_v31  ;;  %8475 = vst [vmem:[#allocation96_spill] sm:$0xff] %v7178_v32 }
 0x62f   :  { %3002 = vmatpush1.bf16.msra.mxu0 %v7160_v4  ;;  %3043 = vmatpush1.bf16.msra.mxu1 %v7162_v56  ;;  %v7180_v4 = vld [vmem:[#allocation4 + $0x178] sm:$0xff]  ;;  %v7184_v56 = vld [vmem:[#allocation4 + $0x160] sm:$0xff] }
 0x630   :  { %3003 = vmatprep.subr.bf16.mxu0 %v7166_v8  ;;  %3044 = vmatprep.subr.bf16.mxu1 %v7168_v17  ;;  %8476 = vst [vmem:[#allocation97_spill] sm:$0xff] %v7180_v4  ;;  %8477 = vst [vmem:[#allocation98_spill] sm:$0xff] %v7184_v56  ;;  %v7186_v8 = vld [vmem:[#allocation4 + $0x170] sm:$0xff]  ;;  %v7190_v17 = vld [vmem:[#allocation4 + $0x188] sm:$0xff] }
 0x631   :  { %8478 = vst [vmem:[#allocation99_spill] sm:$0xff] %v7186_v8  ;;  %8479 = vst [vmem:[#allocation100_spill] sm:$0xff] %v7190_v17 }
 0x633   :  { %3004 = vmatpush1.bf16.msra.mxu0 %v7172_v26  ;;  %3045 = vmatpush1.bf16.msra.mxu1 %v7174_v31  ;;  %v7192_v26 = vld [vmem:[#allocation4 + $0x198] sm:$0xff]  ;;  %v7196_v31 = vld [vmem:[#allocation4 + $0x180] sm:$0xff] }
 0x634   :  { %3005 = vmatprep.subr.bf16.mxu0 %v7178_v32  ;;  %3046 = vmatprep.subr.bf16.mxu1 %v7180_v4  ;;  %8480 = vst [vmem:[#allocation101_spill] sm:$0xff] %v7192_v26  ;;  %8481 = vst [vmem:[#allocation102_spill] sm:$0xff] %v7196_v31  ;;  %v7198_v32 = vld [vmem:[#allocation4 + $0x190] sm:$0xff]  ;;  %v7202_v4 = vld [vmem:[#allocation4 + $0x1a8] sm:$0xff] }
 0x635   :  { %8482 = vst [vmem:[#allocation103_spill] sm:$0xff] %v7198_v32  ;;  %8483 = vst [vmem:[#allocation104_spill] sm:$0xff] %v7202_v4 }
 0x637   :  { %3006 = vmatpush1.bf16.msra.mxu0 %v7184_v56  ;;  %3047 = vmatpush1.bf16.msra.mxu1 %v7186_v8  ;;  %v7204_v56 = vld [vmem:[#allocation4 + $0x1b8] sm:$0xff]  ;;  %v7206_v8 = vld [vmem:[#allocation4 + $0x1a0] sm:$0xff] }
 0x638   :  { %3007 = vmatprep.subr.bf16.mxu0 %v7190_v17  ;;  %3048 = vmatprep.subr.bf16.mxu1 %v7192_v26  ;;  %8484 = vst [vmem:[#allocation105_spill] sm:$0xff] %v7204_v56  ;;  %8485 = vst [vmem:[#allocation106_spill] sm:$0xff] %v7206_v8  ;;  %v7210_v17 = vld [vmem:[#allocation4 + $0x1b0] sm:$0xff]  ;;  %v7212_v26 = vld [vmem:[#allocation4 + $0x1c8] sm:$0xff] }
 0x639   :  { %8486 = vst [vmem:[#allocation107_spill] sm:$0xff] %v7210_v17  ;;  %8487 = vst [vmem:[#allocation108_spill] sm:$0xff] %v7212_v26 }
 0x63b   :  { %3008 = vmatpush1.bf16.msra.mxu0 %v7196_v31  ;;  %3049 = vmatpush1.bf16.msra.mxu1 %v7198_v32  ;;  %v7220_v32 = vld [vmem:[#allocation4 + $0x1c0] sm:$0xff]  ;;  %v7222_v31 = vld [vmem:[#allocation4 + $0x1d0] sm:$0xff] }
 0x63c   :  { %3009 = vmatprep.subr.bf16.mxu0 %v7202_v4  ;;  %3050 = vmatprep.subr.bf16.mxu1 %v7204_v56  ;;  %8489 = vst [vmem:[#allocation110_spill] sm:$0xff] %v7220_v32  ;;  %8490 = vst [vmem:[#allocation42_spill] sm:$0xff] %v7222_v31  ;;  %v7224_v4 = vld [vmem:[#allocation4 + $0x1e8] sm:$0xff]  ;;  %v7226_v56 = vld [vmem:[#allocation4 + $0x1f8] sm:$0xff] }
 0x63d   :  { %8491 = vst [vmem:[#allocation44_spill] sm:$0xff] %v7224_v4  ;;  %8492 = vst [vmem:[#allocation31_spill] sm:$0xff] %v7226_v56 }
 0x63f   :  { %3010 = vmatpush1.bf16.msra.mxu0 %v7206_v8  ;;  %3051 = vmatpush1.bf16.msra.mxu1 %v7210_v17  ;;  %v7232_v17 = vld [vmem:[#allocation4 + $0x1e0] sm:$0xff] }
 0x640   :  { %3011 = vmatprep.subr.bf16.mxu0 %v7212_v26  ;;  %3052 = vmatprep.subr.bf16.mxu1 %v7214_v52  ;;  %8493 = vst [vmem:[#allocation32_spill] sm:$0xff] %v7232_v17  ;;  %v7234_v26 = vld [vmem:[#allocation4 + $0x1f0] sm:$0xff] }
 0x641   :  { %8494 = vst [vmem:[#allocation47_spill] sm:$0xff] %v7234_v26 }
 0x643   :  { %3012 = vmatpush1.bf16.msra.mxu0 %v7220_v32  ;;  %3053 = vmatpush1.bf16.msra.mxu1 %v7222_v31  ;;  %v2458_v31 = vld [vmem:[%s7911_s6] sm:$0xf] }
 0x644   :  { %3013 = vmatprep.subr.bf16.mxu0 %v7224_v4  ;;  %3054 = vmatprep.subr.bf16.mxu1 %v7226_v56  ;;  %v2463_v4 = vrot.slane %v2458_v31, %v8432_v10  ;;  %v2467_v56 = vrot.slane %v2458_v31, %v8433_v18  ;;  %v2471_v36 = vrot.slane %v2458_v31, %v8308_v7 }
 0x645   :  { %v2475_v10 = vrot.slane %v2458_v31, %v8309_v12 }
 0x647   :  { %3014 = vmatpush1.bf16.msra.mxu0 %v7232_v17  ;;  %3055 = vmatpush1.bf16.msra.mxu1 %v7234_v26 }
 0x648   :  { %3288 = vmatprep.subr.bf16.mxu0 %v6919_v1  ;;  %3329 = vmatprep.subr.bf16.mxu1 %v6921_v9 }
 0x6bd   :  { %v2514_v32 = vpop.f32.mrb[28].mxu0  ;;  %v2555_v52 = vpop.f32.mrb[60].mxu1 }
 0x6be   :  { %v2515_v8 = vadd.f32 %v2514_v32, %v2463_v4  ;;  %v2516_v50 = vpop.f32.mrb[29].mxu0  ;;  %v2557_v30 = vpop.f32.mrb[61].mxu1  ;;  %v2556_v20 = vadd.f32 %v2555_v52, %v2471_v36 }
 0x6bf   :  { %v2517_v17 = vadd.f32 %v2516_v50, %v2467_v56  ;;  %v2518_v28 = vpop.f32.mrb[30].mxu0  ;;  %v2559_v26 = vpop.f32.mrb[62].mxu1  ;;  %v2558_v18 = vadd.f32 %v2557_v30, %v2475_v10 }
 0x6c0   :  { %v4957_v25 = vmul.f32 -1.442695, %v2515_v8  ;;  %v2519_v1 = vpop.f32.mrb[31].mxu0  ;;  %v2560_v22 = vpop.f32.mrb[63].mxu1  ;;  %v4959_v14 = vmul.f32 -1.442695, %v2556_v20 }
 0x6c1   :  { %v4958_v9 = vmul.f32 -1.442695, %v2517_v17  ;;  %v8495_v20 = vld [vmem:[#allocation37_spill] sm:$0xff] }
 0x6c2   :  { %5522 = vpow2.f32 %v4957_v25 }
 0x6c3   :  { %5524 = vpow2.f32 %v4958_v9 }
 0x6c4   :  { %5526 = vtanh.f32 %v2558_v18 }
 0x6c5   :  { %5528 = vpow2.f32 %v4959_v14  ;;  %v8496_v14 = vld [vmem:[#allocation38_spill] sm:$0xff] }
 0x6cc   :  { %v5523_v3 = vpop.eup %5522 }
 0x6cd   :  { %v2571_v4 = vadd.f32 1.0, %v5523_v3  ;;  %v5525_v32 = vpop.eup %5524 }
 0x6ce   :  { %v2572_v28 = vadd.f32 1.0, %v5525_v32  ;;  %v5527_v50 = vpop.eup %5526 }
 0x6cf   :  { %5530 = vrcp.f32 %v2571_v4  ;;  %v5529_v22 = vpop.eup %5528 }
 0x6d0   :  { %5532 = vrcp.f32 %v2572_v28  ;;  %v2573_v17 = vadd.f32 1.0, %v5529_v22 }
 0x6d2   :  { %5534 = vrcp.f32 %v2573_v17 }
 0x6d9   :  { %v5531_v56 = vpop.eup %5530 }
 0x6da   :  { %v2582_v25 = vmul.f32 %v5531_v56, %v5527_v50  ;;  %v5533_v8 = vpop.eup %5532 }
 0x6db   :  { %v2581_v26 = vmul.f32 %v5533_v8, %v6933_v63  ;;  %v8497_v63 = vld [vmem:[#allocation53_spill] sm:$0xff] }
 0x6dc   :  { %v5535_v56 = vpop.eup %5534 }
 0x6dd   :  { %v2819_v31 = vpop.f32.mrb[32].mxu0  ;;  %v2860_v36 = vpop.f32.mrb[64].mxu1  ;;  %v7248_v10 = vadd.f32 %v2582_v25, %v2581_v26  ;;  %v8498_v25 = vld [vmem:[#allocation54_spill] sm:$0xff] }
 0x6de   :  { %v2867_v3 = vadd.f32 %v2819_v31, %v8495_v20  ;;  %v2821_v18 = vpop.f32.mrb[33].mxu0  ;;  %v2862_v30 = vpop.f32.mrb[65].mxu1  ;;  %v2869_v22 = vadd.f32 %v2860_v36, %v8497_v63 }
 0x6df   :  { %v2868_v52 = vadd.f32 %v2821_v18, %v8496_v14  ;;  %v2823_v1 = vpop.f32.mrb[34].mxu0  ;;  %v2864_v9 = vpop.f32.mrb[66].mxu1  ;;  %5536 = vtanh.f32 %v7248_v10  ;;  %v2870_v8 = vadd.f32 %v2862_v30, %v8498_v25 }
 0x6e0   :  { %v4992_v4 = vmul.f32 -1.442695, %v2867_v3  ;;  %v2824_v32 = vpop.f32.mrb[35].mxu0  ;;  %v2865_v28 = vpop.f32.mrb[67].mxu1  ;;  %v4994_v31 = vmul.f32 -1.442695, %v2869_v22 }
 0x6e1   :  { %v4993_v50 = vmul.f32 -1.442695, %v2868_v52 }
 0x6e2   :  { %5538 = vpow2.f32 %v4992_v4 }
 0x6e3   :  { %5540 = vpow2.f32 %v4993_v50 }
 0x6e4   :  { %5542 = vtanh.f32 %v2870_v8  ;;  %v8539_v8 = vld [vmem:[#allocation99_spill] sm:$0xff] }
 0x6e5   :  { %5544 = vpow2.f32 %v4994_v31  ;;  %v8541_v31 = vld [vmem:[#allocation101_spill] sm:$0xff] }
 0x6e9   :  { %v5537_v26 = vpop.eup %5536 }
 0x6ea   :  { %v7255_v17 = vmul.f32 %v5537_v26, %v5535_v56  ;;  %v8540_v26 = vld [vmem:[#allocation100_spill] sm:$0xff] }
 0x6ec   :  { %8499 = vst [vmem:[#allocation48_spill] sm:$0xff] %v7255_v17  ;;  %v5539_v20 = vpop.eup %5538  ;;  %v2896_v3 = vpack.c.bf16 %v7255_v17, %v7255_v17  ;;  %v7558_v17 = vld [vmem:[#allocation4 + $0xc8] sm:$0xff] }
 0x6ed   :  { %v2880_v18 = vadd.f32 1.0, %v5539_v20  ;;  %v5541_v14 = vpop.eup %5540  ;;  %v8542_v20 = vld [vmem:[#allocation102_spill] sm:$0xff] }
 0x6ee   :  { %v2881_v52 = vadd.f32 1.0, %v5541_v14  ;;  %3015 = vmatprep.mubr.bf16.mxu0 %v2896_v3  ;;  %3056 = vmatprep.mubr.bf16.mxu1 %v2896_v3  ;;  %v5543_v36 = vpop.eup %5542  ;;  %v8544_v3 = vld [vmem:[#allocation104_spill] sm:$0xff]  ;;  %v8545_v14 = vld [vmem:[#allocation105_spill] sm:$0xff] }
 0x6ef   :  { %5546 = vrcp.f32 %v2880_v18  ;;  %v5545_v1 = vpop.eup %5544  ;;  %v8543_v18 = vld [vmem:[#allocation103_spill] sm:$0xff] }
 0x6f0   :  { %5548 = vrcp.f32 %v2881_v52  ;;  %v2882_v32 = vadd.f32 1.0, %v5545_v1  ;;  %v8546_v52 = vld [vmem:[#allocation106_spill] sm:$0xff]  ;;  %v8548_v1 = vld [vmem:[#allocation108_spill] sm:$0xff] }
 0x6f2   :  { %5550 = vrcp.f32 %v2882_v32  ;;  %v8552_v32 = vld [vmem:[#allocation44_spill] sm:$0xff] }
 0x6f9   :  { %v5547_v30 = vpop.eup %5546 }
 0x6fa   :  { %v2891_v9 = vmul.f32 %v5547_v30, %v5543_v36  ;;  %v5549_v4 = vpop.eup %5548  ;;  %v8547_v36 = vld [vmem:[#allocation107_spill] sm:$0xff]  ;;  %v8549_v30 = vld [vmem:[#allocation109_spill] sm:$0xff] }
 0x6fb   :  { %v2890_v28 = vmul.f32 %v5549_v4, %v6945_v60  ;;  %v8500_v60 = vld [vmem:[#allocation49_spill] sm:$0xff]  ;;  %v8551_v4 = vld [vmem:[#allocation42_spill] sm:$0xff] }
 0x6fc   :  { %v5551_v63 = vpop.eup %5550 }
 0x6fd   :  { %v7260_v50 = vadd.f32 %v2891_v9, %v2890_v28  ;;  %v8550_v9 = vld [vmem:[#allocation110_spill] sm:$0xff]  ;;  %v8553_v28 = vld [vmem:[#allocation31_spill] sm:$0xff] }
 0x6ff   :  { %5552 = vtanh.f32 %v7260_v50 }
 0x709   :  { %v5553_v22 = vpop.eup %5552 }
 0x70a   :  { %v2894_v56 = vmul.f32 %v5553_v22, %v5551_v63  ;;  %v8554_v63 = vld [vmem:[#allocation32_spill] sm:$0xff]  ;;  %v8555_v22 = vld [vmem:[#allocation47_spill] sm:$0xff] }
 0x70c   :  { %v2895_v25 = vpack.c.bf16 %v2894_v56, %v2894_v56  ;;  %v7359_v56 = vld [vmem:[#allocation7 + $0x4] ss:$16 sps:$4 sm:$0xff]  }
 0x70e   :  { %3016 = vmatmul.mubr.bf16.vlgmr.msra.gmra.mrb[36].mxu0 %v2895_v25  ;;  %3057 = vmatmul.mubr.bf16.vlgmr.msra.gmra.mrb[68].mxu1 %v2895_v25 }
 0x70f   :  { %3289 = vmatpush1.bf16.msra.mxu0 %v6948_v33  ;;  %3330 = vmatpush1.bf16.msra.mxu1 %v6950_v35  ;;  %v8501_v33 = vld [vmem:[#allocation50_spill] sm:$0xff] }
 0x710   :  { %3290 = vmatprep.subr.bf16.mxu0 %v6954_v39  ;;  %3331 = vmatprep.subr.bf16.mxu1 %v6956_v41  ;;  %v8502_v35 = vld [vmem:[#allocation62_spill] sm:$0xff]  ;;  %v8503_v39 = vld [vmem:[#allocation63_spill] sm:$0xff]  ;;  %v8504_v41 = vld [vmem:[#allocation64_spill] sm:$0xff] }
 0x711   :  { %3320 = vmatprep.mubr.bf16.mxu0 %v8255_v46  ;;  %3361 = vmatprep.mubr.bf16.mxu1 %v8255_v46 }
 0x713   :  { %3291 = vmatpush1.bf16.msra.mxu0 %v6962_v44  ;;  %3332 = vmatpush1.bf16.msra.mxu1 %v6964_v43  ;;  %v8505_v44 = vld [vmem:[#allocation65_spill] sm:$0xff]  ;;  %v8506_v43 = vld [vmem:[#allocation66_spill] sm:$0xff] }
 0x714   :  { %3292 = vmatprep.subr.bf16.mxu0 %v6968_v45  ;;  %3333 = vmatprep.subr.bf16.mxu1 %v6970_v48  ;;  %v8507_v45 = vld [vmem:[#allocation67_spill] sm:$0xff]  ;;  %v8508_v48 = vld [vmem:[#allocation68_spill] sm:$0xff] }
 0x715   :  { %8579 = vst [vmem:[#allocation68_spill] sm:$0xff] %v7558_v17 }
 0x717   :  { %3293 = vmatpush1.bf16.msra.mxu0 %v6976_v51  ;;  %3334 = vmatpush1.bf16.msra.mxu1 %v6978_v54  ;;  %v8509_v51 = vld [vmem:[#allocation69_spill] sm:$0xff]  ;;  %v8510_v54 = vld [vmem:[#allocation70_spill] sm:$0xff] }
 0x718   :  { %3294 = vmatprep.subr.bf16.mxu0 %v6982_v58  ;;  %3335 = vmatprep.subr.bf16.mxu1 %v6984_v62  ;;  %v8511_v58 = vld [vmem:[#allocation71_spill] sm:$0xff]  ;;  %v8512_v62 = vld [vmem:[#allocation72_spill] sm:$0xff] }
 0x71b   :  { %3295 = vmatpush1.bf16.msra.mxu0 %v6988_v11  ;;  %3336 = vmatpush1.bf16.msra.mxu1 %v6990_v15  ;;  %v8513_v11 = vld [vmem:[#allocation73_spill] sm:$0xff]  ;;  %v8514_v15 = vld [vmem:[#allocation74_spill] sm:$0xff] }
 0x71c   :  { %3296 = vmatprep.subr.bf16.mxu0 %v6994_v19  ;;  %3337 = vmatprep.subr.bf16.mxu1 %v6996_v23  ;;  %v8515_v19 = vld [vmem:[#allocation75_spill] sm:$0xff]  ;;  %v8516_v23 = vld [vmem:[#allocation76_spill] sm:$0xff] }
 0x71f   :  { %3297 = vmatpush1.bf16.msra.mxu0 %v7000_v21  ;;  %3338 = vmatpush1.bf16.msra.mxu1 %v7002_v13  ;;  %v8517_v21 = vld [vmem:[#allocation77_spill] sm:$0xff]  ;;  %v8518_v13 = vld [vmem:[#allocation78_spill] sm:$0xff] }
 0x720   :  { %3298 = vmatprep.subr.bf16.mxu0 %v7006_v29  ;;  %3339 = vmatprep.subr.bf16.mxu1 %v7008_v37  ;;  %v8519_v29 = vld [vmem:[#allocation79_spill] sm:$0xff]  ;;  %v8520_v37 = vld [vmem:[#allocation80_spill] sm:$0xff] }
 0x723   :  { %3299 = vmatpush1.bf16.msra.mxu0 %v7012_v53  ;;  %3340 = vmatpush1.bf16.msra.mxu1 %v7014_v2  ;;  %v8521_v53 = vld [vmem:[#allocation81_spill] sm:$0xff]  ;;  %v8522_v2 = vld [vmem:[#allocation82_spill] sm:$0xff] }
 0x724   :  { %3300 = vmatprep.subr.bf16.mxu0 %v7018_v5  ;;  %3341 = vmatprep.subr.bf16.mxu1 %v7020_v6  ;;  %v8523_v5 = vld [vmem:[#allocation83_spill] sm:$0xff]  ;;  %v8524_v6 = vld [vmem:[#allocation84_spill] sm:$0xff] }
 0x727   :  { %3301 = vmatpush1.bf16.msra.mxu0 %v7024_v61  ;;  %3342 = vmatpush1.bf16.msra.mxu1 %v7026_v27  ;;  %v8525_v61 = vld [vmem:[#allocation85_spill] sm:$0xff]  ;;  %v8526_v27 = vld [vmem:[#allocation86_spill] sm:$0xff] }
 0x728   :  { %3302 = vmatprep.subr.bf16.mxu0 %v7030_v55  ;;  %3343 = vmatprep.subr.bf16.mxu1 %v7032_v57  ;;  %v8527_v55 = vld [vmem:[#allocation87_spill] sm:$0xff]  ;;  %v8528_v57 = vld [vmem:[#allocation88_spill] sm:$0xff] }
 0x72b   :  { %3303 = vmatpush1.bf16.msra.mxu0 %v7036_v0  ;;  %3344 = vmatpush1.bf16.msra.mxu1 %v7038_v34  ;;  %v8529_v0 = vld [vmem:[#allocation89_spill] sm:$0xff]  ;;  %v8530_v34 = vld [vmem:[#allocation90_spill] sm:$0xff] }
 0x72c   :  { %3486 = vmatprep.subr.bf16.mxu0 %v7046_v59  ;;  %3527 = vmatprep.subr.bf16.mxu1 %v7048_v49  ;;  %v8531_v59 = vld [vmem:[#allocation91_spill] sm:$0xff]  ;;  %v8532_v49 = vld [vmem:[#allocation92_spill] sm:$0xff] }
 0x72e   :  { %3321 = vmatmul.mubr.bf16.vlgmr.msra.gmra.mrb[40].mxu0 %v2895_v25  ;;  %3362 = vmatmul.mubr.bf16.vlgmr.msra.gmra.mrb[72].mxu1 %v2895_v25  ;;  %v7361_v25 = vld [vmem:[#allocation7 + $0xc] ss:$16 sps:$4 sm:$0xff]  }
 0x72f   :  { %3487 = vmatpush1.bf16.msra.mxu0 %v7052_v42  ;;  %3528 = vmatpush1.bf16.msra.mxu1 %v7054_v47  ;;  %v8533_v42 = vld [vmem:[#allocation93_spill] sm:$0xff]  ;;  %v8534_v47 = vld [vmem:[#allocation94_spill] sm:$0xff] }
 0x730   :  { %3488 = vmatprep.subr.bf16.mxu0 %v7058_v24  ;;  %3529 = vmatprep.subr.bf16.mxu1 %v7060_v16  ;;  %v8535_v24 = vld [vmem:[#allocation95_spill] sm:$0xff]  ;;  %v8536_v16 = vld [vmem:[#allocation96_spill] sm:$0xff] }
 0x733   :  { %3489 = vmatpush1.bf16.msra.mxu0 %v7064_v40  ;;  %3530 = vmatpush1.bf16.msra.mxu1 %v7066_v38  ;;  %v8537_v40 = vld [vmem:[#allocation97_spill] sm:$0xff]  ;;  %v8538_v38 = vld [vmem:[#allocation98_spill] sm:$0xff] }
 0x734   :  { %3490 = vmatprep.subr.bf16.mxu0 %v8500_v60  ;;  %3531 = vmatprep.subr.bf16.mxu1 %v8501_v33  ;;  %v2961_v60 = vld [vmem:[%s7911_s6] sm:$0xf] }
 0x735   :  { %v8556_v33 = vld [vmem:[#allocation29_spill] sm:$0xff] }
 0x737   :  { %3491 = vmatpush1.bf16.msra.mxu0 %v8502_v35  ;;  %3532 = vmatpush1.bf16.msra.mxu1 %v8503_v39  ;;  %v2966_v35 = vrot.slane %v2961_v60, %v8556_v33  ;;  %v8557_v39 = vld [vmem:[#allocation30_spill] sm:$0xff] }
 0x738   :  { %3492 = vmatprep.subr.bf16.mxu0 %v8504_v41  ;;  %3533 = vmatprep.subr.bf16.mxu1 %v8505_v44  ;;  %v2970_v41 = vrot.slane %v2961_v60, %v8557_v39 }
 0x73b   :  { %3493 = vmatpush1.bf16.msra.mxu0 %v8506_v43  ;;  %3534 = vmatpush1.bf16.msra.mxu1 %v8507_v45 }
 0x73c   :  { %3494 = vmatprep.subr.bf16.mxu0 %v8508_v48  ;;  %3535 = vmatprep.subr.bf16.mxu1 %v8509_v51 }
 0x73f   :  { %3495 = vmatpush1.bf16.msra.mxu0 %v8510_v54  ;;  %3536 = vmatpush1.bf16.msra.mxu1 %v8511_v58 }
 0x740   :  { %3496 = vmatprep.subr.bf16.mxu0 %v8512_v62  ;;  %3537 = vmatprep.subr.bf16.mxu1 %v8513_v11 }
 0x743   :  { %3497 = vmatpush1.bf16.msra.mxu0 %v8514_v15  ;;  %3538 = vmatpush1.bf16.msra.mxu1 %v8515_v19 }
 0x744   :  { %3498 = vmatprep.subr.bf16.mxu0 %v8516_v23  ;;  %3539 = vmatprep.subr.bf16.mxu1 %v8517_v21  ;;  %v2974_v21 = vrot.slane %v2961_v60, %v8308_v7 }
 0x747   :  { %3499 = vmatpush1.bf16.msra.mxu0 %v8518_v13  ;;  %3540 = vmatpush1.bf16.msra.mxu1 %v8519_v29  ;;  %v2978_v13 = vrot.slane %v2961_v60, %v8309_v12 }
 0x748   :  { %3500 = vmatprep.subr.bf16.mxu0 %v8520_v37  ;;  %3541 = vmatprep.subr.bf16.mxu1 %v8521_v53 }
 0x74b   :  { %3501 = vmatpush1.bf16.msra.mxu0 %v8522_v2  ;;  %3542 = vmatpush1.bf16.msra.mxu1 %v8523_v5 }
 0x74c   :  { %3502 = vmatprep.subr.bf16.mxu0 %v8524_v6  ;;  %3543 = vmatprep.subr.bf16.mxu1 %v8525_v61 }
 0x74f   :  { %3503 = vmatpush1.bf16.msra.mxu0 %v8526_v27  ;;  %3544 = vmatpush1.bf16.msra.mxu1 %v8527_v55 }
 0x750   :  { %3504 = vmatprep.subr.bf16.mxu0 %v8528_v57  ;;  %3545 = vmatprep.subr.bf16.mxu1 %v8529_v0 }
 0x753   :  { %3505 = vmatpush1.bf16.msra.mxu0 %v8530_v34  ;;  %3546 = vmatpush1.bf16.msra.mxu1 %v8531_v59 }
 0x754   :  { %3506 = vmatprep.subr.bf16.mxu0 %v8532_v49  ;;  %3547 = vmatprep.subr.bf16.mxu1 %v8533_v42 }
 0x757   :  { %3507 = vmatpush1.bf16.msra.mxu0 %v8534_v47  ;;  %3548 = vmatpush1.bf16.msra.mxu1 %v8535_v24 }
 0x758   :  { %3508 = vmatprep.subr.bf16.mxu0 %v8536_v16  ;;  %3549 = vmatprep.subr.bf16.mxu1 %v8537_v40  ;;  %v8558_v16 = vld [vmem:[#allocation39_spill] sm:$0xff] }
 0x75b   :  { %3509 = vmatpush1.bf16.msra.mxu0 %v8538_v38  ;;  %3550 = vmatpush1.bf16.msra.mxu1 %v8539_v8 }
 0x75c   :  { %3510 = vmatprep.subr.bf16.mxu0 %v8540_v26  ;;  %3551 = vmatprep.subr.bf16.mxu1 %v8541_v31  ;;  %v8559_v26 = vld [vmem:[#allocation40_spill] sm:$0xff] }
 0x75f   :  { %3511 = vmatpush1.bf16.msra.mxu0 %v8542_v20  ;;  %3552 = vmatpush1.bf16.msra.mxu1 %v8543_v18 }
 0x760   :  { %3512 = vmatprep.subr.bf16.mxu0 %v8544_v3  ;;  %3553 = vmatprep.subr.bf16.mxu1 %v8545_v14 }
 0x763   :  { %3513 = vmatpush1.bf16.msra.mxu0 %v8546_v52  ;;  %3554 = vmatpush1.bf16.msra.mxu1 %v8547_v36 }
 0x764   :  { %3514 = vmatprep.subr.bf16.mxu0 %v8548_v1  ;;  %3555 = vmatprep.subr.bf16.mxu1 %v8549_v30 }
 0x767   :  { %3515 = vmatpush1.bf16.msra.mxu0 %v8550_v9  ;;  %3556 = vmatpush1.bf16.msra.mxu1 %v8551_v4  ;;  %v8561_v9 = vld [vmem:[#allocation56_spill] sm:$0xff] }
 0x768   :  { %3516 = vmatprep.subr.bf16.mxu0 %v8552_v32  ;;  %3557 = vmatprep.subr.bf16.mxu1 %v8553_v28 }
 0x76b   :  { %3517 = vmatpush1.bf16.msra.mxu0 %v8554_v63  ;;  %3558 = vmatpush1.bf16.msra.mxu1 %v8555_v22 }
 0x76c   :  { %3791 = vmatprep.subr.bf16.mxu0 %v7359_v56  ;;  %3832 = vmatprep.subr.bf16.mxu1 %v7361_v25 }
 0x7e1   :  { %v3017_v44 = vpop.f32.mrb[36].mxu0  ;;  %v3058_v43 = vpop.f32.mrb[68].mxu1 }
 0x7e2   :  { %v3018_v45 = vadd.f32 %v3017_v44, %v2966_v35  ;;  %v3019_v48 = vpop.f32.mrb[37].mxu0  ;;  %v3060_v51 = vpop.f32.mrb[69].mxu1  ;;  %v3059_v29 = vadd.f32 %v3058_v43, %v2974_v21  ;;  %v7388_v21 = vld [vmem:[#allocation7] ss:$16 sps:$4 sm:$0xff]  }
 0x7e3   :  { %v3020_v54 = vadd.f32 %v3019_v48, %v2970_v41  ;;  %v3021_v58 = vpop.f32.mrb[38].mxu0  ;;  %v3062_v62 = vpop.f32.mrb[70].mxu1  ;;  %v3061_v37 = vadd.f32 %v3060_v51, %v2978_v13  ;;  %v7390_v13 = vld [vmem:[#allocation7 + $0x8] ss:$16 sps:$4 sm:$0xff]  }
 0x7e4   :  { %v4995_v11 = vmul.f32 -1.442695, %v3018_v45  ;;  %v3022_v15 = vpop.f32.mrb[39].mxu0  ;;  %v3063_v19 = vpop.f32.mrb[71].mxu1  ;;  %v4997_v53 = vmul.f32 -1.442695, %v3059_v29 }
 0x7e5   :  { %v4996_v23 = vmul.f32 -1.442695, %v3020_v54 }
 0x7e6   :  { %5554 = vpow2.f32 %v4995_v11 }
 0x7e7   :  { %5556 = vpow2.f32 %v4996_v23 }
 0x7e8   :  { %5558 = vtanh.f32 %v3061_v37  ;;  %v7394_v37 = vld [vmem:[#allocation7 + $0x24] ss:$16 sps:$4 sm:$0xff]  }
 0x7e9   :  { %5560 = vpow2.f32 %v4997_v53  ;;  %v7396_v53 = vld [vmem:[#allocation7 + $0x2c] ss:$16 sps:$4 sm:$0xff]  }
 0x7f0   :  { %v5555_v2 = vpop.eup %5554 }
 0x7f1   :  { %v3074_v5 = vadd.f32 1.0, %v5555_v2  ;;  %v5557_v6 = vpop.eup %5556  ;;  %v7404_v2 = vld [vmem:[#allocation7 + $0x28] ss:$16 sps:$4 sm:$0xff]  }
 0x7f2   :  { %v3075_v61 = vadd.f32 1.0, %v5557_v6  ;;  %v5559_v27 = vpop.eup %5558  ;;  %v7410_v6 = vld [vmem:[#allocation7 + $0x4c] ss:$16 sps:$4 sm:$0xff]  }
 0x7f3   :  { %5562 = vrcp.f32 %v3074_v5  ;;  %v5561_v55 = vpop.eup %5560  ;;  %v7408_v5 = vld [vmem:[#allocation7 + $0x44] ss:$16 sps:$4 sm:$0xff]  }
 0x7f4   :  { %5564 = vrcp.f32 %v3075_v61  ;;  %v3076_v59 = vadd.f32 1.0, %v5561_v55  ;;  %v7416_v61 = vld [vmem:[#allocation7 + $0x40] ss:$16 sps:$4 sm:$0xff]   ;;  %v7422_v55 = vld [vmem:[#allocation7 + $0x64] ss:$16 sps:$4 sm:$0xff]  }
 0x7f6   :  { %5566 = vrcp.f32 %v3076_v59  ;;  %v7434_v59 = vld [vmem:[#allocation7 + $0x84] ss:$16 sps:$4 sm:$0xff]  }
 0x7fd   :  { %v5563_v57 = vpop.eup %5562 }
 0x7fe   :  { %v3085_v0 = vmul.f32 %v5563_v57, %v5559_v27  ;;  %v5565_v34 = vpop.eup %5564  ;;  %v7418_v27 = vld [vmem:[#allocation7 + $0x48] ss:$16 sps:$4 sm:$0xff]   ;;  %v7424_v57 = vld [vmem:[#allocation7 + $0x6c] ss:$16 sps:$4 sm:$0xff]  }
 0x7ff   :  { %v3084_v49 = vmul.f32 %v5565_v34, %v7248_v10  ;;  %v8560_v10 = vld [vmem:[#allocation55_spill] sm:$0xff]  ;;  %v7430_v34 = vld [vmem:[#allocation7 + $0x68] ss:$16 sps:$4 sm:$0xff]  }
 0x800   :  { %v5567_v30 = vpop.eup %5566 }
 0x801   :  { %v3322_v42 = vpop.f32.mrb[40].mxu0  ;;  %v3363_v47 = vpop.f32.mrb[72].mxu1  ;;  %v7373_v24 = vadd.f32 %v3085_v0, %v3084_v49  ;;  %v7428_v0 = vld [vmem:[#allocation7 + $0x60] ss:$16 sps:$4 sm:$0xff]   ;;  %v7436_v49 = vld [vmem:[#allocation7 + $0x8c] ss:$16 sps:$4 sm:$0xff]  }
 0x802   :  { %v3370_v40 = vadd.f32 %v3322_v42, %v8558_v16  ;;  %v3324_v38 = vpop.f32.mrb[41].mxu0  ;;  %v3365_v8 = vpop.f32.mrb[73].mxu1  ;;  %v3372_v1 = vadd.f32 %v3363_v47, %v8560_v10  ;;  %v7440_v42 = vld [vmem:[#allocation7 + $0x80] ss:$16 sps:$4 sm:$0xff]   ;;  %v7442_v47 = vld [vmem:[#allocation7 + $0x88] ss:$16 sps:$4 sm:$0xff]  }
 0x803   :  { %v3371_v31 = vadd.f32 %v3324_v38, %v8559_v26  ;;  %v3326_v20 = vpop.f32.mrb[42].mxu0  ;;  %v3367_v18 = vpop.f32.mrb[74].mxu1  ;;  %5568 = vtanh.f32 %v7373_v24  ;;  %v3373_v4 = vadd.f32 %v3365_v8, %v8561_v9  ;;  %v7446_v16 = vld [vmem:[#allocation7 + $0xa4] ss:$16 sps:$4 sm:$0xff]   ;;  %v7452_v38 = vld [vmem:[#allocation7 + $0xa0] ss:$16 sps:$4 sm:$0xff]  }
 0x804   :  { %v5030_v3 = vmul.f32 -1.442695, %v3370_v40  ;;  %v3327_v14 = vpop.f32.mrb[43].mxu0  ;;  %v3368_v52 = vpop.f32.mrb[75].mxu1  ;;  %v5032_v28 = vmul.f32 -1.442695, %v3372_v1 }
 0x805   :  { %v5031_v36 = vmul.f32 -1.442695, %v3371_v31  ;;  %v7448_v40 = vld [vmem:[#allocation7 + $0xac] ss:$16 sps:$4 sm:$0xff]   ;;  %v7454_v8 = vld [vmem:[#allocation7 + $0xa8] ss:$16 sps:$4 sm:$0xff]  }
 0x806   :  { %5570 = vpow2.f32 %v5030_v3  ;;  %v7458_v26 = vld [vmem:[#allocation7 + $0xc4] ss:$16 sps:$4 sm:$0xff]   ;;  %v7460_v31 = vld [vmem:[#allocation7 + $0xcc] ss:$16 sps:$4 sm:$0xff]   ;;  %v7464_v20 = vld [vmem:[#allocation7 + $0xc0] ss:$16 sps:$4 sm:$0xff]  }
 0x807   :  { %5572 = vpow2.f32 %v5031_v36  ;;  %v7466_v18 = vld [vmem:[#allocation7 + $0xc8] ss:$16 sps:$4 sm:$0xff]   ;;  %v7470_v3 = vld [vmem:[#allocation7 + $0xe4] ss:$16 sps:$4 sm:$0xff]   ;;  %v7472_v14 = vld [vmem:[#allocation7 + $0xec] ss:$16 sps:$4 sm:$0xff]  }
 0x808   :  { %5574 = vtanh.f32 %v3373_v4  ;;  %v7476_v52 = vld [vmem:[#allocation7 + $0xe0] ss:$16 sps:$4 sm:$0xff]   ;;  %v7478_v36 = vld [vmem:[#allocation7 + $0xe8] ss:$16 sps:$4 sm:$0xff]  }
 0x809   :  { %5576 = vpow2.f32 %v5032_v28  ;;  %v7486_v10 = vld [vmem:[#allocation4 + $0x8] sm:$0xff]  ;;  %v7488_v1 = vld [vmem:[#allocation4 + $0x18] sm:$0xff]  ;;  %v7494_v9 = vld [vmem:[#allocation4 + $0x10] sm:$0xff] }
 0x80a   :  { %v7498_v4 = vld [vmem:[#allocation4 + $0x28] sm:$0xff]  ;;  %v7504_v28 = vld [vmem:[#allocation4 + $0x20] sm:$0xff] }
 0x80d   :  { %v5569_v32 = vpop.eup %5568 }
 0x80e   :  { %v7380_v63 = vmul.f32 %v5569_v32, %v5567_v30  ;;  %v7492_v30 = vld [vmem:[#allocation4] sm:$0xff]  ;;  %v7500_v32 = vld [vmem:[#allocation4 + $0x38] sm:$0xff] }
 0x810   :  { %8562 = vst [vmem:[#allocation111_spill] sm:$0xff] %v7380_v63  ;;  %v5571_v22 = vpop.eup %5570  ;;  %v3399_v35 = vpack.c.bf16 %v7380_v63, %v7380_v63  ;;  %v7554_v63 = vld [vmem:[#allocation4 + $0xb0] sm:$0xff] }
 0x811   :  { %v3383_v60 = vadd.f32 1.0, %v5571_v22  ;;  %v5573_v41 = vpop.eup %5572  ;;  %v7506_v22 = vld [vmem:[#allocation4 + $0x30] sm:$0xff]  ;;  %8578 = vst [vmem:[#allocation67_spill] sm:$0xff] %v7554_v63 }
 0x812   :  { %v3384_v44 = vadd.f32 1.0, %v5573_v41  ;;  %3518 = vmatprep.mubr.bf16.mxu0 %v3399_v35  ;;  %3559 = vmatprep.mubr.bf16.mxu1 %v3399_v35  ;;  %v5575_v43 = vpop.eup %5574  ;;  %v7512_v35 = vld [vmem:[#allocation4 + $0x58] sm:$0xff]  ;;  %v7516_v41 = vld [vmem:[#allocation4 + $0x40] sm:$0xff] }
 0x813   :  { %5578 = vrcp.f32 %v3383_v60  ;;  %v5577_v45 = vpop.eup %5576  ;;  %v7510_v60 = vld [vmem:[#allocation4 + $0x48] sm:$0xff]  ;;  %8564 = vst [vmem:[#allocation36_spill] sm:$0xff] %v7512_v35  ;;  %8565 = vst [vmem:[#allocation51_spill] sm:$0xff] %v7516_v41 }
 0x814   :  { %5580 = vrcp.f32 %v3384_v44  ;;  %v3385_v58 = vadd.f32 1.0, %v5577_v45  ;;  %8563 = vst [vmem:[#allocation35_spill] sm:$0xff] %v7510_v60  ;;  %v7518_v44 = vld [vmem:[#allocation4 + $0x50] sm:$0xff]  ;;  %v7524_v45 = vld [vmem:[#allocation4 + $0x78] sm:$0xff] }
 0x815   :  { %8566 = vst [vmem:[#allocation52_spill] sm:$0xff] %v7518_v44  ;;  %8568 = vst [vmem:[#allocation38_spill] sm:$0xff] %v7524_v45 }
 0x816   :  { %5582 = vrcp.f32 %v3385_v58  ;;  %v7536_v58 = vld [vmem:[#allocation4 + $0x98] sm:$0xff] }
 0x817   :  { %8572 = vst [vmem:[#allocation50_spill] sm:$0xff] %v7536_v58 }
 0x81d   :  { %v5579_v48 = vpop.eup %5578 }
 0x81e   :  { %v3394_v51 = vmul.f32 %v5579_v48, %v5575_v43  ;;  %v5581_v54 = vpop.eup %5580  ;;  %v7522_v43 = vld [vmem:[#allocation4 + $0x68] sm:$0xff]  ;;  %v7528_v48 = vld [vmem:[#allocation4 + $0x60] sm:$0xff] }
 0x81f   :  { %v3393_v62 = vmul.f32 %v5581_v54, %v7260_v50  ;;  %v7402_v50 = vld [vmem:[#allocation7 + $0x20] ss:$16 sps:$4 sm:$0xff]   ;;  %8567 = vst [vmem:[#allocation37_spill] sm:$0xff] %v7522_v43  ;;  %8569 = vst [vmem:[#allocation53_spill] sm:$0xff] %v7528_v48  ;;  %v7534_v54 = vld [vmem:[#allocation4 + $0x88] sm:$0xff] }
 0x820   :  { %v5583_v15 = vpop.eup %5582  ;;  %8571 = vst [vmem:[#allocation49_spill] sm:$0xff] %v7534_v54 }
 0x821   :  { %v7385_v11 = vadd.f32 %v3394_v51, %v3393_v62  ;;  %v7530_v51 = vld [vmem:[#allocation4 + $0x70] sm:$0xff]  ;;  %v7540_v62 = vld [vmem:[#allocation4 + $0x80] sm:$0xff] }
 0x822   :  { %8570 = vst [vmem:[#allocation54_spill] sm:$0xff] %v7530_v51  ;;  %8573 = vst [vmem:[#allocation62_spill] sm:$0xff] %v7540_v62 }
 0x823   :  { %5584 = vtanh.f32 %v7385_v11 }
 0x82d   :  { %v5585_v19 = vpop.eup %5584 }
 0x82e   :  { %v3397_v23 = vmul.f32 %v5585_v19, %v5583_v15  ;;  %v7542_v15 = vld [vmem:[#allocation4 + $0x90] sm:$0xff]  ;;  %v7546_v19 = vld [vmem:[#allocation4 + $0xa8] sm:$0xff] }
 0x82f   :  { %8574 = vst [vmem:[#allocation63_spill] sm:$0xff] %v7542_v15  ;;  %8575 = vst [vmem:[#allocation64_spill] sm:$0xff] %v7546_v19 }
 0x830   :  { %v7392_v29 = vpack.c.bf16 %v3397_v23, %v3397_v23  ;;  %v7548_v23 = vld [vmem:[#allocation4 + $0xb8] sm:$0xff] }
 0x831   :  { %8576 = vst [vmem:[#allocation65_spill] sm:$0xff] %v7548_v23 }
 0x832   :  { %3519 = vmatmul.mubr.bf16.vlgmr.msra.gmra.mrb[44].mxu0 %v7392_v29  ;;  %3560 = vmatmul.mubr.bf16.vlgmr.msra.gmra.mrb[76].mxu1 %v7392_v29 }
 0x833   :  { %3792 = vmatpush1.bf16.msra.mxu0 %v7388_v21  ;;  %3833 = vmatpush1.bf16.msra.mxu1 %v7390_v13 }
 0x834   :  { %3793 = vmatprep.subr.bf16.mxu0 %v7394_v37  ;;  %3834 = vmatprep.subr.bf16.mxu1 %v7396_v53 }
 0x835   :  { %3823 = vmatprep.mubr.bf16.mxu0 %v8255_v46  ;;  %3864 = vmatprep.mubr.bf16.mxu1 %v8255_v46 }
 0x837   :  { %3794 = vmatpush1.bf16.msra.mxu0 %v7402_v50  ;;  %3835 = vmatpush1.bf16.msra.mxu1 %v7404_v2 }
 0x838   :  { %3795 = vmatprep.subr.bf16.mxu0 %v7408_v5  ;;  %3836 = vmatprep.subr.bf16.mxu1 %v7410_v6 }
 0x83b   :  { %3796 = vmatpush1.bf16.msra.mxu0 %v7416_v61  ;;  %3837 = vmatpush1.bf16.msra.mxu1 %v7418_v27 }
 0x83c   :  { %3797 = vmatprep.subr.bf16.mxu0 %v7422_v55  ;;  %3838 = vmatprep.subr.bf16.mxu1 %v7424_v57 }
 0x83f   :  { %3798 = vmatpush1.bf16.msra.mxu0 %v7428_v0  ;;  %3839 = vmatpush1.bf16.msra.mxu1 %v7430_v34 }
 0x840   :  { %3799 = vmatprep.subr.bf16.mxu0 %v7434_v59  ;;  %3840 = vmatprep.subr.bf16.mxu1 %v7436_v49 }
 0x843   :  { %3800 = vmatpush1.bf16.msra.mxu0 %v7440_v42  ;;  %3841 = vmatpush1.bf16.msra.mxu1 %v7442_v47 }
 0x844   :  { %3801 = vmatprep.subr.bf16.mxu0 %v7446_v16  ;;  %3842 = vmatprep.subr.bf16.mxu1 %v7448_v40 }
 0x847   :  { %3802 = vmatpush1.bf16.msra.mxu0 %v7452_v38  ;;  %3843 = vmatpush1.bf16.msra.mxu1 %v7454_v8 }
 0x848   :  { %3803 = vmatprep.subr.bf16.mxu0 %v7458_v26  ;;  %3844 = vmatprep.subr.bf16.mxu1 %v7460_v31 }
 0x84b   :  { %3804 = vmatpush1.bf16.msra.mxu0 %v7464_v20  ;;  %3845 = vmatpush1.bf16.msra.mxu1 %v7466_v18 }
 0x84c   :  { %3805 = vmatprep.subr.bf16.mxu0 %v7470_v3  ;;  %3846 = vmatprep.subr.bf16.mxu1 %v7472_v14 }
 0x84f   :  { %3806 = vmatpush1.bf16.msra.mxu0 %v7476_v52  ;;  %3847 = vmatpush1.bf16.msra.mxu1 %v7478_v36 }
 0x850   :  { %3989 = vmatprep.subr.bf16.mxu0 %v7486_v10  ;;  %4030 = vmatprep.subr.bf16.mxu1 %v7488_v1 }
 0x852   :  { %3824 = vmatmul.mubr.bf16.vlgmr.msra.gmra.mrb[48].mxu0 %v7392_v29  ;;  %3865 = vmatmul.mubr.bf16.vlgmr.msra.gmra.mrb[80].mxu1 %v7392_v29  ;;  %v7552_v29 = vld [vmem:[#allocation4 + $0xa0] sm:$0xff] }
 0x853   :  { %3990 = vmatpush1.bf16.msra.mxu0 %v7492_v30  ;;  %4031 = vmatpush1.bf16.msra.mxu1 %v7494_v9  ;;  %8577 = vst [vmem:[#allocation66_spill] sm:$0xff] %v7552_v29 }
 0x854   :  { %3991 = vmatprep.subr.bf16.mxu0 %v7498_v4  ;;  %4032 = vmatprep.subr.bf16.mxu1 %v7500_v32 }
 0x857   :  { %3992 = vmatpush1.bf16.msra.mxu0 %v7504_v28  ;;  %4033 = vmatpush1.bf16.msra.mxu1 %v7506_v22 }
 0x858   :  { %3993 = vmatprep.subr.bf16.mxu0 %v7510_v60  ;;  %4034 = vmatprep.subr.bf16.mxu1 %v7512_v35 }
 0x85b   :  { %3994 = vmatpush1.bf16.msra.mxu0 %v7516_v41  ;;  %4035 = vmatpush1.bf16.msra.mxu1 %v7518_v44 }
 0x85c   :  { %3995 = vmatprep.subr.bf16.mxu0 %v7522_v43  ;;  %4036 = vmatprep.subr.bf16.mxu1 %v7524_v45 }
 0x85f   :  { %3996 = vmatpush1.bf16.msra.mxu0 %v7528_v48  ;;  %4037 = vmatpush1.bf16.msra.mxu1 %v7530_v51 }
 0x860   :  { %3997 = vmatprep.subr.bf16.mxu0 %v7534_v54  ;;  %4038 = vmatprep.subr.bf16.mxu1 %v7536_v58  ;;  %v7654_v58 = vld [vmem:[#allocation4 + $0x1d8] sm:$0xff] }
 0x861   :  { %8612 = vst [vmem:[#allocation101_spill] sm:$0xff] %v7654_v58 }
 0x863   :  { %3998 = vmatpush1.bf16.msra.mxu0 %v7540_v62  ;;  %4039 = vmatpush1.bf16.msra.mxu1 %v7542_v15  ;;  %v7560_v62 = vld [vmem:[#allocation4 + $0xd8] sm:$0xff]  ;;  %v7564_v15 = vld [vmem:[#allocation4 + $0xc0] sm:$0xff] }
 0x864   :  { %3999 = vmatprep.subr.bf16.mxu0 %v7546_v19  ;;  %4040 = vmatprep.subr.bf16.mxu1 %v7548_v23  ;;  %8580 = vst [vmem:[#allocation69_spill] sm:$0xff] %v7560_v62  ;;  %8581 = vst [vmem:[#allocation70_spill] sm:$0xff] %v7564_v15  ;;  %v7566_v19 = vld [vmem:[#allocation4 + $0xd0] sm:$0xff]  ;;  %v7570_v23 = vld [vmem:[#allocation4 + $0xe8] sm:$0xff] }
 0x865   :  { %8582 = vst [vmem:[#allocation71_spill] sm:$0xff] %v7566_v19  ;;  %8583 = vst [vmem:[#allocation72_spill] sm:$0xff] %v7570_v23 }
 0x867   :  { %4000 = vmatpush1.bf16.msra.mxu0 %v7552_v29  ;;  %4041 = vmatpush1.bf16.msra.mxu1 %v7554_v63  ;;  %v7572_v29 = vld [vmem:[#allocation4 + $0xf8] sm:$0xff]  ;;  %v7576_v63 = vld [vmem:[#allocation4 + $0xe0] sm:$0xff] }
 0x868   :  { %4001 = vmatprep.subr.bf16.mxu0 %v7558_v17  ;;  %4042 = vmatprep.subr.bf16.mxu1 %v7560_v62  ;;  %8584 = vst [vmem:[#allocation73_spill] sm:$0xff] %v7572_v29  ;;  %8585 = vst [vmem:[#allocation74_spill] sm:$0xff] %v7576_v63  ;;  %v7578_v17 = vld [vmem:[#allocation4 + $0xf0] sm:$0xff]  ;;  %v7582_v62 = vld [vmem:[#allocation4 + $0x108] sm:$0xff] }
 0x869   :  { %8586 = vst [vmem:[#allocation75_spill] sm:$0xff] %v7578_v17  ;;  %8587 = vst [vmem:[#allocation76_spill] sm:$0xff] %v7582_v62 }
 0x86b   :  { %4002 = vmatpush1.bf16.msra.mxu0 %v7564_v15  ;;  %4043 = vmatpush1.bf16.msra.mxu1 %v7566_v19  ;;  %v7584_v15 = vld [vmem:[#allocation4 + $0x118] sm:$0xff]  ;;  %v7588_v19 = vld [vmem:[#allocation4 + $0x100] sm:$0xff] }
 0x86c   :  { %4003 = vmatprep.subr.bf16.mxu0 %v7570_v23  ;;  %4044 = vmatprep.subr.bf16.mxu1 %v7572_v29  ;;  %8588 = vst [vmem:[#allocation77_spill] sm:$0xff] %v7584_v15  ;;  %8589 = vst [vmem:[#allocation78_spill] sm:$0xff] %v7588_v19  ;;  %v7590_v23 = vld [vmem:[#allocation4 + $0x110] sm:$0xff]  ;;  %v7594_v29 = vld [vmem:[#allocation4 + $0x128] sm:$0xff] }
 0x86d   :  { %8590 = vst [vmem:[#allocation79_spill] sm:$0xff] %v7590_v23  ;;  %8591 = vst [vmem:[#allocation80_spill] sm:$0xff] %v7594_v29 }
 0x86f   :  { %4004 = vmatpush1.bf16.msra.mxu0 %v7576_v63  ;;  %4045 = vmatpush1.bf16.msra.mxu1 %v7578_v17  ;;  %v7596_v63 = vld [vmem:[#allocation4 + $0x138] sm:$0xff]  ;;  %v7600_v17 = vld [vmem:[#allocation4 + $0x120] sm:$0xff] }
 0x870   :  { %4005 = vmatprep.subr.bf16.mxu0 %v7582_v62  ;;  %4046 = vmatprep.subr.bf16.mxu1 %v7584_v15  ;;  %8592 = vst [vmem:[#allocation81_spill] sm:$0xff] %v7596_v63  ;;  %8593 = vst [vmem:[#allocation82_spill] sm:$0xff] %v7600_v17  ;;  %v7602_v62 = vld [vmem:[#allocation4 + $0x130] sm:$0xff]  ;;  %v7606_v15 = vld [vmem:[#allocation4 + $0x148] sm:$0xff] }
 0x871   :  { %8594 = vst [vmem:[#allocation83_spill] sm:$0xff] %v7602_v62  ;;  %8595 = vst [vmem:[#allocation84_spill] sm:$0xff] %v7606_v15 }
 0x873   :  { %4006 = vmatpush1.bf16.msra.mxu0 %v7588_v19  ;;  %4047 = vmatpush1.bf16.msra.mxu1 %v7590_v23  ;;  %v7608_v19 = vld [vmem:[#allocation4 + $0x158] sm:$0xff]  ;;  %v7612_v23 = vld [vmem:[#allocation4 + $0x140] sm:$0xff] }
 0x874   :  { %4007 = vmatprep.subr.bf16.mxu0 %v7594_v29  ;;  %4048 = vmatprep.subr.bf16.mxu1 %v7596_v63  ;;  %8596 = vst [vmem:[#allocation85_spill] sm:$0xff] %v7608_v19  ;;  %8597 = vst [vmem:[#allocation86_spill] sm:$0xff] %v7612_v23  ;;  %v7614_v29 = vld [vmem:[#allocation4 + $0x150] sm:$0xff]  ;;  %v7618_v63 = vld [vmem:[#allocation4 + $0x168] sm:$0xff] }
 0x875   :  { %8598 = vst [vmem:[#allocation87_spill] sm:$0xff] %v7614_v29  ;;  %8599 = vst [vmem:[#allocation88_spill] sm:$0xff] %v7618_v63 }
 0x877   :  { %4008 = vmatpush1.bf16.msra.mxu0 %v7600_v17  ;;  %4049 = vmatpush1.bf16.msra.mxu1 %v7602_v62  ;;  %v7620_v17 = vld [vmem:[#allocation4 + $0x178] sm:$0xff]  ;;  %v7624_v62 = vld [vmem:[#allocation4 + $0x160] sm:$0xff] }
 0x878   :  { %4009 = vmatprep.subr.bf16.mxu0 %v7606_v15  ;;  %4050 = vmatprep.subr.bf16.mxu1 %v7608_v19  ;;  %8600 = vst [vmem:[#allocation89_spill] sm:$0xff] %v7620_v17  ;;  %8601 = vst [vmem:[#allocation90_spill] sm:$0xff] %v7624_v62  ;;  %v7626_v15 = vld [vmem:[#allocation4 + $0x170] sm:$0xff]  ;;  %v7630_v19 = vld [vmem:[#allocation4 + $0x188] sm:$0xff] }
 0x879   :  { %8602 = vst [vmem:[#allocation91_spill] sm:$0xff] %v7626_v15  ;;  %8603 = vst [vmem:[#allocation92_spill] sm:$0xff] %v7630_v19 }
 0x87b   :  { %4010 = vmatpush1.bf16.msra.mxu0 %v7612_v23  ;;  %4051 = vmatpush1.bf16.msra.mxu1 %v7614_v29  ;;  %v7632_v23 = vld [vmem:[#allocation4 + $0x198] sm:$0xff]  ;;  %v7636_v29 = vld [vmem:[#allocation4 + $0x180] sm:$0xff] }
 0x87c   :  { %4011 = vmatprep.subr.bf16.mxu0 %v7618_v63  ;;  %4052 = vmatprep.subr.bf16.mxu1 %v7620_v17  ;;  %8604 = vst [vmem:[#allocation93_spill] sm:$0xff] %v7632_v23  ;;  %8605 = vst [vmem:[#allocation94_spill] sm:$0xff] %v7636_v29  ;;  %v7638_v63 = vld [vmem:[#allocation4 + $0x190] sm:$0xff]  ;;  %v7642_v17 = vld [vmem:[#allocation4 + $0x1a8] sm:$0xff] }
 0x87d   :  { %8606 = vst [vmem:[#allocation95_spill] sm:$0xff] %v7638_v63  ;;  %8607 = vst [vmem:[#allocation96_spill] sm:$0xff] %v7642_v17 }
 0x87f   :  { %4012 = vmatpush1.bf16.msra.mxu0 %v7624_v62  ;;  %4053 = vmatpush1.bf16.msra.mxu1 %v7626_v15  ;;  %v7644_v62 = vld [vmem:[#allocation4 + $0x1b8] sm:$0xff]  ;;  %v7646_v15 = vld [vmem:[#allocation4 + $0x1a0] sm:$0xff] }
 0x880   :  { %4013 = vmatprep.subr.bf16.mxu0 %v7630_v19  ;;  %4054 = vmatprep.subr.bf16.mxu1 %v7632_v23  ;;  %8608 = vst [vmem:[#allocation97_spill] sm:$0xff] %v7644_v62  ;;  %8609 = vst [vmem:[#allocation98_spill] sm:$0xff] %v7646_v15  ;;  %v7650_v19 = vld [vmem:[#allocation4 + $0x1b0] sm:$0xff]  ;;  %v7652_v23 = vld [vmem:[#allocation4 + $0x1c8] sm:$0xff] }
 0x881   :  { %8610 = vst [vmem:[#allocation99_spill] sm:$0xff] %v7650_v19  ;;  %8611 = vst [vmem:[#allocation100_spill] sm:$0xff] %v7652_v23 }
 0x883   :  { %4014 = vmatpush1.bf16.msra.mxu0 %v7636_v29  ;;  %4055 = vmatpush1.bf16.msra.mxu1 %v7638_v63  ;;  %v7660_v63 = vld [vmem:[#allocation4 + $0x1c0] sm:$0xff]  ;;  %v7662_v29 = vld [vmem:[#allocation4 + $0x1d0] sm:$0xff] }
 0x884   :  { %4015 = vmatprep.subr.bf16.mxu0 %v7642_v17  ;;  %4056 = vmatprep.subr.bf16.mxu1 %v7644_v62  ;;  %8613 = vst [vmem:[#allocation102_spill] sm:$0xff] %v7660_v63  ;;  %8614 = vst [vmem:[#allocation103_spill] sm:$0xff] %v7662_v29  ;;  %v7664_v17 = vld [vmem:[#allocation4 + $0x1e8] sm:$0xff]  ;;  %v7666_v62 = vld [vmem:[#allocation4 + $0x1f8] sm:$0xff] }
 0x885   :  { %8615 = vst [vmem:[#allocation104_spill] sm:$0xff] %v7664_v17  ;;  %8616 = vst [vmem:[#allocation105_spill] sm:$0xff] %v7666_v62 }
 0x887   :  { %4016 = vmatpush1.bf16.msra.mxu0 %v7646_v15  ;;  %4057 = vmatpush1.bf16.msra.mxu1 %v7650_v19  ;;  %v7672_v19 = vld [vmem:[#allocation4 + $0x1e0] sm:$0xff] }
 0x888   :  { %4017 = vmatprep.subr.bf16.mxu0 %v7652_v23  ;;  %4058 = vmatprep.subr.bf16.mxu1 %v7654_v58  ;;  %8617 = vst [vmem:[#allocation106_spill] sm:$0xff] %v7672_v19  ;;  %v7674_v23 = vld [vmem:[#allocation4 + $0x1f0] sm:$0xff] }
 0x889   :  { %8618 = vst [vmem:[#allocation107_spill] sm:$0xff] %v7674_v23 }
 0x88b   :  { %4018 = vmatpush1.bf16.msra.mxu0 %v7660_v63  ;;  %4059 = vmatpush1.bf16.msra.mxu1 %v7662_v29  ;;  %v3464_v29 = vld [vmem:[%s7911_s6] sm:$0xf] }
 0x88c   :  { %4019 = vmatprep.subr.bf16.mxu0 %v7664_v17  ;;  %4060 = vmatprep.subr.bf16.mxu1 %v7666_v62  ;;  %v3469_v17 = vrot.slane %v3464_v29, %v8556_v33  ;;  %v3473_v62 = vrot.slane %v3464_v29, %v8557_v39  ;;  %v3477_v44 = vrot.slane %v3464_v29, %v8308_v7 }
 0x88d   :  { %v3481_v33 = vrot.slane %v3464_v29, %v8309_v12 }
 0x88f   :  { %4020 = vmatpush1.bf16.msra.mxu0 %v7672_v19  ;;  %4061 = vmatpush1.bf16.msra.mxu1 %v7674_v23 }
 0x890   :  { %4294 = vmatprep.subr.bf16.mxu0 %v7359_v56  ;;  %4335 = vmatprep.subr.bf16.mxu1 %v7361_v25 }
 0x905   :  { %v3520_v63 = vpop.f32.mrb[44].mxu0  ;;  %v3561_v58 = vpop.f32.mrb[76].mxu1 }
 0x906   :  { %v3521_v15 = vadd.f32 %v3520_v63, %v3469_v17  ;;  %v3522_v54 = vpop.f32.mrb[45].mxu0  ;;  %v3563_v51 = vpop.f32.mrb[77].mxu1  ;;  %v3562_v41 = vadd.f32 %v3561_v58, %v3477_v44 }
 0x907   :  { %v3523_v19 = vadd.f32 %v3522_v54, %v3473_v62  ;;  %v3524_v48 = vpop.f32.mrb[46].mxu0  ;;  %v3565_v23 = vpop.f32.mrb[78].mxu1  ;;  %v3564_v39 = vadd.f32 %v3563_v51, %v3481_v33 }
 0x908   :  { %v5033_v45 = vmul.f32 -1.442695, %v3521_v15  ;;  %v3525_v56 = vpop.f32.mrb[47].mxu0  ;;  %v3566_v43 = vpop.f32.mrb[79].mxu1  ;;  %v5035_v35 = vmul.f32 -1.442695, %v3562_v41 }
 0x909   :  { %v5034_v25 = vmul.f32 -1.442695, %v3523_v19  ;;  %v8619_v41 = vld [vmem:[#allocation41_spill] sm:$0xff] }
 0x90a   :  { %5586 = vpow2.f32 %v5033_v45 }
 0x90b   :  { %5588 = vpow2.f32 %v5034_v25 }
 0x90c   :  { %5590 = vtanh.f32 %v3564_v39 }
 0x90d   :  { %5592 = vpow2.f32 %v5035_v35  ;;  %v8620_v35 = vld [vmem:[#allocation43_spill] sm:$0xff] }
 0x914   :  { %v5587_v60 = vpop.eup %5586 }
 0x915   :  { %v3577_v17 = vadd.f32 1.0, %v5587_v60  ;;  %v5589_v63 = vpop.eup %5588 }
 0x916   :  { %v3578_v48 = vadd.f32 1.0, %v5589_v63  ;;  %v5591_v54 = vpop.eup %5590 }
 0x917   :  { %5594 = vrcp.f32 %v3577_v17  ;;  %v5593_v43 = vpop.eup %5592 }
 0x918   :  { %5596 = vrcp.f32 %v3578_v48  ;;  %v3579_v19 = vadd.f32 1.0, %v5593_v43 }
 0x91a   :  { %5598 = vrcp.f32 %v3579_v19 }
 0x921   :  { %v5595_v62 = vpop.eup %5594 }
 0x922   :  { %v3588_v45 = vmul.f32 %v5595_v62, %v5591_v54  ;;  %v5597_v15 = vpop.eup %5596 }
 0x923   :  { %v3587_v23 = vmul.f32 %v5597_v15, %v7373_v24  ;;  %v8621_v24 = vld [vmem:[#allocation57_spill] sm:$0xff] }
 0x924   :  { %v5599_v62 = vpop.eup %5598 }
 0x925   :  { %v3825_v29 = vpop.f32.mrb[48].mxu0  ;;  %v3866_v44 = vpop.f32.mrb[80].mxu1  ;;  %v7688_v33 = vadd.f32 %v3588_v45, %v3587_v23  ;;  %v8622_v45 = vld [vmem:[#allocation58_spill] sm:$0xff] }
 0x926   :  { %v3873_v60 = vadd.f32 %v3825_v29, %v8619_v41  ;;  %v3827_v39 = vpop.f32.mrb[49].mxu0  ;;  %v3868_v51 = vpop.f32.mrb[81].mxu1  ;;  %v3875_v43 = vadd.f32 %v3866_v44, %v8621_v24 }
 0x927   :  { %v3874_v58 = vadd.f32 %v3827_v39, %v8620_v35  ;;  %v3829_v56 = vpop.f32.mrb[50].mxu0  ;;  %v3870_v25 = vpop.f32.mrb[82].mxu1  ;;  %5600 = vtanh.f32 %v7688_v33  ;;  %v3876_v15 = vadd.f32 %v3868_v51, %v8622_v45 }
 0x928   :  { %v5068_v17 = vmul.f32 -1.442695, %v3873_v60  ;;  %v3830_v63 = vpop.f32.mrb[51].mxu0  ;;  %v3871_v48 = vpop.f32.mrb[83].mxu1  ;;  %v5070_v29 = vmul.f32 -1.442695, %v3875_v43 }
 0x929   :  { %v5069_v54 = vmul.f32 -1.442695, %v3874_v58 }
 0x92a   :  { %5602 = vpow2.f32 %v5068_v17 }
 0x92b   :  { %5604 = vpow2.f32 %v5069_v54 }
 0x92c   :  { %5606 = vtanh.f32 %v3876_v15  ;;  %v8663_v15 = vld [vmem:[#allocation92_spill] sm:$0xff] }
 0x92d   :  { %5608 = vpow2.f32 %v5070_v29  ;;  %v8665_v29 = vld [vmem:[#allocation94_spill] sm:$0xff] }
 0x931   :  { %v5601_v23 = vpop.eup %5600 }
 0x932   :  { %v7695_v19 = vmul.f32 %v5601_v23, %v5599_v62  ;;  %v8664_v23 = vld [vmem:[#allocation93_spill] sm:$0xff] }
 0x934   :  { %v5603_v41 = vpop.eup %5602  ;;  %v3902_v60 = vpack.c.bf16 %v7695_v19, %v7695_v19 }
 0x935   :  { %v3886_v39 = vadd.f32 1.0, %v5603_v41  ;;  %v5605_v35 = vpop.eup %5604  ;;  %v8666_v41 = vld [vmem:[#allocation95_spill] sm:$0xff] }
 0x936   :  { %v3887_v58 = vadd.f32 1.0, %v5605_v35  ;;  %4021 = vmatprep.mubr.bf16.mxu0 %v3902_v60  ;;  %4062 = vmatprep.mubr.bf16.mxu1 %v3902_v60  ;;  %v5607_v44 = vpop.eup %5606  ;;  %v8668_v60 = vld [vmem:[#allocation97_spill] sm:$0xff]  ;;  %v8669_v35 = vld [vmem:[#allocation98_spill] sm:$0xff] }
 0x937   :  { %5610 = vrcp.f32 %v3886_v39  ;;  %v5609_v56 = vpop.eup %5608  ;;  %v8667_v39 = vld [vmem:[#allocation96_spill] sm:$0xff] }
 0x938   :  { %5612 = vrcp.f32 %v3887_v58  ;;  %v3888_v63 = vadd.f32 1.0, %v5609_v56  ;;  %v8670_v58 = vld [vmem:[#allocation99_spill] sm:$0xff]  ;;  %v8672_v56 = vld [vmem:[#allocation101_spill] sm:$0xff] }
 0x93a   :  { %5614 = vrcp.f32 %v3888_v63  ;;  %v8676_v63 = vld [vmem:[#allocation105_spill] sm:$0xff] }
 0x941   :  { %v5611_v51 = vpop.eup %5610 }
 0x942   :  { %v3897_v25 = vmul.f32 %v5611_v51, %v5607_v44  ;;  %v5613_v17 = vpop.eup %5612  ;;  %v8671_v44 = vld [vmem:[#allocation100_spill] sm:$0xff]  ;;  %v8673_v51 = vld [vmem:[#allocation102_spill] sm:$0xff] }
 0x943   :  { %v3896_v48 = vmul.f32 %v5613_v17, %v7385_v11  ;;  %v8624_v11 = vld [vmem:[#allocation36_spill] sm:$0xff] }
 0x944   :  { %v5615_v24 = vpop.eup %5614  ;;  %v8675_v17 = vld [vmem:[#allocation104_spill] sm:$0xff] }
 0x945   :  { %v7700_v54 = vadd.f32 %v3897_v25, %v3896_v48  ;;  %v8674_v25 = vld [vmem:[#allocation103_spill] sm:$0xff]  ;;  %v8677_v48 = vld [vmem:[#allocation106_spill] sm:$0xff] }
 0x947   :  { %5616 = vtanh.f32 %v7700_v54 }
 0x951   :  { %v5617_v43 = vpop.eup %5616 }
 0x952   :  { %v3900_v62 = vmul.f32 %v5617_v43, %v5615_v24  ;;  %v8678_v24 = vld [vmem:[#allocation107_spill] sm:$0xff]  ;;  %v3967_v43 = vld [vmem:[%s7911_s6] sm:$0xf] }
 0x954   :  { %v3901_v45 = vpack.c.bf16 %v3900_v62, %v3900_v62  ;;  %v8679_v62 = vld [vmem:[#allocation29_spill] sm:$0xff] }
 0x956   :  { %4022 = vmatmul.mubr.bf16.vlgmr.msra.gmra.mrb[52].mxu0 %v3901_v45  ;;  %4063 = vmatmul.mubr.bf16.vlgmr.msra.gmra.mrb[84].mxu1 %v3901_v45 }
 0x957   :  { %4295 = vmatpush1.bf16.msra.mxu0 %v7388_v21  ;;  %4336 = vmatpush1.bf16.msra.mxu1 %v7390_v13  ;;  %v8625_v21 = vld [vmem:[#allocation51_spill] sm:$0xff]  ;;  %v8626_v13 = vld [vmem:[#allocation52_spill] sm:$0xff] }
 0x958   :  { %4296 = vmatprep.subr.bf16.mxu0 %v7394_v37  ;;  %4337 = vmatprep.subr.bf16.mxu1 %v7396_v53  ;;  %v8627_v37 = vld [vmem:[#allocation37_spill] sm:$0xff]  ;;  %v8628_v53 = vld [vmem:[#allocation38_spill] sm:$0xff] }
 0x959   :  { %4326 = vmatprep.mubr.bf16.mxu0 %v8255_v46  ;;  %4367 = vmatprep.mubr.bf16.mxu1 %v8255_v46  ;;  %v8623_v46 = vld [vmem:[#allocation35_spill] sm:$0xff] }
 0x95b   :  { %4297 = vmatpush1.bf16.msra.mxu0 %v7402_v50  ;;  %4338 = vmatpush1.bf16.msra.mxu1 %v7404_v2  ;;  %v8629_v50 = vld [vmem:[#allocation53_spill] sm:$0xff]  ;;  %v8630_v2 = vld [vmem:[#allocation54_spill] sm:$0xff] }
 0x95c   :  { %4298 = vmatprep.subr.bf16.mxu0 %v7408_v5  ;;  %4339 = vmatprep.subr.bf16.mxu1 %v7410_v6  ;;  %v8631_v5 = vld [vmem:[#allocation49_spill] sm:$0xff]  ;;  %v8632_v6 = vld [vmem:[#allocation50_spill] sm:$0xff] }
 0x95f   :  { %4299 = vmatpush1.bf16.msra.mxu0 %v7416_v61  ;;  %4340 = vmatpush1.bf16.msra.mxu1 %v7418_v27  ;;  %v8633_v61 = vld [vmem:[#allocation62_spill] sm:$0xff]  ;;  %v8634_v27 = vld [vmem:[#allocation63_spill] sm:$0xff] }
 0x960   :  { %4300 = vmatprep.subr.bf16.mxu0 %v7422_v55  ;;  %4341 = vmatprep.subr.bf16.mxu1 %v7424_v57  ;;  %v8635_v55 = vld [vmem:[#allocation64_spill] sm:$0xff]  ;;  %v8636_v57 = vld [vmem:[#allocation65_spill] sm:$0xff] }
 0x963   :  { %4301 = vmatpush1.bf16.msra.mxu0 %v7428_v0  ;;  %4342 = vmatpush1.bf16.msra.mxu1 %v7430_v34  ;;  %v8637_v0 = vld [vmem:[#allocation66_spill] sm:$0xff]  ;;  %v8638_v34 = vld [vmem:[#allocation67_spill] sm:$0xff] }
 0x964   :  { %4302 = vmatprep.subr.bf16.mxu0 %v7434_v59  ;;  %4343 = vmatprep.subr.bf16.mxu1 %v7436_v49  ;;  %v8639_v59 = vld [vmem:[#allocation68_spill] sm:$0xff]  ;;  %v8640_v49 = vld [vmem:[#allocation69_spill] sm:$0xff] }
 0x967   :  { %4303 = vmatpush1.bf16.msra.mxu0 %v7440_v42  ;;  %4344 = vmatpush1.bf16.msra.mxu1 %v7442_v47  ;;  %v8641_v42 = vld [vmem:[#allocation70_spill] sm:$0xff]  ;;  %v8642_v47 = vld [vmem:[#allocation71_spill] sm:$0xff] }
 0x968   :  { %4304 = vmatprep.subr.bf16.mxu0 %v7446_v16  ;;  %4345 = vmatprep.subr.bf16.mxu1 %v7448_v40  ;;  %v8643_v16 = vld [vmem:[#allocation72_spill] sm:$0xff]  ;;  %v8644_v40 = vld [vmem:[#allocation73_spill] sm:$0xff] }
 0x96b   :  { %4305 = vmatpush1.bf16.msra.mxu0 %v7452_v38  ;;  %4346 = vmatpush1.bf16.msra.mxu1 %v7454_v8  ;;  %v8645_v38 = vld [vmem:[#allocation74_spill] sm:$0xff]  ;;  %v8646_v8 = vld [vmem:[#allocation75_spill] sm:$0xff] }
 0x96c   :  { %4306 = vmatprep.subr.bf16.mxu0 %v7458_v26  ;;  %4347 = vmatprep.subr.bf16.mxu1 %v7460_v31  ;;  %v8647_v26 = vld [vmem:[#allocation76_spill] sm:$0xff]  ;;  %v8648_v31 = vld [vmem:[#allocation77_spill] sm:$0xff] }
 0x96f   :  { %4307 = vmatpush1.bf16.msra.mxu0 %v7464_v20  ;;  %4348 = vmatpush1.bf16.msra.mxu1 %v7466_v18  ;;  %v8649_v20 = vld [vmem:[#allocation78_spill] sm:$0xff]  ;;  %v8650_v18 = vld [vmem:[#allocation79_spill] sm:$0xff] }
 0x970   :  { %4308 = vmatprep.subr.bf16.mxu0 %v7470_v3  ;;  %4349 = vmatprep.subr.bf16.mxu1 %v7472_v14  ;;  %v8651_v3 = vld [vmem:[#allocation80_spill] sm:$0xff]  ;;  %v8652_v14 = vld [vmem:[#allocation81_spill] sm:$0xff] }
 0x973   :  { %4309 = vmatpush1.bf16.msra.mxu0 %v7476_v52  ;;  %4350 = vmatpush1.bf16.msra.mxu1 %v7478_v36  ;;  %v8653_v52 = vld [vmem:[#allocation82_spill] sm:$0xff]  ;;  %v8654_v36 = vld [vmem:[#allocation83_spill] sm:$0xff] }
 0x974   :  { %4492 = vmatprep.subr.bf16.mxu0 %v7486_v10  ;;  %4533 = vmatprep.subr.bf16.mxu1 %v7488_v1  ;;  %v8655_v10 = vld [vmem:[#allocation84_spill] sm:$0xff]  ;;  %v8656_v1 = vld [vmem:[#allocation85_spill] sm:$0xff] }
 0x976   :  { %4327 = vmatmul.mubr.bf16.vlgmr.msra.gmra.mrb[56].mxu0 %v3901_v45  ;;  %4368 = vmatmul.mubr.bf16.vlgmr.msra.gmra.mrb[88].mxu1 %v3901_v45  ;;  %v3972_v45 = vrot.slane %v3967_v43, %v8679_v62 }
 0x977   :  { %4493 = vmatpush1.bf16.msra.mxu0 %v7492_v30  ;;  %4534 = vmatpush1.bf16.msra.mxu1 %v7494_v9  ;;  %v8657_v30 = vld [vmem:[#allocation86_spill] sm:$0xff]  ;;  %v8658_v9 = vld [vmem:[#allocation87_spill] sm:$0xff] }
 0x978   :  { %4494 = vmatprep.subr.bf16.mxu0 %v7498_v4  ;;  %4535 = vmatprep.subr.bf16.mxu1 %v7500_v32  ;;  %v8659_v4 = vld [vmem:[#allocation88_spill] sm:$0xff]  ;;  %v8660_v32 = vld [vmem:[#allocation89_spill] sm:$0xff] }
 0x97b   :  { %4495 = vmatpush1.bf16.msra.mxu0 %v7504_v28  ;;  %4536 = vmatpush1.bf16.msra.mxu1 %v7506_v22  ;;  %v8661_v28 = vld [vmem:[#allocation90_spill] sm:$0xff]  ;;  %v8662_v22 = vld [vmem:[#allocation91_spill] sm:$0xff] }
 0x97c   :  { %4496 = vmatprep.subr.bf16.mxu0 %v8623_v46  ;;  %4537 = vmatprep.subr.bf16.mxu1 %v8624_v11  ;;  %v8680_v46 = vld [vmem:[#allocation30_spill] sm:$0xff] }
 0x97d   :  { %v3976_v11 = vrot.slane %v3967_v43, %v8680_v46 }
 0x97f   :  { %4497 = vmatpush1.bf16.msra.mxu0 %v8625_v21  ;;  %4538 = vmatpush1.bf16.msra.mxu1 %v8626_v13 }
 0x980   :  { %4498 = vmatprep.subr.bf16.mxu0 %v8627_v37  ;;  %4539 = vmatprep.subr.bf16.mxu1 %v8628_v53 }
 0x983   :  { %4499 = vmatpush1.bf16.msra.mxu0 %v8629_v50  ;;  %4540 = vmatpush1.bf16.msra.mxu1 %v8630_v2 }
 0x984   :  { %4500 = vmatprep.subr.bf16.mxu0 %v8631_v5  ;;  %4541 = vmatprep.subr.bf16.mxu1 %v8632_v6 }
 0x987   :  { %4501 = vmatpush1.bf16.msra.mxu0 %v8633_v61  ;;  %4542 = vmatpush1.bf16.msra.mxu1 %v8634_v27 }
 0x988   :  { %4502 = vmatprep.subr.bf16.mxu0 %v8635_v55  ;;  %4543 = vmatprep.subr.bf16.mxu1 %v8636_v57 }
 0x98b   :  { %4503 = vmatpush1.bf16.msra.mxu0 %v8637_v0  ;;  %4544 = vmatpush1.bf16.msra.mxu1 %v8638_v34  ;;  %v3980_v0 = vrot.slane %v3967_v43, %v8308_v7  ;;  %v3984_v34 = vrot.slane %v3967_v43, %v8309_v12 }
 0x98c   :  { %4504 = vmatprep.subr.bf16.mxu0 %v8639_v59  ;;  %4545 = vmatprep.subr.bf16.mxu1 %v8640_v49 }
 0x98f   :  { %4505 = vmatpush1.bf16.msra.mxu0 %v8641_v42  ;;  %4546 = vmatpush1.bf16.msra.mxu1 %v8642_v47 }
 0x990   :  { %4506 = vmatprep.subr.bf16.mxu0 %v8643_v16  ;;  %4547 = vmatprep.subr.bf16.mxu1 %v8644_v40 }
 0x993   :  { %4507 = vmatpush1.bf16.msra.mxu0 %v8645_v38  ;;  %4548 = vmatpush1.bf16.msra.mxu1 %v8646_v8 }
 0x994   :  { %4508 = vmatprep.subr.bf16.mxu0 %v8647_v26  ;;  %4549 = vmatprep.subr.bf16.mxu1 %v8648_v31 }
 0x997   :  { %4509 = vmatpush1.bf16.msra.mxu0 %v8649_v20  ;;  %4550 = vmatpush1.bf16.msra.mxu1 %v8650_v18 }
 0x998   :  { %4510 = vmatprep.subr.bf16.mxu0 %v8651_v3  ;;  %4551 = vmatprep.subr.bf16.mxu1 %v8652_v14 }
 0x99b   :  { %4511 = vmatpush1.bf16.msra.mxu0 %v8653_v52  ;;  %4552 = vmatpush1.bf16.msra.mxu1 %v8654_v36 }
 0x99c   :  { %4512 = vmatprep.subr.bf16.mxu0 %v8655_v10  ;;  %4553 = vmatprep.subr.bf16.mxu1 %v8656_v1  ;;  %v8681_v1 = vld [vmem:[#allocation45_spill] sm:$0xff] }
 0x99f   :  { %4513 = vmatpush1.bf16.msra.mxu0 %v8657_v30  ;;  %4554 = vmatpush1.bf16.msra.mxu1 %v8658_v9 }
 0x9a0   :  { %4514 = vmatprep.subr.bf16.mxu0 %v8659_v4  ;;  %4555 = vmatprep.subr.bf16.mxu1 %v8660_v32  ;;  %v8682_v32 = vld [vmem:[#allocation46_spill] sm:$0xff] }
 0x9a3   :  { %4515 = vmatpush1.bf16.msra.mxu0 %v8661_v28  ;;  %4556 = vmatpush1.bf16.msra.mxu1 %v8662_v22 }
 0x9a4   :  { %4516 = vmatprep.subr.bf16.mxu0 %v8663_v15  ;;  %4557 = vmatprep.subr.bf16.mxu1 %v8664_v23 }
 0x9a7   :  { %4517 = vmatpush1.bf16.msra.mxu0 %v8665_v29  ;;  %4558 = vmatpush1.bf16.msra.mxu1 %v8666_v41 }
 0x9a8   :  { %4518 = vmatprep.subr.bf16.mxu0 %v8667_v39  ;;  %4559 = vmatprep.subr.bf16.mxu1 %v8668_v60 }
 0x9ab   :  { %4519 = vmatpush1.bf16.msra.mxu0 %v8669_v35  ;;  %4560 = vmatpush1.bf16.msra.mxu1 %v8670_v58  ;;  %v8684_v58 = vld [vmem:[#allocation60_spill] sm:$0xff] }
 0x9ac   :  { %4520 = vmatprep.subr.bf16.mxu0 %v8671_v44  ;;  %4561 = vmatprep.subr.bf16.mxu1 %v8672_v56 }
 0x9af   :  { %4521 = vmatpush1.bf16.msra.mxu0 %v8673_v51  ;;  %4562 = vmatpush1.bf16.msra.mxu1 %v8674_v25 }
 0x9b0   :  { %4522 = vmatprep.subr.bf16.mxu0 %v8675_v17  ;;  %4563 = vmatprep.subr.bf16.mxu1 %v8676_v63 }
 0x9b3   :  { %4523 = vmatpush1.bf16.msra.mxu0 %v8677_v48  ;;  %4564 = vmatpush1.bf16.msra.mxu1 %v8678_v24 }
 0xa29   :  { %v4023_v21 = vpop.f32.mrb[52].mxu0  ;;  %v4064_v13 = vpop.f32.mrb[84].mxu1 }
 0xa2a   :  { %v4024_v37 = vadd.f32 %v4023_v21, %v3972_v45  ;;  %v4025_v53 = vpop.f32.mrb[53].mxu0  ;;  %v4066_v50 = vpop.f32.mrb[85].mxu1  ;;  %v4065_v59 = vadd.f32 %v4064_v13, %v3980_v0 }
 0xa2b   :  { %v4026_v2 = vadd.f32 %v4025_v53, %v3976_v11  ;;  %v4027_v5 = vpop.f32.mrb[54].mxu0  ;;  %v4068_v6 = vpop.f32.mrb[86].mxu1  ;;  %v4067_v49 = vadd.f32 %v4066_v50, %v3984_v34 }
 0xa2c   :  { %v5071_v61 = vmul.f32 -1.442695, %v4024_v37  ;;  %v4028_v27 = vpop.f32.mrb[55].mxu0  ;;  %v4069_v55 = vpop.f32.mrb[87].mxu1  ;;  %v5073_v42 = vmul.f32 -1.442695, %v4065_v59 }
 0xa2d   :  { %v5072_v57 = vmul.f32 -1.442695, %v4026_v2  ;;  %v4470_v55 = vld [vmem:[%s7911_s6] sm:$0xf] }
 0xa2e   :  { %5618 = vpow2.f32 %v5071_v61  ;;  %v4479_v0 = vrot.slane %v4470_v55, %v8680_v46 }
 0xa2f   :  { %5620 = vpow2.f32 %v5072_v57  ;;  %v4475_v57 = vrot.slane %v4470_v55, %v8679_v62  ;;  %v4487_v62 = vrot.slane %v4470_v55, %v8309_v12 }
 0xa30   :  { %5622 = vtanh.f32 %v4067_v49 }
 0xa31   :  { %5624 = vpow2.f32 %v5073_v42 }
 0xa38   :  { %v5619_v47 = vpop.eup %5618 }
 0xa39   :  { %v4080_v16 = vadd.f32 1.0, %v5619_v47  ;;  %v5621_v40 = vpop.eup %5620 }
 0xa3a   :  { %v4081_v38 = vadd.f32 1.0, %v5621_v40  ;;  %v5623_v8 = vpop.eup %5622 }
 0xa3b   :  { %5626 = vrcp.f32 %v4080_v16  ;;  %v5625_v26 = vpop.eup %5624 }
 0xa3c   :  { %5628 = vrcp.f32 %v4081_v38  ;;  %v4082_v3 = vadd.f32 1.0, %v5625_v26 }
 0xa3e   :  { %5630 = vrcp.f32 %v4082_v3 }
 0xa45   :  { %v5627_v31 = vpop.eup %5626 }
 0xa46   :  { %v4091_v20 = vmul.f32 %v5627_v31, %v5623_v8  ;;  %v5629_v18 = vpop.eup %5628 }
 0xa47   :  { %v4090_v14 = vmul.f32 %v5629_v18, %v7688_v33  ;;  %v8683_v33 = vld [vmem:[#allocation59_spill] sm:$0xff] }
 0xa48   :  { %v5631_v35 = vpop.eup %5630 }
 0xa49   :  { %v4328_v52 = vpop.f32.mrb[56].mxu0  ;;  %v4369_v36 = vpop.f32.mrb[88].mxu1  ;;  %v7807_v10 = vadd.f32 %v4091_v20, %v4090_v14  ;;  %v4483_v20 = vrot.slane %v4470_v55, %v8308_v7 }
 0xa4a   :  { %v4376_v30 = vadd.f32 %v4328_v52, %v8681_v1  ;;  %v4330_v9 = vpop.f32.mrb[57].mxu0  ;;  %v4371_v4 = vpop.f32.mrb[89].mxu1  ;;  %v4378_v60 = vadd.f32 %v4369_v36, %v8683_v33  ;;  %v8687_v33 = vld [vmem:[#allocation33_spill] sm:$0xff] }
 0xa4b   :  { %v4377_v28 = vadd.f32 %v4330_v9, %v8682_v32  ;;  %v4332_v22 = vpop.f32.mrb[58].mxu0  ;;  %v4373_v15 = vpop.f32.mrb[90].mxu1  ;;  %5632 = vtanh.f32 %v7807_v10  ;;  %v4379_v44 = vadd.f32 %v4371_v4, %v8684_v58 }
 0xa4c   :  { %v5106_v23 = vmul.f32 -1.442695, %v4376_v30  ;;  %v4333_v29 = vpop.f32.mrb[59].mxu0  ;;  %v4374_v41 = vpop.f32.mrb[91].mxu1  ;;  %v5108_v51 = vmul.f32 -1.442695, %v4378_v60 }
 0xa4d   :  { %v5107_v39 = vmul.f32 -1.442695, %v4377_v28  ;;  %v8685_v41 = vld [vmem:[#allocation21_spill] sm:$0xff] }
 0xa4e   :  { %5634 = vpow2.f32 %v5106_v23  ;;  %5127 = vmatprep.subr.bf16.mxu0 %v8685_v41 }
 0xa4f   :  { %5636 = vpow2.f32 %v5107_v39  ;;  %v8686_v39 = vld [vmem:[#allocation61_spill] sm:$0xff] }
 0xa50   :  { %5638 = vtanh.f32 %v4379_v44  ;;  %v4618_v60 = vpack.c.bf16 %v8687_v33, %v8686_v39 }
 0xa51   :  { %5640 = vpow2.f32 %v5108_v51 }
 0xa55   :  { %v5633_v56 = vpop.eup %5632 }
 0xa56   :  { %v7814_v25 = vmul.f32 %v5633_v56, %v5631_v35 }
 0xa58   :  { %v5635_v17 = vpop.eup %5634  ;;  %v4405_v48 = vpack.c.bf16 %v7814_v25, %v7814_v25 }
 0xa59   :  { %v4389_v63 = vadd.f32 1.0, %v5635_v17  ;;  %v5637_v24 = vpop.eup %5636 }
 0xa5a   :  { %v4390_v43 = vadd.f32 1.0, %v5637_v24  ;;  %4524 = vmatprep.mubr.bf16.mxu0 %v4405_v48  ;;  %4565 = vmatprep.mubr.bf16.mxu1 %v4405_v48  ;;  %v5639_v45 = vpop.eup %5638 }
 0xa5b   :  { %5642 = vrcp.f32 %v4389_v63  ;;  %v5641_v11 = vpop.eup %5640 }
 0xa5c   :  { %5644 = vrcp.f32 %v4390_v43  ;;  %v4391_v53 = vadd.f32 1.0, %v5641_v11 }
 0xa5e   :  { %5646 = vrcp.f32 %v4391_v53 }
 0xa65   :  { %v5643_v21 = vpop.eup %5642 }
 0xa66   :  { %v4400_v13 = vmul.f32 %v5643_v21, %v5639_v45  ;;  %v5645_v37 = vpop.eup %5644 }
 0xa67   :  { %v4399_v50 = vmul.f32 %v5645_v37, %v7700_v54 }
 0xa68   :  { %v5647_v5 = vpop.eup %5646 }
 0xa69   :  { %v4401_v2 = vadd.f32 %v4400_v13, %v4399_v50 }
 0xa6b   :  { %5648 = vtanh.f32 %v4401_v2  ;;  %4601 = vst [vmem:[#allocation11] sm:$0xff] %v4401_v2 }
 0xa75   :  { %v5649_v6 = vpop.eup %5648 }
 0xa76   :  { %v4403_v61 = vmul.f32 %v5649_v6, %v5647_v5 }
 0xa78   :  { %v4404_v27 = vpack.c.bf16 %v4403_v61, %v4403_v61  ;;  %4600 = vst [vmem:[#allocation10] sm:$0xff] %v4403_v61 }
 0xa7a   :  { %4525 = vmatmul.mubr.bf16.vlgmr.msra.gmra.mrb[60].mxu0 %v4404_v27  ;;  %4566 = vmatmul.mubr.bf16.vlgmr.msra.gmra.mrb[92].mxu1 %v4404_v27 }
 0xb4d   :  { %v4526_v54 = vpop.f32.mrb[60].mxu0  ;;  %v4567_v34 = vpop.f32.mrb[92].mxu1 }
 0xb4e   :  { %v4527_v59 = vadd.f32 %v4526_v54, %v4475_v57  ;;  %v4528_v49 = vpop.f32.mrb[61].mxu0  ;;  %v4569_v42 = vpop.f32.mrb[93].mxu1  ;;  %v4568_v18 = vadd.f32 %v4567_v34, %v4483_v20 }
 0xb4f   :  { %v4529_v47 = vadd.f32 %v4528_v49, %v4479_v0  ;;  %v4530_v16 = vpop.f32.mrb[62].mxu0  ;;  %v4571_v40 = vpop.f32.mrb[94].mxu1  ;;  %v4570_v46 = vadd.f32 %v4569_v42, %v4487_v62 }
 0xb50   :  { %v5109_v38 = vmul.f32 -1.442695, %v4527_v59  ;;  %v4531_v8 = vpop.f32.mrb[63].mxu0  ;;  %v4572_v26 = vpop.f32.mrb[95].mxu1  ;;  %v5111_v3 = vmul.f32 -1.442695, %v4568_v18 }
 0xb51   :  { %v5110_v31 = vmul.f32 -1.442695, %v4529_v47 }
 0xb52   :  { %5650 = vpow2.f32 %v5109_v38 }
 0xb53   :  { %5652 = vpow2.f32 %v5110_v31 }
 0xb54   :  { %5654 = vtanh.f32 %v4570_v46 }
 0xb55   :  { %5656 = vpow2.f32 %v5111_v3 }
 0xb5c   :  { %v5651_v14 = vpop.eup %5650 }
 0xb5d   :  { %v4583_v52 = vadd.f32 1.0, %v5651_v14  ;;  %v5653_v36 = vpop.eup %5652 }
 0xb5e   :  { %v4584_v1 = vadd.f32 1.0, %v5653_v36  ;;  %v5655_v30 = vpop.eup %5654 }
 0xb5f   :  { %5658 = vrcp.f32 %v4583_v52  ;;  %v5657_v9 = vpop.eup %5656 }
 0xb60   :  { %5660 = vrcp.f32 %v4584_v1  ;;  %v4585_v7 = vadd.f32 1.0, %v5657_v9 }
 0xb62   :  { %5662 = vrcp.f32 %v4585_v7 }
 0xb69   :  { %v5659_v4 = vpop.eup %5658 }
 0xb6a   :  { %v4594_v32 = vmul.f32 %v5659_v4, %v5655_v30  ;;  %v5661_v28 = vpop.eup %5660 }
 0xb6b   :  { %v4593_v22 = vmul.f32 %v5661_v28, %v7807_v10 }
 0xb6c   :  { %v5663_v15 = vpop.eup %5662 }
 0xb6d   :  { %v4595_v12 = vadd.f32 %v4594_v32, %v4593_v22 }
 0xb6f   :  { %5664 = vtanh.f32 %v4595_v12  ;;  %4605 = vst [vmem:[#allocation11 + $0x8] sm:$0xff] %v4595_v12 }
 0xb79   :  { %v5665_v23 = vpop.eup %5664 }
 0xb7a   :  { %v4597_v29 = vmul.f32 %v5665_v23, %v5663_v15 }
 0xb7c   :  { %4603 = vst [vmem:[#allocation10 + $0x8] sm:$0xff] %v4597_v29 }
 0xb7d   :  { %5736 = dma.done.wait [#allocation6 + $0x1], 1024 }
 0xb7e   :  { %5737 = vsyncadd [#allocation6 + $0x1], 4294966272  ;;  %5128 = vmatpush3.bf16.msra.mxu0 %v8685_v41  ;;  %v8688_v35 = vld [vmem:[#allocation22_spill] sm:$0xff]  ;;  %5143 = vmatprep.mubr.bf16.mxu0 %v4618_v60  ;;  %v8689_v10 = vld [vmem:[#allocation23_spill] sm:$0xff]  ;;  %v4621_v11 = vpack.c.bf16 %v4597_v29, %v7814_v25  ;;  %s5754_s6 = smov [#allocation10]   ;;  %s5755_s5 = smov [#allocation11]  }
 0xb7f   :  { %5129 = vmatprep.subr.bf16.mxu0 %v8688_v35  ;;  %v8690_v58 = vld [vmem:[#allocation24_spill] sm:$0xff]  ;;  %v8691_v44 = vld [vmem:[#allocation25_spill] sm:$0xff]  ;;  %v8692_v56 = vld [vmem:[#allocation26_spill] sm:$0xff]  ;;  %s4717_s3 = sshll.u32 %s5754_s6, 4  ;;  %s4729_s8 = sshll.u32 %s5755_s5, 4  ;;  %s4718_s3 = int_to_ptr.vmem [resolvable:$true] %s4717_s3  ;;  %s4730_s8 = int_to_ptr.vmem [resolvable:$true] %s4729_s8 }
 0xb80   :  { %v8693_v51 = vld [vmem:[#allocation27_spill] sm:$0xff]  ;;  %v8694_v17 = vld [vmem:[#allocation28_spill] sm:$0xff]  ;;  %v8695_v63 = vld [vmem:[#allocation34_spill] sm:$0xff]  ;;  %s5688_s20 = scalar_lea.vmem %s4718_s3, 256  ;;  %p5693_p9 = scmp.lt.s32.totalorder %s4718_s3, %s4718_s3 }
 0xb81   :  { %v8696_v48 = vld [vmem:[#allocation48_spill] sm:$0xff]  ;;  %v8697_v43 = vld [vmem:[#allocation111_spill] sm:$0xff]  ;;  %p5689_p8 = scmp.ne.s32.totalorder %s4718_s3, %s5688_s20  ;;  %p5694_p10 = scmp.lt.s32.totalorder %s5688_s20, %s5688_s20 }
 0xb82   :  { %5130 = vmatpush3.bf16.msra.mxu0 %v8688_v35  ;;  %v4619_v24 = vpack.c.bf16 %v8696_v48, %v8695_v63  ;;  %v4620_v45 = vpack.c.bf16 %v7695_v19, %v8697_v43 }
 0xb83   :  { %5131 = vmatprep.subr.bf16.mxu0 %v8689_v10  ;;  %p5695_p11 = por %p5694_p10, %p5693_p9 }
 0xb85   :  { %p5696_p12 = pnand %p5695_p11, %p5689_p8 }
 0xb86   :  { %5132 = vmatpush3.bf16.msra.mxu0 %v8689_v10 }
 0xb87   :  { %5133 = vmatprep.subr.bf16.mxu0 %v8690_v58 }
 0xb8a   :  { %5134 = vmatpush3.bf16.msra.mxu0 %v8690_v58 }
 0xb8b   :  { %5135 = vmatprep.subr.bf16.mxu0 %v8691_v44 }
 0xb8e   :  { %5136 = vmatpush3.bf16.msra.mxu0 %v8691_v44 }
 0xb8f   :  { %5137 = vmatprep.subr.bf16.mxu0 %v8692_v56 }
 0xb92   :  { %5138 = vmatpush3.bf16.msra.mxu0 %v8692_v56 }
 0xb93   :  { %5139 = vmatprep.subr.bf16.mxu0 %v8693_v51 }
 0xb96   :  { %5140 = vmatpush3.bf16.msra.mxu0 %v8693_v51 }
 0xb97   :  { %5141 = vmatprep.subr.bf16.mxu0 %v8694_v17 }
 0xb9a   :  { %5142 = vmatpush3.bf16.msra.mxu0 %v8694_v17 }
 0xb9d   :  { %5144 = vmatmul.mubr.bf16.vlgmr.msra.gmra.mrb[64].mxu0 %v4619_v24 }
 0xb9e   :  { %5147 = vmatprep.mubr.bf16.mxu0 %v4620_v45 }
 0xba5   :  { %5148 = vmatmul.mubr.bf16.gmra.mrb[68].mxu0 %v4621_v11 }
 0xba6   :  { %5699 = shalt.err (!%p5696_p12)
}
 0xba7   :  { %s5700_s24 = scalar_lea.hbm %s7916_s11, 256 }
 0xba8   :  { %p5701_p13 = scmp.ne.s32.totalorder %s7916_s11, %s5700_s24  ;;  %p5704_p0 = scmp.lt.u32.totalorder %s5700_s24, %s7916_s11 }
 0xbaa   :  { %p5706_p1 = pnand %p5704_p0, %p5701_p13 }
 0xbac   :  { %5709 = shalt.err (!%p5706_p1)
}
 0xbad   :  { %s5756_s2 = smov 8   ;;  %s5710_s29 = scalar_lea.vmem %s4730_s8, 256 }
 0xbae   :  { %4723 = dma.vmem_to_hbm [thread:$0]  %s4718_s3, 256, %s7916_s11, [#allocation9], %s5748_s21, %s5748_s21, %s5756_s2  }
 0xbaf   :  { %p5711_p2 = scmp.ne.s32.totalorder %s4730_s8, %s5710_s29  ;;  %p5715_p3 = scmp.lt.s32.totalorder %s4730_s8, %s4730_s8 }
 0xbb0   :  { %p5716_p4 = scmp.lt.s32.totalorder %s5710_s29, %s5710_s29 }
 0xbb2   :  { %p5717_p5 = por %p5716_p4, %p5715_p3 }
 0xbb4   :  { %p5718_p6 = pnand %p5717_p5, %p5711_p2 }
 0xbb6   :  { %5721 = shalt.err (!%p5718_p6)
}
 0xbb7   :  { %s5722_s15 = scalar_lea.hbm %s7917_s12, 256 }
 0xbb8   :  { %p5723_p7 = scmp.ne.s32.totalorder %s7917_s12, %s5722_s15  ;;  %p5726_p8 = scmp.lt.u32.totalorder %s5722_s15, %s7917_s12 }
 0xbba   :  { %p5728_p9 = pnand %p5726_p8, %p5723_p7 }
 0xbbc   :  { %5731 = shalt.err (!%p5728_p9)
}
 0xbbd   :  { %4735 = dma.vmem_to_hbm [thread:$0]  %s4730_s8, 256, %s7917_s12, [#allocation12], %s5748_s21, %s5748_s21, %s5756_s2  }
 0xbbe   :  { %v5112_v19 = vld [vmem:[%s7912_s7] ss:$0 sm:$0xff] }
 0xc70   :  { %v5145_v25 = vpop.f32.mrb[64].mxu0 }
 0xc71   :  { %v4680_v21 = vadd.f32 %v5145_v25, %v5112_v19  ;;  %v4671_v13 = vpop.f32.mrb[65].mxu0 }
 0xc72   :  { %v4672_v37 = vadd.f32 %v5112_v19, %v4671_v13  ;;  %v5146_v53 = vpop.f32.mrb[66].mxu0 }
 0xc73   :  { %4704 = vst [vmem:[%s7915_s10 + $0x10] sm:$0xff] %v4680_v21  ;;  %v4683_v50 = vadd.f32 %v5146_v53, %v5112_v19  ;;  %v4674_v2 = vpop.f32.mrb[67].mxu0 }
 0xc74   :  { %4702 = vst [vmem:[%s7915_s10] sm:$0xff] %v4672_v37  ;;  %v4675_v5 = vadd.f32 %v5112_v19, %v4674_v2 }
 0xc75   :  { %4705 = vst [vmem:[%s7915_s10 + $0x18] sm:$0xff] %v4683_v50 }
 0xc76   :  { %4703 = vst [vmem:[%s7915_s10 + $0x8] sm:$0xff] %v4675_v5 }
 0xc78   :  { %v5149_v6 = vpop.f32.mrb[68].mxu0 }
 0xc79   :  { %v4696_v61 = vadd.f32 %v5149_v6, %v5112_v19  ;;  %v4687_v27 = vpop.f32.mrb[69].mxu0 }
 0xc7a   :  { %v4688_v55 = vadd.f32 %v5112_v19, %v4687_v27  ;;  %v5150_v57 = vpop.f32.mrb[70].mxu0 }
 0xc7b   :  { %4708 = vst [vmem:[%s7915_s10 + $0x30] sm:$0xff] %v4696_v61  ;;  %v4699_v0 = vadd.f32 %v5150_v57, %v5112_v19  ;;  %v4690_v54 = vpop.f32.mrb[71].mxu0 }
 0xc7c   :  { %4706 = vst [vmem:[%s7915_s10 + $0x20] sm:$0xff] %v4688_v55  ;;  %v4691_v34 = vadd.f32 %v5112_v19, %v4690_v54 }
 0xc7d   :  { %4709 = vst [vmem:[%s7915_s10 + $0x38] sm:$0xff] %v4699_v0 }
 0xc7e   :  { %4707 = vst [vmem:[%s7915_s10 + $0x28] sm:$0xff] %v4691_v34 }
 0xc7f   :  { %5738 = dma.done.wait [#allocation9], 256  }
 0xc80   :  { %5739 = vsyncadd [#allocation9], 4294967040 }
 0xc81   :  { %5740 = dma.done.wait [#allocation12], 256  }
 0xc82   :  { %5741 = vsyncadd [#allocation12], 4294967040 }
 0xc83   :  { %4744 = vsyncpa [#allocation8], 1 }
 0xc84   :  { %4745 = vsyncpa [#allocation9], 1 }
 0xc85   :  { %4746 = vsyncpa [#allocation12], 1 }
 0xc86   :  { %4747 = vsyncmov [#allocation6] }
 0xc89   :  { %s4748_s27 = vpop.sfrf %4747 }
 0xc8a   :  { %p5113_p10 = scmp.ne.s32.totalorder %s4748_s27, 0 }
 0xc8c   :  { %4752 = shalt.err (%p5113_p10)  }
 0xc8d   :  { %4754 = vsyncmov [#allocation6 + $0x1] }
 0xc90   :  { %s4755_s28 = vpop.sfrf %4754 }
 0xc91   :  { %p5114_p11 = scmp.ne.s32.totalorder %s4755_s28, 0 }
 0xc93   :  { %4759 = shalt.err (%p5114_p11)  }

</bundles_post_ra>
